<compile_context>
chip_gen: v5e
topology: v5e:2x2
jax: 0.10.0
libtpu: 0.0.40
codegen_flags: <defaults>
</compile_context>

<pallas_src>
import functools

import jax
import jax.numpy as jnp
from jax.experimental import pallas as pl
from jax.experimental.pallas import tpu as pltpu


# ----------------------------------------------------------------------------
# generation-aware VMEM budgets
# ----------------------------------------------------------------------------

def _tpu_vmem_capacity_bytes():
    try:
        info = pltpu.get_tpu_info()
        cap = int(getattr(info, "vmem_capacity_bytes", 0) or 0)
        if cap > 0:
            return cap
    except Exception:
        pass
    return 64 * 1024 * 1024  # conservative fallback (v7x per-TC VMEM)


_VMEM_CAP = _tpu_vmem_capacity_bytes()
# ~77 MiB on 128-MiB parts (v5e/v6e), ~38 MiB on v7x (64 MiB per TC).
_VMEM_LIMIT = max(32 * 1024 * 1024, min(int(_VMEM_CAP * 0.60), 100 * 1024 * 1024))
_MM_TILE_BUDGET = int(_VMEM_LIMIT * 0.80)          # joint tile budget for the conv matmul
_UPCONV_BAND_BUDGET = min(8 * 1024 * 1024, _VMEM_LIMIT // 4)


def _cdiv(a, b):
    return -(-a // b)


def _pad_axis(x, axis, target):
    pad = target - x.shape[axis]
    if pad <= 0:
        return x
    widths = [(0, 0)] * x.ndim
    widths[axis] = (0, pad)
    return jnp.pad(x, widths)


# ----------------------------------------------------------------------------
# joint tile selection for the conv matmul (bf16 operands, f32 accumulator)
# ----------------------------------------------------------------------------

def _conv_tiles(m, k, cout, budget):
    """Pick (tm, tn, tk) jointly under a VMEM byte budget.
    HBM traffic ~ M*K*(Cout/tn) + K*Cout*(M/tm), so tn -> full Cout first,
    then tm as large as possible, tk only has to fit (full K preferred)."""
    if cout > 512 and cout % 512 == 0:
        tn = 512
    elif cout > 512 and cout % 256 == 0:
        tn = 256
    else:
        tn = cout

    def fits(tm, tk):
        # dbl-buffered bf16 A + W + out, f32 accumulator scratch, bias/stats slivers
        return (2 * tm * tk * 2 + 2 * tk * tn * 2 + 2 * tm * tn * 2
                + tm * tn * 4 + 16 * tn * 4) <= budget

    tm_opts = [t for t in (512, 256, 128, 64, 32, 16) if t <= max(m, 16)] or [16]
    if k % 128 == 0:
        tk_opts = [d for d in range(k, 0, -128) if k % d == 0]      # divisors, 128-mult
    else:
        tk_opts = [k] + [t for t in (4096, 2048, 1024, 512, 256, 128) if t < k]

    for tm in tm_opts:
        for tk in tk_opts:
            if fits(tm, tk):
                # keep >= 2 parallel programs so v7x's two TensorCores both work
                while _cdiv(m, tm) * (cout // tn) < 2 and tm > 16:
                    tm //= 2
                m_pad = _cdiv(m, tm) * tm
                k_pad = _cdiv(k, tk) * tk
                return tm, tn, tk, m_pad, k_pad
    tm = 16
    tk = 128 if k > 128 else k
    return tm, tn, tk, _cdiv(m, tm) * tm, _cdiv(k, tk) * tk


# ----------------------------------------------------------------------------
# Pallas kernels
# ----------------------------------------------------------------------------

def _conv_mm_kernel(a_ref, w_ref, b_ref, o_ref, stats_ref, acc_ref, *, m_valid, tm):
    """Tiled matmul conv: acc += a @ w over the K grid axis (bf16 in, f32 acc).
    On the last K step add bias, store the (bf16) tile and emit per-channel
    (sum, sumsq) partials (padded rows masked out) for the BatchNorm that follows."""
    k = pl.program_id(2)

    @pl.when(k == 0)
    def _init():
        acc_ref[...] = jnp.zeros_like(acc_ref)

    acc_ref[...] += jnp.dot(a_ref[...], w_ref[...],
                            preferred_element_type=jnp.float32)

    @pl.when(k == pl.num_programs(2) - 1)
    def _finish():
        y = acc_ref[...] + b_ref[...]
        o_ref[...] = y.astype(o_ref.dtype)
        if m_valid is not None:  # M was padded: keep padded rows out of the stats
            rows = (pl.program_id(0) * tm
                    + jax.lax.broadcasted_iota(jnp.int32, y.shape, 0))
            y = jnp.where(rows < m_valid, y, 0.0)
        stats_ref[0, 0:1, :] = jnp.sum(y, axis=0, keepdims=True)
        stats_ref[0, 1:2, :] = jnp.sum(y * y, axis=0, keepdims=True)


def _upconv_kernel(x_ref, w_ref, b_ref, o_ref):
    """ConvTranspose2d(k=2, s=2) on one (batch, row-band) tile (bf16 in, f32 acc).
    x: (1, th, W, Cin); w: (2, Cin, 2*Cout) ordered (di, ci, (dj, co));
    b: (1, 2*Cout) f32; o: (1, th, 2, W, 2*Cout) bf16 — sub-pixel layout folded in."""
    _, th, w_in, cin = x_ref.shape
    two_cout = w_ref.shape[-1]
    x2 = x_ref[0].reshape(th * w_in, cin)
    for di in range(2):  # static unroll; slab-level stores
        y = jnp.dot(x2, w_ref[di], preferred_element_type=jnp.float32) + b_ref[...]
        o_ref[0, :, di, :, :] = y.reshape(th, w_in, two_cout).astype(o_ref.dtype)


# ----------------------------------------------------------------------------
# pallas_call wrappers
# ----------------------------------------------------------------------------

def _pick_band(n, h, w_sp, cin, cout, budget):
    """Largest row band (divisor of H) whose double-buffered blocks fit the budget;
    keeps >= 2 parallel grid programs when the batch alone cannot provide them."""
    for th in range(h, 0, -1):
        if h % th:
            continue
        if n == 1 and th == h and h > 1:
            continue
        blk = (2 * th * w_sp * cin * 2 + 2 * th * 2 * w_sp * 2 * cout * 2
               + 2 * 2 * cin * 2 * cout * 2 + 2 * cout * 4)
        if blk <= budget:
            return th
    return 1


def conv_transpose_2x2_s2(x_nhwc, w, b):
    """ConvTranspose2d(kernel=2, stride=2). x bf16, w: (Cin,2,2,Cout), b: (Cout,)."""
    n, h, w_sp, cin = x_nhwc.shape
    cout = w.shape[-1]
    wk = jnp.transpose(w, (1, 0, 2, 3)).reshape(2, cin, 2 * cout).astype(jnp.bfloat16)
    bk = jnp.tile(b, 2).reshape(1, 2 * cout).astype(jnp.float32)
    th = _pick_band(n, h, w_sp, cin, cout, _UPCONV_BAND_BUDGET)

    out = pl.pallas_call(
        _upconv_kernel,
        out_shape=jax.ShapeDtypeStruct((n, h, 2, w_sp, 2 * cout), jnp.bfloat16),
        grid=(n, h // th),
        in_specs=[pl.BlockSpec((1, th, w_sp, cin), lambda b_, i: (b_, i, 0, 0)),
                  pl.BlockSpec((2, cin, 2 * cout), lambda b_, i: (0, 0, 0)),
                  pl.BlockSpec((1, 2 * cout), lambda b_, i: (0, 0))],
        out_specs=pl.BlockSpec((1, th, 2, w_sp, 2 * cout),
                               lambda b_, i: (b_, i, 0, 0, 0)),
        compiler_params=pltpu.CompilerParams(
            dimension_semantics=("parallel", "parallel"),
            vmem_limit_bytes=_VMEM_LIMIT),
    )(x_nhwc, wk, bk)
    # (N, H, 2, W, 2*Cout) -> (N, 2H, 2W, Cout): pure row-major reshape (free).
    return out.reshape(n, 2 * h, 2 * w_sp, cout)


def _im2col3x3(x_nhwc):
    """(N,H,W,C) bf16 -> (N*H*W, 9*C) bf16, taps ordered (kh, kw, c)."""
    n, h, w, c = x_nhwc.shape
    xp = jnp.pad(x_nhwc, ((0, 0), (1, 1), (1, 1), (0, 0)))
    cols = [xp[:, kh:kh + h, kw:kw + w, :] for kh in range(3) for kw in range(3)]
    return jnp.concatenate(cols, axis=-1).reshape(n * h * w, 9 * c)


def conv3x3_mm(acol, wcol, b):
    """Tiled matmul conv: (M,K)bf16 @ (K,Cout)bf16 + b (f32 acc, bf16 out); also
    returns exact per-block per-channel (sum, sumsq) partials and the M tile."""
    m, k = acol.shape
    cout = wcol.shape[1]
    tm, tn, tk, m_pad, k_pad = _conv_tiles(m, k, cout, _MM_TILE_BUDGET)
    acol = _pad_axis(_pad_axis(acol, 0, m_pad), 1, k_pad)
    wcol = _pad_axis(wcol, 0, k_pad)
    grid = (m_pad // tm, cout // tn, k_pad // tk)

    kern = functools.partial(_conv_mm_kernel,
                             m_valid=(m if m_pad != m else None), tm=tm)
    out, stats = pl.pallas_call(
        kern,
        out_shape=(jax.ShapeDtypeStruct((m_pad, cout), jnp.bfloat16),
                   jax.ShapeDtypeStruct((grid[0], 2, cout), jnp.float32)),
        grid=grid,
        in_specs=[pl.BlockSpec((tm, tk), lambda mi, ni, ki: (mi, ki)),
                  pl.BlockSpec((tk, tn), lambda mi, ni, ki: (ki, ni)),
                  pl.BlockSpec((1, tn), lambda mi, ni, ki: (0, ni))],
        out_specs=(pl.BlockSpec((tm, tn), lambda mi, ni, ki: (mi, ni)),
                   pl.BlockSpec((1, 2, tn), lambda mi, ni, ki: (mi, 0, ni))),
        scratch_shapes=[pltpu.VMEM((tm, tn), jnp.float32)],
        compiler_params=pltpu.CompilerParams(
            dimension_semantics=("parallel", "parallel", "arbitrary"),
            vmem_limit_bytes=_VMEM_LIMIT),
    )(acol, wcol, b.reshape(1, cout).astype(jnp.float32))
    return out[:m], stats, tm


def _bn_scale_shift(stats, m, tm, gamma, beta, eps):
    """Training-mode BatchNorm scale/shift from per-block (sum, sumsq) partials.
    Uses a per-block shifted (Chan) combine to avoid E[x^2]-mean^2 cancellation."""
    s = stats[:, 0, :]
    q = stats[:, 1, :]
    g = stats.shape[0]
    counts = jnp.clip(m - jnp.arange(g) * tm, 1, tm).astype(jnp.float32)[:, None]
    mean_b = s / counts
    mean = jnp.sum(s, axis=0) / m
    m2 = jnp.sum((q - s * mean_b) + counts * (mean_b - mean) ** 2, axis=0)
    var = jnp.maximum(m2 / m, 0.0)                  # biased variance (train mode)
    scale = gamma * jax.lax.rsqrt(var + eps)
    shift = beta - mean * scale
    return scale, shift


# ----------------------------------------------------------------------------
# Module forward (UpBlockForUNetWithResNet50, upsampling_method='conv_transpose')
# ----------------------------------------------------------------------------

def up_block_forward(up_x_nchw, down_x_nchw, p, *, eps=1e-5):
    bf16 = jnp.bfloat16
    up_x = jnp.transpose(up_x_nchw, (0, 2, 3, 1)).astype(bf16)      # NCHW -> NHWC
    down_x = jnp.transpose(down_x_nchw, (0, 2, 3, 1)).astype(bf16)

    # 1) ConvTranspose2d(k=2, s=2), bias + sub-pixel scatter fused in-kernel.
    u = conv_transpose_2x2_s2(up_x, p['w_up'], p['b_up'])
    n, ho, wo, cu = u.shape
    cd = down_x.shape[-1]
    cout = p['w1'].shape[-1]

    # 2) conv_block_1: the channel concat is fused away — feed both im2col column
    #    blocks and split w1 into its up / skip halves.
    acol1 = jnp.concatenate([_im2col3x3(u), _im2col3x3(down_x)], axis=-1)
    wcol1 = jnp.concatenate(
        [p['w1'][:, :, :cu, :].reshape(9 * cu, cout),
         p['w1'][:, :, cu:, :].reshape(9 * cd, cout)], axis=0).astype(bf16)
    y1, st1, tm1 = conv3x3_mm(acol1, wcol1, p['b1'])
    s1, t1 = _bn_scale_shift(st1, y1.shape[0], tm1, p['g1'], p['be1'], eps)
    # BN+ReLU in plain jnp so XLA fuses it into conv2's im2col pad/concat.
    y1_act = jnp.maximum(y1.astype(jnp.float32) * s1 + t1, 0.0).astype(bf16)
    y1_act = y1_act.reshape(n, ho, wo, cout)

    # 3) conv_block_2
    acol2 = _im2col3x3(y1_act)
    wcol2 = p['w2'].reshape(9 * cout, cout).astype(bf16)
    y2, st2, tm2 = conv3x3_mm(acol2, wcol2, p['b2'])
    s2, t2 = _bn_scale_shift(st2, y2.shape[0], tm2, p['g2'], p['be2'], eps)
    y2_act = jnp.maximum(y2.astype(jnp.float32) * s2 + t2, 0.0)
    y2_act = y2_act.reshape(n, ho, wo, cout)

    return jnp.transpose(y2_act, (0, 3, 1, 2))                      # NHWC -> NCHW


def init_params(key, in_channels, out_channels):
    # up_conv_in_channels defaults to in_channels; up_conv_out_channels to out_channels
    up_cin, up_cout = in_channels, out_channels
    ks = jax.random.split(key, 10)
    s = 0.1
    return dict(
        w_up=s * jax.random.normal(ks[0], (up_cin, 2, 2, up_cout), jnp.float32),
        b_up=s * jax.random.normal(ks[1], (up_cout,), jnp.float32),
        w1=s * jax.random.normal(ks[2], (3, 3, in_channels, out_channels), jnp.float32),
        b1=s * jax.random.normal(ks[3], (out_channels,), jnp.float32),
        g1=1.0 + 0.1 * jax.random.normal(ks[4], (out_channels,), jnp.float32),
        be1=0.1 * jax.random.normal(ks[5], (out_channels,), jnp.float32),
        w2=s * jax.random.normal(ks[6], (3, 3, out_channels, out_channels), jnp.float32),
        b2=s * jax.random.normal(ks[7], (out_channels,), jnp.float32),
        g2=1.0 + 0.1 * jax.random.normal(ks[8], (out_channels,), jnp.float32),
        be2=0.1 * jax.random.normal(ks[9], (out_channels,), jnp.float32),
    )


# Pure-JAX reference, mirroring the kernel's bf16 cast points (f32 accumulation).
def ref_forward(up_x_nchw, down_x_nchw, p, *, eps=1e-5):
    f32, bf16 = jnp.float32, jnp.bfloat16
    up_x = jnp.transpose(up_x_nchw, (0, 2, 3, 1)).astype(bf16)
    down_x = jnp.transpose(down_x_nchw, (0, 2, 3, 1)).astype(bf16)
    n, h, w, _ = up_x.shape
    cu = p['w_up'].shape[-1]

    t = jnp.einsum('nhwc,cijo->nhwijo', up_x, p['w_up'].astype(bf16),
                   preferred_element_type=f32)
    t = t.transpose(0, 1, 3, 2, 4, 5).reshape(n, 2 * h, 2 * w, cu) + p['b_up']
    u = t.astype(bf16)
    x = jnp.concatenate([u, down_x], axis=-1)

    def conv_bn_relu(x_b, wk, b, g, be, out_f32=False):
        y = jax.lax.conv_general_dilated(
            x_b, wk.astype(bf16), (1, 1), 'SAME',
            dimension_numbers=('NHWC', 'HWIO', 'NHWC'),
            preferred_element_type=f32) + b
        mean = jnp.mean(y, axis=(0, 1, 2))
        var = jnp.mean((y - mean) ** 2, axis=(0, 1, 2))
        scale = g * jax.lax.rsqrt(var + eps)
        shift = be - mean * scale
        yb = y.astype(bf16).astype(f32)           # mirror the kernel's bf16 store
        out = jnp.maximum(yb * scale + shift, 0.0)
        return out if out_f32 else out.astype(bf16)

    x = conv_bn_relu(x, p['w1'], p['b1'], p['g1'], p['be1'])
    x = conv_bn_relu(x, p['w2'], p['b2'], p['g2'], p['be2'], out_f32=True)
    return jnp.transpose(x, (0, 3, 1, 2))


if __name__ == "__main__":
    key = jax.random.PRNGKey(0)
    N = 2
    in_channels, out_channels = 8, 4
    H = W = 16  # up_x spatial; upsampled to 32x32

    k_up, k_down, k_param = jax.random.split(key, 3)
    # NCHW inputs, matching the PyTorch module signature
    up_x = jax.random.normal(k_up, (N, in_channels, H, W), jnp.float32)
    # down_x channels = in_channels - up_conv_out_channels so concat == in_channels
    down_x = jax.random.normal(k_down, (N, in_channels - out_channels, 2 * H, 2 * W),
                               jnp.float32)
    params = init_params(k_param, in_channels, out_channels)

    fwd = jax.jit(up_block_forward)
    out = jax.block_until_ready(fwd(up_x, down_x, params))

    ref = jax.block_until_ready(ref_forward(up_x, down_x, params))
    assert out.shape == (N, out_channels, 2 * H, 2 * W), out.shape
    max_diff = jnp.max(jnp.abs(out - ref))
    assert jnp.allclose(out, ref, atol=2e-3, rtol=2e-3), f"max abs diff {max_diff}"

    print("KERNEL_OK")
</pallas_src>

<mosaic_0001>
module attributes {stable_mosaic.version = 11 : i64} {
  func.func @_upconv_kernel(%arg0: i32, %arg1: i32, %arg2: memref<1x16x16x8xbf16, #tpu.memory_space<vmem>>, %arg3: memref<2x8x8xbf16, #tpu.memory_space<vmem>>, %arg4: memref<1x8xf32, #tpu.memory_space<vmem>>, %arg5: memref<1x16x2x16x8xbf16, #tpu.memory_space<vmem>>) attributes {dimension_semantics = [#tpu.dimension_semantics<parallel>, #tpu.dimension_semantics<parallel>], iteration_bounds = array<i64: 2, 1>, scalar_prefetch = 0 : i64, scratch_operands = 0 : i64, tpu.core_type = #tpu.core_type<tc>, window_params = [{transform_indices = @transform_0, window_bounds = array<i64: 1, 16, 16, 8>}, {pipeline_mode = #tpu.pipeline_mode<synchronous>, transform_indices = @transform_1, window_bounds = array<i64: 2, 8, 8>}, {pipeline_mode = #tpu.pipeline_mode<synchronous>, transform_indices = @transform_2, window_bounds = array<i64: 1, 8>}, {transform_indices = @transform_3, window_bounds = array<i64: 1, 16, 2, 16, 8>}]} {
    %c0 = arith.constant 0 : index
    %c0_0 = arith.constant 0 : index
    %c0_1 = arith.constant 0 : index
    %c0_2 = arith.constant 0 : index
    %0 = vector.load %arg2[%c0, %c0_0, %c0_1, %c0_2] : memref<1x16x16x8xbf16, #tpu.memory_space<vmem>>, vector<1x16x16x8xbf16>
    %1 = vector.shape_cast %0 : vector<1x16x16x8xbf16> to vector<16x16x8xbf16>
    %2 = vector.shape_cast %1 : vector<16x16x8xbf16> to vector<256x8xbf16>
    %c0_3 = arith.constant 0 : index
    %c0_4 = arith.constant 0 : index
    %c0_5 = arith.constant 0 : index
    %3 = vector.load %arg3[%c0_3, %c0_4, %c0_5] : memref<2x8x8xbf16, #tpu.memory_space<vmem>>, vector<1x8x8xbf16>
    %4 = vector.shape_cast %3 : vector<1x8x8xbf16> to vector<8x8xbf16>
    %cst = arith.constant dense<0.000000e+00> : vector<256x8xf32>
    %5 = tpu.matmul %2, %4, %cst {dimension_numbers = #tpu.dot_dimension_numbers<[1], [0], [0], [1], [0, 0, 1, 1], [], []>} : vector<256x8xbf16>, vector<8x8xbf16>, vector<256x8xf32> -> vector<256x8xf32>
    %c0_6 = arith.constant 0 : index
    %c0_7 = arith.constant 0 : index
    %6 = vector.load %arg4[%c0_6, %c0_7] : memref<1x8xf32, #tpu.memory_space<vmem>>, vector<1x8xf32>
    %7 = vector.broadcast %6 : vector<1x8xf32> to vector<256x8xf32>
    %8 = arith.addf %5, %7 : vector<256x8xf32>
    %9 = vector.shape_cast %8 : vector<256x8xf32> to vector<16x16x8xf32>
    %10 = arith.truncf %9 : vector<16x16x8xf32> to vector<16x16x8xbf16>
    %c0_8 = arith.constant 0 : index
    %c0_9 = arith.constant 0 : index
    %c0_10 = arith.constant 0 : index
    %c0_11 = arith.constant 0 : index
    %c0_12 = arith.constant 0 : index
    %11 = vector.load %arg5[%c0_8, %c0_9, %c0_10, %c0_11, %c0_12] : memref<1x16x2x16x8xbf16, #tpu.memory_space<vmem>>, vector<1x16x1x16x8xbf16>
    %12 = vector.shape_cast %11 : vector<1x16x1x16x8xbf16> to vector<16x16x8xbf16>
    %13 = vector.shape_cast %10 : vector<16x16x8xbf16> to vector<1x16x1x16x8xbf16>
    tpu.vector_store %arg5[%c0_8, %c0_9, %c0_10, %c0_11, %c0_12], %13 {strides = array<i32>} : memref<1x16x2x16x8xbf16, #tpu.memory_space<vmem>>, vector<1x16x1x16x8xbf16>,
    %c1 = arith.constant 1 : index
    %c0_13 = arith.constant 0 : index
    %c0_14 = arith.constant 0 : index
    %14 = vector.load %arg3[%c1, %c0_13, %c0_14] : memref<2x8x8xbf16, #tpu.memory_space<vmem>>, vector<1x8x8xbf16>
    %15 = vector.shape_cast %14 : vector<1x8x8xbf16> to vector<8x8xbf16>
    %cst_15 = arith.constant dense<0.000000e+00> : vector<256x8xf32>
    %16 = tpu.matmul %2, %15, %cst_15 {dimension_numbers = #tpu.dot_dimension_numbers<[1], [0], [0], [1], [0, 0, 1, 1], [], []>} : vector<256x8xbf16>, vector<8x8xbf16>, vector<256x8xf32> -> vector<256x8xf32>
    %c0_16 = arith.constant 0 : index
    %c0_17 = arith.constant 0 : index
    %17 = vector.load %arg4[%c0_16, %c0_17] : memref<1x8xf32, #tpu.memory_space<vmem>>, vector<1x8xf32>
    %18 = vector.broadcast %17 : vector<1x8xf32> to vector<256x8xf32>
    %19 = arith.addf %16, %18 : vector<256x8xf32>
    %20 = vector.shape_cast %19 : vector<256x8xf32> to vector<16x16x8xf32>
    %21 = arith.truncf %20 : vector<16x16x8xf32> to vector<16x16x8xbf16>
    %c0_18 = arith.constant 0 : index
    %c0_19 = arith.constant 0 : index
    %c1_20 = arith.constant 1 : index
    %c0_21 = arith.constant 0 : index
    %c0_22 = arith.constant 0 : index
    %22 = vector.load %arg5[%c0_18, %c0_19, %c1_20, %c0_21, %c0_22] : memref<1x16x2x16x8xbf16, #tpu.memory_space<vmem>>, vector<1x16x1x16x8xbf16>
    %23 = vector.shape_cast %22 : vector<1x16x1x16x8xbf16> to vector<16x16x8xbf16>
    %24 = vector.shape_cast %21 : vector<16x16x8xbf16> to vector<1x16x1x16x8xbf16>
    tpu.vector_store %arg5[%c0_18, %c0_19, %c1_20, %c0_21, %c0_22], %24 {strides = array<i32>} : memref<1x16x2x16x8xbf16, #tpu.memory_space<vmem>>, vector<1x16x1x16x8xbf16>,
    return
  }
  func.func @transform_0(%arg0: i32, %arg1: i32) -> (i32, i32, i32, i32) {
    %c0_i32 = arith.constant 0 : i32
    %c0_i32_0 = arith.constant 0 : i32
    %c0_i32_1 = arith.constant 0 : i32
    return %arg0, %arg1, %c0_i32, %c0_i32_0 : i32, i32, i32, i32
  }
  func.func @transform_1(%arg0: i32, %arg1: i32) -> (i32, i32, i32) {
    %c0_i32 = arith.constant 0 : i32
    %c0_i32_0 = arith.constant 0 : i32
    %c0_i32_1 = arith.constant 0 : i32
    %c0_i32_2 = arith.constant 0 : i32
    return %c0_i32, %c0_i32_0, %c0_i32_1 : i32, i32, i32
  }
  func.func @transform_2(%arg0: i32, %arg1: i32) -> (i32, i32) {
    %c0_i32 = arith.constant 0 : i32
    %c0_i32_0 = arith.constant 0 : i32
    %c0_i32_1 = arith.constant 0 : i32
    return %c0_i32, %c0_i32_0 : i32, i32
  }
  func.func @transform_3(%arg0: i32, %arg1: i32) -> (i32, i32, i32, i32, i32) {
    %c0_i32 = arith.constant 0 : i32
    %c0_i32_0 = arith.constant 0 : i32
    %c0_i32_1 = arith.constant 0 : i32
    %c0_i32_2 = arith.constant 0 : i32
    return %arg0, %arg1, %c0_i32, %c0_i32_0, %c0_i32_1 : i32, i32, i32, i32, i32
  }
}

module attributes {stable_mosaic.version = 11 : i64} {
  func.func @_conv_mm_kernel(%arg0: i32, %arg1: i32, %arg2: i32, %arg3: memref<512x72xbf16, #tpu.memory_space<vmem>>, %arg4: memref<72x4xbf16, #tpu.memory_space<vmem>>, %arg5: memref<1x4xf32, #tpu.memory_space<vmem>>, %arg6: memref<512x4xbf16, #tpu.memory_space<vmem>>, %arg7: memref<1x2x4xf32, #tpu.memory_space<vmem>>, %arg8: memref<512x4xf32, #tpu.memory_space<vmem>>) attributes {dimension_semantics = [#tpu.dimension_semantics<parallel>, #tpu.dimension_semantics<parallel>, #tpu.dimension_semantics<arbitrary>], iteration_bounds = array<i64: 4, 1, 1>, scalar_prefetch = 0 : i64, scratch_operands = 1 : i64, tpu.core_type = #tpu.core_type<tc>, window_params = [{transform_indices = @transform_0, window_bounds = array<i64: 512, 72>}, {transform_indices = @transform_1, window_bounds = array<i64: 72, 4>}, {transform_indices = @transform_2, window_bounds = array<i64: 1, 4>}, {transform_indices = @transform_3, window_bounds = array<i64: 512, 4>}, {transform_indices = @transform_4, window_bounds = array<i64: 1, 2, 4>}]} {
    %c0_i32 = arith.constant 0 : i32
    %0 = arith.cmpi eq, %arg2, %c0_i32 : i32
    %1 = arith.extui %0 : i1 to i32
    %c0_i32_0 = arith.constant 0 : i32
    %2 = arith.cmpi ne, %1, %c0_i32_0 : i32
    scf.if %2 {
      %cst_10 = arith.constant 0.000000e+00 : f32
      %12 = vector.broadcast %cst_10 : f32 to vector<512x4xf32>
      %c0_11 = arith.constant 0 : index
      %c0_12 = arith.constant 0 : index
      %13 = vector.load %arg8[%c0_11, %c0_12] : memref<512x4xf32, #tpu.memory_space<vmem>>, vector<512x4xf32>
      tpu.vector_store %arg8[%c0_11, %c0_12], %12 {strides = array<i32>} : memref<512x4xf32, #tpu.memory_space<vmem>>, vector<512x4xf32>,
    } else {
    }
    %c0 = arith.constant 0 : index
    %c0_1 = arith.constant 0 : index
    %3 = vector.load %arg8[%c0, %c0_1] : memref<512x4xf32, #tpu.memory_space<vmem>>, vector<512x4xf32>
    %c0_2 = arith.constant 0 : index
    %c0_3 = arith.constant 0 : index
    %4 = vector.load %arg3[%c0_2, %c0_3] : memref<512x72xbf16, #tpu.memory_space<vmem>>, vector<512x72xbf16>
    %c0_4 = arith.constant 0 : index
    %c0_5 = arith.constant 0 : index
    %5 = vector.load %arg4[%c0_4, %c0_5] : memref<72x4xbf16, #tpu.memory_space<vmem>>, vector<72x4xbf16>
    %cst = arith.constant dense<0.000000e+00> : vector<512x4xf32>
    %6 = tpu.matmul %4, %5, %cst {dimension_numbers = #tpu.dot_dimension_numbers<[1], [0], [0], [1], [0, 0, 1, 1], [], []>} : vector<512x72xbf16>, vector<72x4xbf16>, vector<512x4xf32> -> vector<512x4xf32>
    %7 = arith.addf %3, %6 : vector<512x4xf32>
    %c0_6 = arith.constant 0 : index
    %c0_7 = arith.constant 0 : index
    %8 = vector.load %arg8[%c0_6, %c0_7] : memref<512x4xf32, #tpu.memory_space<vmem>>, vector<512x4xf32>
    tpu.vector_store %arg8[%c0_6, %c0_7], %7 {strides = array<i32>} : memref<512x4xf32, #tpu.memory_space<vmem>>, vector<512x4xf32>,
    %c0_i32_8 = arith.constant 0 : i32
    %9 = arith.cmpi eq, %arg2, %c0_i32_8 : i32
    %10 = arith.extui %9 : i1 to i32
    %c0_i32_9 = arith.constant 0 : i32
    %11 = arith.cmpi ne, %10, %c0_i32_9 : i32
    scf.if %11 {
      %c0_10 = arith.constant 0 : index
      %c0_11 = arith.constant 0 : index
      %12 = vector.load %arg8[%c0_10, %c0_11] : memref<512x4xf32, #tpu.memory_space<vmem>>, vector<512x4xf32>
      %c0_12 = arith.constant 0 : index
      %c0_13 = arith.constant 0 : index
      %13 = vector.load %arg5[%c0_12, %c0_13] : memref<1x4xf32, #tpu.memory_space<vmem>>, vector<1x4xf32>
      %14 = vector.broadcast %13 : vector<1x4xf32> to vector<512x4xf32>
      %15 = arith.addf %12, %14 : vector<512x4xf32>
      %16 = arith.truncf %15 : vector<512x4xf32> to vector<512x4xbf16>
      %c0_14 = arith.constant 0 : index
      %c0_15 = arith.constant 0 : index
      %17 = vector.load %arg6[%c0_14, %c0_15] : memref<512x4xbf16, #tpu.memory_space<vmem>>, vector<512x4xbf16>
      tpu.vector_store %arg6[%c0_14, %c0_15], %16 {strides = array<i32>} : memref<512x4xbf16, #tpu.memory_space<vmem>>, vector<512x4xbf16>,
      %cst_16 = arith.constant dense<0.000000e+00> : vector<4xf32>
      %18 = vector.multi_reduction <add>, %15, %cst_16 [0] : vector<512x4xf32> to vector<4xf32>
      %19 = vector.shape_cast %18 : vector<4xf32> to vector<1x4xf32>
      %c0_17 = arith.constant 0 : index
      %c0_18 = arith.constant 0 : index
      %c0_19 = arith.constant 0 : index
      %20 = vector.load %arg7[%c0_17, %c0_18, %c0_19] : memref<1x2x4xf32, #tpu.memory_space<vmem>>, vector<1x1x4xf32>
      %21 = vector.shape_cast %20 : vector<1x1x4xf32> to vector<1x4xf32>
      %22 = vector.shape_cast %19 : vector<1x4xf32> to vector<1x1x4xf32>
      tpu.vector_store %arg7[%c0_17, %c0_18, %c0_19], %22 {strides = array<i32>} : memref<1x2x4xf32, #tpu.memory_space<vmem>>, vector<1x1x4xf32>,
      %23 = arith.mulf %15, %15 : vector<512x4xf32>
      %cst_20 = arith.constant dense<0.000000e+00> : vector<4xf32>
      %24 = vector.multi_reduction <add>, %23, %cst_20 [0] : vector<512x4xf32> to vector<4xf32>
      %25 = vector.shape_cast %24 : vector<4xf32> to vector<1x4xf32>
      %c0_21 = arith.constant 0 : index
      %c1 = arith.constant 1 : index
      %c0_22 = arith.constant 0 : index
      %26 = vector.load %arg7[%c0_21, %c1, %c0_22] : memref<1x2x4xf32, #tpu.memory_space<vmem>>, vector<1x1x4xf32>
      %27 = vector.shape_cast %26 : vector<1x1x4xf32> to vector<1x4xf32>
      %28 = vector.shape_cast %25 : vector<1x4xf32> to vector<1x1x4xf32>
      tpu.vector_store %arg7[%c0_21, %c1, %c0_22], %28 {strides = array<i32>} : memref<1x2x4xf32, #tpu.memory_space<vmem>>, vector<1x1x4xf32>,
    } else {
    }
    return
  }
  func.func @transform_0(%arg0: i32, %arg1: i32, %arg2: i32) -> (i32, i32) {
    %c0_i32 = arith.constant 0 : i32
    return %arg0, %arg2 : i32, i32
  }
  func.func @transform_1(%arg0: i32, %arg1: i32, %arg2: i32) -> (i32, i32) {
    %c0_i32 = arith.constant 0 : i32
    return %arg2, %arg1 : i32, i32
  }
  func.func @transform_2(%arg0: i32, %arg1: i32, %arg2: i32) -> (i32, i32) {
    %c0_i32 = arith.constant 0 : i32
    %c0_i32_0 = arith.constant 0 : i32
    return %c0_i32, %arg1 : i32, i32
  }
  func.func @transform_3(%arg0: i32, %arg1: i32, %arg2: i32) -> (i32, i32) {
    %c0_i32 = arith.constant 0 : i32
    return %arg0, %arg1 : i32, i32
  }
  func.func @transform_4(%arg0: i32, %arg1: i32, %arg2: i32) -> (i32, i32, i32) {
    %c0_i32 = arith.constant 0 : i32
    %c0_i32_0 = arith.constant 0 : i32
    return %arg0, %c0_i32, %arg1 : i32, i32, i32
  }
}

module attributes {stable_mosaic.version = 11 : i64} {
  func.func @_conv_mm_kernel(%arg0: i32, %arg1: i32, %arg2: i32, %arg3: memref<512x36xbf16, #tpu.memory_space<vmem>>, %arg4: memref<36x4xbf16, #tpu.memory_space<vmem>>, %arg5: memref<1x4xf32, #tpu.memory_space<vmem>>, %arg6: memref<512x4xbf16, #tpu.memory_space<vmem>>, %arg7: memref<1x2x4xf32, #tpu.memory_space<vmem>>, %arg8: memref<512x4xf32, #tpu.memory_space<vmem>>) attributes {dimension_semantics = [#tpu.dimension_semantics<parallel>, #tpu.dimension_semantics<parallel>, #tpu.dimension_semantics<arbitrary>], iteration_bounds = array<i64: 4, 1, 1>, scalar_prefetch = 0 : i64, scratch_operands = 1 : i64, tpu.core_type = #tpu.core_type<tc>, window_params = [{transform_indices = @transform_0, window_bounds = array<i64: 512, 36>}, {transform_indices = @transform_1, window_bounds = array<i64: 36, 4>}, {transform_indices = @transform_2, window_bounds = array<i64: 1, 4>}, {transform_indices = @transform_3, window_bounds = array<i64: 512, 4>}, {transform_indices = @transform_4, window_bounds = array<i64: 1, 2, 4>}]} {
    %c0_i32 = arith.constant 0 : i32
    %0 = arith.cmpi eq, %arg2, %c0_i32 : i32
    %1 = arith.extui %0 : i1 to i32
    %c0_i32_0 = arith.constant 0 : i32
    %2 = arith.cmpi ne, %1, %c0_i32_0 : i32
    scf.if %2 {
      %cst_10 = arith.constant 0.000000e+00 : f32
      %12 = vector.broadcast %cst_10 : f32 to vector<512x4xf32>
      %c0_11 = arith.constant 0 : index
      %c0_12 = arith.constant 0 : index
      %13 = vector.load %arg8[%c0_11, %c0_12] : memref<512x4xf32, #tpu.memory_space<vmem>>, vector<512x4xf32>
      tpu.vector_store %arg8[%c0_11, %c0_12], %12 {strides = array<i32>} : memref<512x4xf32, #tpu.memory_space<vmem>>, vector<512x4xf32>,
    } else {
    }
    %c0 = arith.constant 0 : index
    %c0_1 = arith.constant 0 : index
    %3 = vector.load %arg8[%c0, %c0_1] : memref<512x4xf32, #tpu.memory_space<vmem>>, vector<512x4xf32>
    %c0_2 = arith.constant 0 : index
    %c0_3 = arith.constant 0 : index
    %4 = vector.load %arg3[%c0_2, %c0_3] : memref<512x36xbf16, #tpu.memory_space<vmem>>, vector<512x36xbf16>
    %c0_4 = arith.constant 0 : index
    %c0_5 = arith.constant 0 : index
    %5 = vector.load %arg4[%c0_4, %c0_5] : memref<36x4xbf16, #tpu.memory_space<vmem>>, vector<36x4xbf16>
    %cst = arith.constant dense<0.000000e+00> : vector<512x4xf32>
    %6 = tpu.matmul %4, %5, %cst {dimension_numbers = #tpu.dot_dimension_numbers<[1], [0], [0], [1], [0, 0, 1, 1], [], []>} : vector<512x36xbf16>, vector<36x4xbf16>, vector<512x4xf32> -> vector<512x4xf32>
    %7 = arith.addf %3, %6 : vector<512x4xf32>
    %c0_6 = arith.constant 0 : index
    %c0_7 = arith.constant 0 : index
    %8 = vector.load %arg8[%c0_6, %c0_7] : memref<512x4xf32, #tpu.memory_space<vmem>>, vector<512x4xf32>
    tpu.vector_store %arg8[%c0_6, %c0_7], %7 {strides = array<i32>} : memref<512x4xf32, #tpu.memory_space<vmem>>, vector<512x4xf32>,
    %c0_i32_8 = arith.constant 0 : i32
    %9 = arith.cmpi eq, %arg2, %c0_i32_8 : i32
    %10 = arith.extui %9 : i1 to i32
    %c0_i32_9 = arith.constant 0 : i32
    %11 = arith.cmpi ne, %10, %c0_i32_9 : i32
    scf.if %11 {
      %c0_10 = arith.constant 0 : index
      %c0_11 = arith.constant 0 : index
      %12 = vector.load %arg8[%c0_10, %c0_11] : memref<512x4xf32, #tpu.memory_space<vmem>>, vector<512x4xf32>
      %c0_12 = arith.constant 0 : index
      %c0_13 = arith.constant 0 : index
      %13 = vector.load %arg5[%c0_12, %c0_13] : memref<1x4xf32, #tpu.memory_space<vmem>>, vector<1x4xf32>
      %14 = vector.broadcast %13 : vector<1x4xf32> to vector<512x4xf32>
      %15 = arith.addf %12, %14 : vector<512x4xf32>
      %16 = arith.truncf %15 : vector<512x4xf32> to vector<512x4xbf16>
      %c0_14 = arith.constant 0 : index
      %c0_15 = arith.constant 0 : index
      %17 = vector.load %arg6[%c0_14, %c0_15] : memref<512x4xbf16, #tpu.memory_space<vmem>>, vector<512x4xbf16>
      tpu.vector_store %arg6[%c0_14, %c0_15], %16 {strides = array<i32>} : memref<512x4xbf16, #tpu.memory_space<vmem>>, vector<512x4xbf16>,
      %cst_16 = arith.constant dense<0.000000e+00> : vector<4xf32>
      %18 = vector.multi_reduction <add>, %15, %cst_16 [0] : vector<512x4xf32> to vector<4xf32>
      %19 = vector.shape_cast %18 : vector<4xf32> to vector<1x4xf32>
      %c0_17 = arith.constant 0 : index
      %c0_18 = arith.constant 0 : index
      %c0_19 = arith.constant 0 : index
      %20 = vector.load %arg7[%c0_17, %c0_18, %c0_19] : memref<1x2x4xf32, #tpu.memory_space<vmem>>, vector<1x1x4xf32>
      %21 = vector.shape_cast %20 : vector<1x1x4xf32> to vector<1x4xf32>
      %22 = vector.shape_cast %19 : vector<1x4xf32> to vector<1x1x4xf32>
      tpu.vector_store %arg7[%c0_17, %c0_18, %c0_19], %22 {strides = array<i32>} : memref<1x2x4xf32, #tpu.memory_space<vmem>>, vector<1x1x4xf32>,
      %23 = arith.mulf %15, %15 : vector<512x4xf32>
      %cst_20 = arith.constant dense<0.000000e+00> : vector<4xf32>
      %24 = vector.multi_reduction <add>, %23, %cst_20 [0] : vector<512x4xf32> to vector<4xf32>
      %25 = vector.shape_cast %24 : vector<4xf32> to vector<1x4xf32>
      %c0_21 = arith.constant 0 : index
      %c1 = arith.constant 1 : index
      %c0_22 = arith.constant 0 : index
      %26 = vector.load %arg7[%c0_21, %c1, %c0_22] : memref<1x2x4xf32, #tpu.memory_space<vmem>>, vector<1x1x4xf32>
      %27 = vector.shape_cast %26 : vector<1x1x4xf32> to vector<1x4xf32>
      %28 = vector.shape_cast %25 : vector<1x4xf32> to vector<1x1x4xf32>
      tpu.vector_store %arg7[%c0_21, %c1, %c0_22], %28 {strides = array<i32>} : memref<1x2x4xf32, #tpu.memory_space<vmem>>, vector<1x1x4xf32>,
    } else {
    }
    return
  }
  func.func @transform_0(%arg0: i32, %arg1: i32, %arg2: i32) -> (i32, i32) {
    %c0_i32 = arith.constant 0 : i32
    return %arg0, %arg2 : i32, i32
  }
  func.func @transform_1(%arg0: i32, %arg1: i32, %arg2: i32) -> (i32, i32) {
    %c0_i32 = arith.constant 0 : i32
    return %arg2, %arg1 : i32, i32
  }
  func.func @transform_2(%arg0: i32, %arg1: i32, %arg2: i32) -> (i32, i32) {
    %c0_i32 = arith.constant 0 : i32
    %c0_i32_0 = arith.constant 0 : i32
    return %c0_i32, %arg1 : i32, i32
  }
  func.func @transform_3(%arg0: i32, %arg1: i32, %arg2: i32) -> (i32, i32) {
    %c0_i32 = arith.constant 0 : i32
    return %arg0, %arg1 : i32, i32
  }
  func.func @transform_4(%arg0: i32, %arg1: i32, %arg2: i32) -> (i32, i32, i32) {
    %c0_i32 = arith.constant 0 : i32
    %c0_i32_0 = arith.constant 0 : i32
    return %arg0, %c0_i32, %arg1 : i32, i32, i32
  }
}

</mosaic_0001>

<bundles_post_ra>
// kernel: tile.8
= control target key start
LH: loop header
LB: loop body
LE: loop exit
PB: predicated region body
PF: predicated region fallthrough
CT: control target
= control target key end

     0   :  { %s22_s0 = inlined_call_operand.vmem [shape: f32[4], index: 0, kind: input, shape index: {}]   ;;  %s23_s1 = inlined_call_operand.vmem [shape: f32[2,4], index: 1, kind: output, shape index: {}]  }
   0x1   :  { %v4_v0 = vld [vmem:[%s22_s0] ss:$0 sm:$0xff] }
   0x2   :  { %5 = vst [vmem:[%s23_s1] sm:$0x3] %v4_v0 }

// kernel: tile.9
= control target key start
LH: loop header
LB: loop body
LE: loop exit
PB: predicated region body
PF: predicated region fallthrough
CT: control target
= control target key end

     0   :  { %vm7_vm0 = vcmask 31744   ;;  %vm13_vm1 = vcmask 64544   ;;  %s39_s0 = inlined_call_operand.vmem [shape: f32[2,4], index: 0, kind: input, shape index: {}]   ;;  %s40_s1 = inlined_call_operand.vmem [shape: f32[1,8], index: 1, kind: output, shape index: {}]  }
   0x1   :  { %v4_v0 = vld [vmem:[%s39_s0] sm:$0x3]  ;;  %s22_s0 = smov 4  }
   0x2   :  { %5 = vst [vmem:[#allocation1] sm:$0x3] %v4_v0 }
   0x9   :  { %v10_v1 = vld [vmem:[#allocation1 + $0x1] sm:$0x1]   ;;  %v6_v2 = vld [vmem:[#allocation1] sm:$0x1]  }
   0xa   :  { %11 = vrot.lane.b32.xlu0 %v10_v1, %s22_s0  ;;  %8 = vst.msk [vmem:[#allocation0] sm:$0x1] %vm7_vm0, %v6_v2  }
  0x7c   :  { %v12_v3 = vpop.permute.xlu0 %11  }
  0x7d   :  { %14 = vst.msk [vmem:[#allocation0] sm:$0x1] %vm13_vm1, %v12_v3  }
  0x84   :  { %v17_v4 = vld [vmem:[#allocation0] sm:$0x1] }
  0x85   :  { %20 = vst [vmem:[%s40_s1] sm:$0x1] %v17_v4 }

// kernel: up_block_forward.3
= control target key start
LH: loop header
LB: loop body
LE: loop exit
PB: predicated region body
PF: predicated region fallthrough
CT: control target
= control target key end

     0   :  { %s1029_s12 = smov 0   ;;  %s1031_s13 = smov 0   ;;  %s1326_s0 = inlined_call_operand.vmem [shape: bf16[2,16,16,8], index: 0, kind: input, shape index: {}]   ;;  %s1327_s1 = inlined_call_operand.vmem [shape: bf16[2,8,8], index: 1, kind: input, shape index: {}]   ;;  %s1328_s2 = inlined_call_operand.vmem [shape: f32[1,8], index: 2, kind: input, shape index: {}]   ;;  %s1329_s3 = inlined_call_operand.vmem [shape: bf16[2,16,2,16,8], index: 3, kind: output, shape index: {}]  }
   0x1   :  { %s1033_s14 = smov 0  }
   0x2 LB: > { %s25_s15 = sadd.s32 1, %s1003_s13  ;;  %p803_p0 = scmp.ge.s32.totalorder %s1007_s14, 1  ;;  %s1007_s14 = sphi %s1033_s14, %s13_s14   ;;  %s1003_s13 = sphi %s1031_s13, %s1331_s13   ;;  %s999_s12 = sphi %s1029_s12, %s1330_s12  }
   0x3   : > { %p27_p1 = scmp.ge.s32.totalorder %s25_s15, 2  ;;  %p159_p2 = scmp.lt.s32.totalorder %s1007_s14, 3 }
   0x5   : > { %s1333_s15 = smov (%p27_p1, %s25_s15), 0  ;;  %p160_p3 = pnand %p803_p0, %p159_p2 }
   0x6   : > { %p194_p4 = scmp.lt.s32.totalorder (!%p160_p3), %s999_s12, 1 }
   0x7   : > { %163 = sbr.rel (%p160_p3) target bundleno = 275 (0x113), region = 32 }
   0xc   : > { %v248_v0 = vld [vmem:[%s1327_s1] sm:$0xf]  ;;  %vm382_vm0 = vcmask 1043456   ;;  %v888_v1 = vld [vmem:[%s1327_s1 + $0x4] sm:$0xf]  ;;  %s1335_s12 = smov (!%p194_p4, %s999_s12), 1 }
   0xd   : > { %v384_v2 = vsel %vm382_vm0, %v248_v0, 0  ;;  %v547_v3 = vsel %vm382_vm0, %v888_v1, 0  ;;  %s939_s20 = sshll.u32 %s1335_s12, 7  ;;  %vm333_vm1 = vcmask 64512   ;;  %v1112_v20 = vld [vmem:[%s1328_s2] ss:$0 sm:$0xff] }
   0xe   : > { %393 = vmatpush.bf16.msra.mxu0 %v384_v2  ;;  %957 = vmatpush.bf16.msra.mxu2 %v384_v2  ;;  %s1059_s23 = scalar_lea.vmem %s1326_s0, %s939_s20  ;;  %v1117_v21 = vld [vmem:[%s1328_s2] ss:$0 sm:$0xff]  ;;  %s940_s28 = sshll.u32 %s1335_s12, 8  ;;  %vm507_vm2 = vcmask 60416  }
   0xf   : > { %556 = vmatpush.bf16.msra.mxu1 %v547_v3  ;;  %958 = vmatpush.bf16.msra.mxu3 %v547_v3  ;;  %v941_v4 = vld [vmem:[%s1059_s23] sm:$0xff]  ;;  %v942_v6 = vld [vmem:[%s1059_s23 + $0x8] sm:$0xff]  ;;  %v943_v8 = vld [vmem:[%s1059_s23 + $0x10] sm:$0xff]  ;;  %s1124_s4 = scalar_lea.vmem %s1329_s3, %s940_s28 }
  0x10   : > { %v949_v5 = vld [vmem:[%s1059_s23 + $0x40] sm:$0xff]  ;;  %v950_v7 = vld [vmem:[%s1059_s23 + $0x48] sm:$0xff]  ;;  %v951_v9 = vld [vmem:[%s1059_s23 + $0x50] sm:$0xff] }
  0x11   : > { %872 = vmatmul.msk.bf16.vlgmr.msra.gmra.mxu0 %vm333_vm1, %v941_v4  ;;  %880 = vmatmul.msk.bf16.vlgmr.msra.gmra.mxu2 %vm333_vm1, %v949_v5  ;;  %v944_v10 = vld [vmem:[%s1059_s23 + $0x18] sm:$0xff]  ;;  %v945_v12 = vld [vmem:[%s1059_s23 + $0x20] sm:$0xff]  ;;  %v946_v14 = vld [vmem:[%s1059_s23 + $0x28] sm:$0xff] }
  0x12   : > { %889 = vmatmul.msk.bf16.vlgmr.msra.gmra.mxu1 %vm333_vm1, %v941_v4  ;;  %897 = vmatmul.msk.bf16.vlgmr.msra.gmra.mxu3 %vm333_vm1, %v949_v5  ;;  %v952_v11 = vld [vmem:[%s1059_s23 + $0x58] sm:$0xff]  ;;  %v953_v13 = vld [vmem:[%s1059_s23 + $0x60] sm:$0xff]  ;;  %v954_v15 = vld [vmem:[%s1059_s23 + $0x68] sm:$0xff] }
  0x13   : > { %v947_v16 = vld [vmem:[%s1059_s23 + $0x30] sm:$0xff]  ;;  %v948_v18 = vld [vmem:[%s1059_s23 + $0x38] sm:$0xff] }
  0x14   : > { %v955_v17 = vld [vmem:[%s1059_s23 + $0x70] sm:$0xff]  ;;  %v956_v19 = vld [vmem:[%s1059_s23 + $0x78] sm:$0xff] }
  0x21   : > { %873 = vmatmul.msk.bf16.gmra.mxu0 %vm333_vm1, %v942_v6  ;;  %881 = vmatmul.msk.bf16.gmra.mxu2 %vm333_vm1, %v950_v7 }
  0x22   : > { %890 = vmatmul.msk.bf16.gmra.mxu1 %vm333_vm1, %v942_v6  ;;  %898 = vmatmul.msk.bf16.gmra.mxu3 %vm333_vm1, %v950_v7 }
  0x31   : > { %874 = vmatmul.msk.bf16.gmra.mxu0 %vm333_vm1, %v943_v8  ;;  %882 = vmatmul.msk.bf16.gmra.mxu2 %vm333_vm1, %v951_v9 }
  0x32   : > { %891 = vmatmul.msk.bf16.gmra.mxu1 %vm333_vm1, %v943_v8  ;;  %899 = vmatmul.msk.bf16.gmra.mxu3 %vm333_vm1, %v951_v9 }
  0x41   : > { %875 = vmatmul.msk.bf16.gmra.mxu0 %vm333_vm1, %v944_v10  ;;  %883 = vmatmul.msk.bf16.gmra.mxu2 %vm333_vm1, %v952_v11 }
  0x42   : > { %892 = vmatmul.msk.bf16.gmra.mxu1 %vm333_vm1, %v944_v10  ;;  %900 = vmatmul.msk.bf16.gmra.mxu3 %vm333_vm1, %v952_v11 }
  0x51   : > { %876 = vmatmul.msk.bf16.gmra.mxu0 %vm333_vm1, %v945_v12  ;;  %884 = vmatmul.msk.bf16.gmra.mxu2 %vm333_vm1, %v953_v13 }
  0x52   : > { %893 = vmatmul.msk.bf16.gmra.mxu1 %vm333_vm1, %v945_v12  ;;  %901 = vmatmul.msk.bf16.gmra.mxu3 %vm333_vm1, %v953_v13 }
  0x61   : > { %877 = vmatmul.msk.bf16.gmra.mxu0 %vm333_vm1, %v946_v14  ;;  %885 = vmatmul.msk.bf16.gmra.mxu2 %vm333_vm1, %v954_v15 }
  0x62   : > { %894 = vmatmul.msk.bf16.gmra.mxu1 %vm333_vm1, %v946_v14  ;;  %902 = vmatmul.msk.bf16.gmra.mxu3 %vm333_vm1, %v954_v15 }
  0x71   : > { %878 = vmatmul.msk.bf16.gmra.mxu0 %vm333_vm1, %v947_v16  ;;  %886 = vmatmul.msk.bf16.gmra.mxu2 %vm333_vm1, %v955_v17 }
  0x72   : > { %895 = vmatmul.msk.bf16.gmra.mxu1 %vm333_vm1, %v947_v16  ;;  %903 = vmatmul.msk.bf16.gmra.mxu3 %vm333_vm1, %v955_v17 }
  0x81   : > { %879 = vmatmul.msk.bf16.gmra.mxu0 %vm333_vm1, %v948_v18  ;;  %887 = vmatmul.msk.bf16.gmra.mxu2 %vm333_vm1, %v956_v19 }
  0x82   : > { %896 = vmatmul.msk.bf16.gmra.mxu1 %vm333_vm1, %v948_v18  ;;  %904 = vmatmul.msk.bf16.gmra.mxu3 %vm333_vm1, %v956_v19 }
  0x8e   : > { %v395_v22 = vpop.f32.mrf.mxu0 }
  0x8f   : > { %v396_v23 = vadd.f32 %v1112_v20, %v395_v22  ;;  %v558_v24 = vpop.f32.mrf.mxu1 }
  0x90   : > { %v559_v25 = vadd.f32 %v1117_v21, %v558_v24 }
  0x91   : > { %v475_v26 = vpack.c.bf16 %v396_v23, %v396_v23 }
  0x92   : > { %v638_v27 = vpack.c.bf16 %v559_v25, %v559_v25 }
  0x93   : > { %508 = vst.msk [vmem:[%s1124_s4] sm:$0xf] %vm507_vm2, %v475_v26 }
  0x94   : > { %905 = vst.msk [vmem:[%s1124_s4 + $0x8] sm:$0xf] %vm507_vm2, %v638_v27  ;;  %v435_v28 = vpop.f32.mrf.mxu2 }
  0x95   : > { %v436_v29 = vadd.f32 %v1112_v20, %v435_v28  ;;  %v598_v30 = vpop.f32.mrf.mxu3 }
  0x96   : > { %v599_v31 = vadd.f32 %v1117_v21, %v598_v30  ;;  %v397_v32 = vpop.f32.mrf.mxu0 }
  0x97   : > { %v491_v33 = vpack.c.bf16 %v436_v29, %v436_v29  ;;  %v398_v34 = vadd.f32 %v1112_v20, %v397_v32  ;;  %v560_v35 = vpop.f32.mrf.mxu1 }
  0x98   : > { %v654_v36 = vpack.c.bf16 %v599_v31, %v599_v31  ;;  %v561_v37 = vadd.f32 %v1117_v21, %v560_v35 }
  0x99   : > { %524 = vst.msk [vmem:[%s1124_s4 + $0x80] sm:$0xf] %vm507_vm2, %v491_v33  ;;  %v476_v38 = vpack.c.bf16 %v398_v34, %v398_v34 }
  0x9a   : > { %921 = vst.msk [vmem:[%s1124_s4 + $0x88] sm:$0xf] %vm507_vm2, %v654_v36  ;;  %v639_v39 = vpack.c.bf16 %v561_v37, %v561_v37 }
  0x9b   : > { %509 = vst.msk [vmem:[%s1124_s4 + $0x4] sm:$0xf] %vm507_vm2, %v476_v38 }
  0x9c   : > { %906 = vst.msk [vmem:[%s1124_s4 + $0xc] sm:$0xf] %vm507_vm2, %v639_v39  ;;  %v437_v40 = vpop.f32.mrf.mxu2 }
  0x9d   : > { %v438_v41 = vadd.f32 %v1112_v20, %v437_v40  ;;  %v600_v42 = vpop.f32.mrf.mxu3 }
  0x9e   : > { %v601_v43 = vadd.f32 %v1117_v21, %v600_v42  ;;  %v400_v44 = vpop.f32.mrf.mxu0 }
  0x9f   : > { %v492_v45 = vpack.c.bf16 %v438_v41, %v438_v41  ;;  %v401_v46 = vadd.f32 %v1112_v20, %v400_v44  ;;  %v563_v47 = vpop.f32.mrf.mxu1 }
  0xa0   : > { %v655_v48 = vpack.c.bf16 %v601_v43, %v601_v43  ;;  %v564_v49 = vadd.f32 %v1117_v21, %v563_v47 }
  0xa1   : > { %525 = vst.msk [vmem:[%s1124_s4 + $0x84] sm:$0xf] %vm507_vm2, %v492_v45  ;;  %v477_v50 = vpack.c.bf16 %v401_v46, %v401_v46 }
  0xa2   : > { %922 = vst.msk [vmem:[%s1124_s4 + $0x8c] sm:$0xf] %vm507_vm2, %v655_v48  ;;  %v640_v51 = vpack.c.bf16 %v564_v49, %v564_v49 }
  0xa3   : > { %510 = vst.msk [vmem:[%s1124_s4 + $0x10] sm:$0xf] %vm507_vm2, %v477_v50 }
  0xa4   : > { %907 = vst.msk [vmem:[%s1124_s4 + $0x18] sm:$0xf] %vm507_vm2, %v640_v51  ;;  %v440_v52 = vpop.f32.mrf.mxu2 }
  0xa5   : > { %v441_v53 = vadd.f32 %v1112_v20, %v440_v52  ;;  %v603_v54 = vpop.f32.mrf.mxu3 }
  0xa6   : > { %v604_v55 = vadd.f32 %v1117_v21, %v603_v54  ;;  %v402_v56 = vpop.f32.mrf.mxu0 }
  0xa7   : > { %v493_v57 = vpack.c.bf16 %v441_v53, %v441_v53  ;;  %v403_v58 = vadd.f32 %v1112_v20, %v402_v56  ;;  %v565_v59 = vpop.f32.mrf.mxu1 }
  0xa8   : > { %v656_v60 = vpack.c.bf16 %v604_v55, %v604_v55  ;;  %v566_v61 = vadd.f32 %v1117_v21, %v565_v59 }
  0xa9   : > { %526 = vst.msk [vmem:[%s1124_s4 + $0x90] sm:$0xf] %vm507_vm2, %v493_v57  ;;  %v478_v62 = vpack.c.bf16 %v403_v58, %v403_v58 }
  0xaa   : > { %923 = vst.msk [vmem:[%s1124_s4 + $0x98] sm:$0xf] %vm507_vm2, %v656_v60  ;;  %v641_v63 = vpack.c.bf16 %v566_v61, %v566_v61 }
  0xab   : > { %511 = vst.msk [vmem:[%s1124_s4 + $0x14] sm:$0xf] %vm507_vm2, %v478_v62 }
  0xac   : > { %908 = vst.msk [vmem:[%s1124_s4 + $0x1c] sm:$0xf] %vm507_vm2, %v641_v63  ;;  %v442_v0 = vpop.f32.mrf.mxu2 }
  0xad   : > { %v443_v1 = vadd.f32 %v1112_v20, %v442_v0  ;;  %v605_v2 = vpop.f32.mrf.mxu3 }
  0xae   : > { %v606_v3 = vadd.f32 %v1117_v21, %v605_v2  ;;  %v405_v4 = vpop.f32.mrf.mxu0 }
  0xaf   : > { %v494_v5 = vpack.c.bf16 %v443_v1, %v443_v1  ;;  %v406_v6 = vadd.f32 %v1112_v20, %v405_v4  ;;  %v568_v7 = vpop.f32.mrf.mxu1 }
  0xb0   : > { %v657_v8 = vpack.c.bf16 %v606_v3, %v606_v3  ;;  %v569_v9 = vadd.f32 %v1117_v21, %v568_v7 }
  0xb1   : > { %527 = vst.msk [vmem:[%s1124_s4 + $0x94] sm:$0xf] %vm507_vm2, %v494_v5  ;;  %v479_v10 = vpack.c.bf16 %v406_v6, %v406_v6 }
  0xb2   : > { %924 = vst.msk [vmem:[%s1124_s4 + $0x9c] sm:$0xf] %vm507_vm2, %v657_v8  ;;  %v642_v11 = vpack.c.bf16 %v569_v9, %v569_v9 }
  0xb3   : > { %512 = vst.msk [vmem:[%s1124_s4 + $0x20] sm:$0xf] %vm507_vm2, %v479_v10 }
  0xb4   : > { %909 = vst.msk [vmem:[%s1124_s4 + $0x28] sm:$0xf] %vm507_vm2, %v642_v11  ;;  %v445_v12 = vpop.f32.mrf.mxu2 }
  0xb5   : > { %v446_v13 = vadd.f32 %v1112_v20, %v445_v12  ;;  %v608_v14 = vpop.f32.mrf.mxu3 }
  0xb6   : > { %v609_v15 = vadd.f32 %v1117_v21, %v608_v14  ;;  %v407_v16 = vpop.f32.mrf.mxu0 }
  0xb7   : > { %v495_v17 = vpack.c.bf16 %v446_v13, %v446_v13  ;;  %v408_v18 = vadd.f32 %v1112_v20, %v407_v16  ;;  %v570_v19 = vpop.f32.mrf.mxu1 }
  0xb8   : > { %v658_v22 = vpack.c.bf16 %v609_v15, %v609_v15  ;;  %v571_v23 = vadd.f32 %v1117_v21, %v570_v19 }
  0xb9   : > { %528 = vst.msk [vmem:[%s1124_s4 + $0xa0] sm:$0xf] %vm507_vm2, %v495_v17  ;;  %v480_v24 = vpack.c.bf16 %v408_v18, %v408_v18 }
  0xba   : > { %925 = vst.msk [vmem:[%s1124_s4 + $0xa8] sm:$0xf] %vm507_vm2, %v658_v22  ;;  %v643_v25 = vpack.c.bf16 %v571_v23, %v571_v23 }
  0xbb   : > { %513 = vst.msk [vmem:[%s1124_s4 + $0x24] sm:$0xf] %vm507_vm2, %v480_v24 }
  0xbc   : > { %910 = vst.msk [vmem:[%s1124_s4 + $0x2c] sm:$0xf] %vm507_vm2, %v643_v25  ;;  %v447_v26 = vpop.f32.mrf.mxu2 }
  0xbd   : > { %v448_v27 = vadd.f32 %v1112_v20, %v447_v26  ;;  %v610_v28 = vpop.f32.mrf.mxu3 }
  0xbe   : > { %v611_v29 = vadd.f32 %v1117_v21, %v610_v28  ;;  %v410_v30 = vpop.f32.mrf.mxu0 }
  0xbf   : > { %v496_v31 = vpack.c.bf16 %v448_v27, %v448_v27  ;;  %v411_v32 = vadd.f32 %v1112_v20, %v410_v30  ;;  %v573_v33 = vpop.f32.mrf.mxu1 }
  0xc0   : > { %v659_v34 = vpack.c.bf16 %v611_v29, %v611_v29  ;;  %v574_v35 = vadd.f32 %v1117_v21, %v573_v33 }
  0xc1   : > { %529 = vst.msk [vmem:[%s1124_s4 + $0xa4] sm:$0xf] %vm507_vm2, %v496_v31  ;;  %v481_v36 = vpack.c.bf16 %v411_v32, %v411_v32 }
  0xc2   : > { %926 = vst.msk [vmem:[%s1124_s4 + $0xac] sm:$0xf] %vm507_vm2, %v659_v34  ;;  %v644_v37 = vpack.c.bf16 %v574_v35, %v574_v35 }
  0xc3   : > { %514 = vst.msk [vmem:[%s1124_s4 + $0x30] sm:$0xf] %vm507_vm2, %v481_v36 }
  0xc4   : > { %911 = vst.msk [vmem:[%s1124_s4 + $0x38] sm:$0xf] %vm507_vm2, %v644_v37  ;;  %v450_v38 = vpop.f32.mrf.mxu2 }
  0xc5   : > { %v451_v39 = vadd.f32 %v1112_v20, %v450_v38  ;;  %v613_v40 = vpop.f32.mrf.mxu3 }
  0xc6   : > { %v614_v41 = vadd.f32 %v1117_v21, %v613_v40  ;;  %v412_v42 = vpop.f32.mrf.mxu0 }
  0xc7   : > { %v497_v43 = vpack.c.bf16 %v451_v39, %v451_v39  ;;  %v413_v44 = vadd.f32 %v1112_v20, %v412_v42  ;;  %v575_v45 = vpop.f32.mrf.mxu1 }
  0xc8   : > { %v660_v46 = vpack.c.bf16 %v614_v41, %v614_v41  ;;  %v576_v47 = vadd.f32 %v1117_v21, %v575_v45 }
  0xc9   : > { %530 = vst.msk [vmem:[%s1124_s4 + $0xb0] sm:$0xf] %vm507_vm2, %v497_v43  ;;  %v482_v48 = vpack.c.bf16 %v413_v44, %v413_v44 }
  0xca   : > { %927 = vst.msk [vmem:[%s1124_s4 + $0xb8] sm:$0xf] %vm507_vm2, %v660_v46  ;;  %v645_v49 = vpack.c.bf16 %v576_v47, %v576_v47 }
  0xcb   : > { %515 = vst.msk [vmem:[%s1124_s4 + $0x34] sm:$0xf] %vm507_vm2, %v482_v48 }
  0xcc   : > { %912 = vst.msk [vmem:[%s1124_s4 + $0x3c] sm:$0xf] %vm507_vm2, %v645_v49  ;;  %v452_v50 = vpop.f32.mrf.mxu2 }
  0xcd   : > { %v453_v51 = vadd.f32 %v1112_v20, %v452_v50  ;;  %v615_v52 = vpop.f32.mrf.mxu3 }
  0xce   : > { %v616_v53 = vadd.f32 %v1117_v21, %v615_v52  ;;  %v415_v54 = vpop.f32.mrf.mxu0 }
  0xcf   : > { %v498_v55 = vpack.c.bf16 %v453_v51, %v453_v51  ;;  %v416_v56 = vadd.f32 %v1112_v20, %v415_v54  ;;  %v578_v57 = vpop.f32.mrf.mxu1 }
  0xd0   : > { %v661_v58 = vpack.c.bf16 %v616_v53, %v616_v53  ;;  %v579_v59 = vadd.f32 %v1117_v21, %v578_v57 }
  0xd1   : > { %531 = vst.msk [vmem:[%s1124_s4 + $0xb4] sm:$0xf] %vm507_vm2, %v498_v55  ;;  %v483_v60 = vpack.c.bf16 %v416_v56, %v416_v56 }
  0xd2   : > { %928 = vst.msk [vmem:[%s1124_s4 + $0xbc] sm:$0xf] %vm507_vm2, %v661_v58  ;;  %v646_v61 = vpack.c.bf16 %v579_v59, %v579_v59 }
  0xd3   : > { %516 = vst.msk [vmem:[%s1124_s4 + $0x40] sm:$0xf] %vm507_vm2, %v483_v60 }
  0xd4   : > { %913 = vst.msk [vmem:[%s1124_s4 + $0x48] sm:$0xf] %vm507_vm2, %v646_v61  ;;  %v455_v62 = vpop.f32.mrf.mxu2 }
  0xd5   : > { %v456_v63 = vadd.f32 %v1112_v20, %v455_v62  ;;  %v618_v0 = vpop.f32.mrf.mxu3 }
  0xd6   : > { %v619_v1 = vadd.f32 %v1117_v21, %v618_v0  ;;  %v417_v2 = vpop.f32.mrf.mxu0 }
  0xd7   : > { %v499_v3 = vpack.c.bf16 %v456_v63, %v456_v63  ;;  %v418_v4 = vadd.f32 %v1112_v20, %v417_v2  ;;  %v580_v5 = vpop.f32.mrf.mxu1 }
  0xd8   : > { %v662_v6 = vpack.c.bf16 %v619_v1, %v619_v1  ;;  %v581_v7 = vadd.f32 %v1117_v21, %v580_v5 }
  0xd9   : > { %532 = vst.msk [vmem:[%s1124_s4 + $0xc0] sm:$0xf] %vm507_vm2, %v499_v3  ;;  %v484_v8 = vpack.c.bf16 %v418_v4, %v418_v4 }
  0xda   : > { %929 = vst.msk [vmem:[%s1124_s4 + $0xc8] sm:$0xf] %vm507_vm2, %v662_v6  ;;  %v647_v9 = vpack.c.bf16 %v581_v7, %v581_v7 }
  0xdb   : > { %517 = vst.msk [vmem:[%s1124_s4 + $0x44] sm:$0xf] %vm507_vm2, %v484_v8 }
  0xdc   : > { %914 = vst.msk [vmem:[%s1124_s4 + $0x4c] sm:$0xf] %vm507_vm2, %v647_v9  ;;  %v457_v10 = vpop.f32.mrf.mxu2 }
  0xdd   : > { %v458_v11 = vadd.f32 %v1112_v20, %v457_v10  ;;  %v620_v12 = vpop.f32.mrf.mxu3 }
  0xde   : > { %v621_v13 = vadd.f32 %v1117_v21, %v620_v12  ;;  %v420_v14 = vpop.f32.mrf.mxu0 }
  0xdf   : > { %v500_v15 = vpack.c.bf16 %v458_v11, %v458_v11  ;;  %v421_v16 = vadd.f32 %v1112_v20, %v420_v14  ;;  %v583_v17 = vpop.f32.mrf.mxu1 }
  0xe0   : > { %v663_v18 = vpack.c.bf16 %v621_v13, %v621_v13  ;;  %v584_v19 = vadd.f32 %v1117_v21, %v583_v17 }
  0xe1   : > { %533 = vst.msk [vmem:[%s1124_s4 + $0xc4] sm:$0xf] %vm507_vm2, %v500_v15  ;;  %v485_v22 = vpack.c.bf16 %v421_v16, %v421_v16 }
  0xe2   : > { %930 = vst.msk [vmem:[%s1124_s4 + $0xcc] sm:$0xf] %vm507_vm2, %v663_v18  ;;  %v648_v23 = vpack.c.bf16 %v584_v19, %v584_v19 }
  0xe3   : > { %518 = vst.msk [vmem:[%s1124_s4 + $0x50] sm:$0xf] %vm507_vm2, %v485_v22 }
  0xe4   : > { %915 = vst.msk [vmem:[%s1124_s4 + $0x58] sm:$0xf] %vm507_vm2, %v648_v23  ;;  %v460_v24 = vpop.f32.mrf.mxu2 }
  0xe5   : > { %v461_v25 = vadd.f32 %v1112_v20, %v460_v24  ;;  %v623_v26 = vpop.f32.mrf.mxu3 }
  0xe6   : > { %v624_v27 = vadd.f32 %v1117_v21, %v623_v26  ;;  %v422_v28 = vpop.f32.mrf.mxu0 }
  0xe7   : > { %v501_v29 = vpack.c.bf16 %v461_v25, %v461_v25  ;;  %v423_v30 = vadd.f32 %v1112_v20, %v422_v28  ;;  %v585_v31 = vpop.f32.mrf.mxu1 }
  0xe8   : > { %v664_v32 = vpack.c.bf16 %v624_v27, %v624_v27  ;;  %v586_v33 = vadd.f32 %v1117_v21, %v585_v31 }
  0xe9   : > { %534 = vst.msk [vmem:[%s1124_s4 + $0xd0] sm:$0xf] %vm507_vm2, %v501_v29  ;;  %v486_v34 = vpack.c.bf16 %v423_v30, %v423_v30 }
  0xea   : > { %931 = vst.msk [vmem:[%s1124_s4 + $0xd8] sm:$0xf] %vm507_vm2, %v664_v32  ;;  %v649_v35 = vpack.c.bf16 %v586_v33, %v586_v33 }
  0xeb   : > { %519 = vst.msk [vmem:[%s1124_s4 + $0x54] sm:$0xf] %vm507_vm2, %v486_v34 }
  0xec   : > { %916 = vst.msk [vmem:[%s1124_s4 + $0x5c] sm:$0xf] %vm507_vm2, %v649_v35  ;;  %v462_v36 = vpop.f32.mrf.mxu2 }
  0xed   : > { %v463_v37 = vadd.f32 %v1112_v20, %v462_v36  ;;  %v625_v38 = vpop.f32.mrf.mxu3 }
  0xee   : > { %v626_v39 = vadd.f32 %v1117_v21, %v625_v38  ;;  %v425_v40 = vpop.f32.mrf.mxu0 }
  0xef   : > { %v502_v41 = vpack.c.bf16 %v463_v37, %v463_v37  ;;  %v426_v42 = vadd.f32 %v1112_v20, %v425_v40  ;;  %v588_v43 = vpop.f32.mrf.mxu1 }
  0xf0   : > { %v665_v44 = vpack.c.bf16 %v626_v39, %v626_v39  ;;  %v589_v45 = vadd.f32 %v1117_v21, %v588_v43 }
  0xf1   : > { %535 = vst.msk [vmem:[%s1124_s4 + $0xd4] sm:$0xf] %vm507_vm2, %v502_v41  ;;  %v487_v46 = vpack.c.bf16 %v426_v42, %v426_v42 }
  0xf2   : > { %932 = vst.msk [vmem:[%s1124_s4 + $0xdc] sm:$0xf] %vm507_vm2, %v665_v44  ;;  %v650_v47 = vpack.c.bf16 %v589_v45, %v589_v45 }
  0xf3   : > { %520 = vst.msk [vmem:[%s1124_s4 + $0x60] sm:$0xf] %vm507_vm2, %v487_v46 }
  0xf4   : > { %917 = vst.msk [vmem:[%s1124_s4 + $0x68] sm:$0xf] %vm507_vm2, %v650_v47  ;;  %v465_v48 = vpop.f32.mrf.mxu2 }
  0xf5   : > { %v466_v49 = vadd.f32 %v1112_v20, %v465_v48  ;;  %v628_v50 = vpop.f32.mrf.mxu3 }
  0xf6   : > { %v629_v51 = vadd.f32 %v1117_v21, %v628_v50  ;;  %v427_v52 = vpop.f32.mrf.mxu0 }
  0xf7   : > { %v503_v53 = vpack.c.bf16 %v466_v49, %v466_v49  ;;  %v428_v54 = vadd.f32 %v1112_v20, %v427_v52  ;;  %v590_v55 = vpop.f32.mrf.mxu1 }
  0xf8   : > { %v666_v56 = vpack.c.bf16 %v629_v51, %v629_v51  ;;  %v591_v57 = vadd.f32 %v1117_v21, %v590_v55 }
  0xf9   : > { %536 = vst.msk [vmem:[%s1124_s4 + $0xe0] sm:$0xf] %vm507_vm2, %v503_v53  ;;  %v488_v58 = vpack.c.bf16 %v428_v54, %v428_v54 }
  0xfa   : > { %933 = vst.msk [vmem:[%s1124_s4 + $0xe8] sm:$0xf] %vm507_vm2, %v666_v56  ;;  %v651_v59 = vpack.c.bf16 %v591_v57, %v591_v57 }
  0xfb   : > { %521 = vst.msk [vmem:[%s1124_s4 + $0x64] sm:$0xf] %vm507_vm2, %v488_v58 }
  0xfc   : > { %918 = vst.msk [vmem:[%s1124_s4 + $0x6c] sm:$0xf] %vm507_vm2, %v651_v59  ;;  %v467_v60 = vpop.f32.mrf.mxu2 }
  0xfd   : > { %v468_v61 = vadd.f32 %v1112_v20, %v467_v60  ;;  %v630_v62 = vpop.f32.mrf.mxu3 }
  0xfe   : > { %v631_v63 = vadd.f32 %v1117_v21, %v630_v62  ;;  %v430_v0 = vpop.f32.mrf.mxu0 }
  0xff   : > { %v504_v1 = vpack.c.bf16 %v468_v61, %v468_v61  ;;  %v431_v2 = vadd.f32 %v1112_v20, %v430_v0  ;;  %v593_v3 = vpop.f32.mrf.mxu1 }
 0x100   : > { %v667_v4 = vpack.c.bf16 %v631_v63, %v631_v63  ;;  %v594_v5 = vadd.f32 %v1117_v21, %v593_v3 }
 0x101   : > { %537 = vst.msk [vmem:[%s1124_s4 + $0xe4] sm:$0xf] %vm507_vm2, %v504_v1  ;;  %v489_v6 = vpack.c.bf16 %v431_v2, %v431_v2 }
 0x102   : > { %934 = vst.msk [vmem:[%s1124_s4 + $0xec] sm:$0xf] %vm507_vm2, %v667_v4  ;;  %v652_v7 = vpack.c.bf16 %v594_v5, %v594_v5 }
 0x103   : > { %522 = vst.msk [vmem:[%s1124_s4 + $0x70] sm:$0xf] %vm507_vm2, %v489_v6 }
 0x104   : > { %919 = vst.msk [vmem:[%s1124_s4 + $0x78] sm:$0xf] %vm507_vm2, %v652_v7  ;;  %v470_v8 = vpop.f32.mrf.mxu2 }
 0x105   : > { %v471_v9 = vadd.f32 %v1112_v20, %v470_v8  ;;  %v633_v10 = vpop.f32.mrf.mxu3 }
 0x106   : > { %v634_v11 = vadd.f32 %v1117_v21, %v633_v10  ;;  %v432_v12 = vpop.f32.mrf.mxu0 }
 0x107   : > { %v505_v13 = vpack.c.bf16 %v471_v9, %v471_v9  ;;  %v433_v14 = vadd.f32 %v1112_v20, %v432_v12  ;;  %v595_v15 = vpop.f32.mrf.mxu1 }
 0x108   : > { %v668_v16 = vpack.c.bf16 %v634_v11, %v634_v11  ;;  %v596_v17 = vadd.f32 %v1117_v21, %v595_v15 }
 0x109   : > { %538 = vst.msk [vmem:[%s1124_s4 + $0xf0] sm:$0xf] %vm507_vm2, %v505_v13  ;;  %v490_v18 = vpack.c.bf16 %v433_v14, %v433_v14 }
 0x10a   : > { %935 = vst.msk [vmem:[%s1124_s4 + $0xf8] sm:$0xf] %vm507_vm2, %v668_v16  ;;  %v653_v19 = vpack.c.bf16 %v596_v17, %v596_v17 }
 0x10b   : > { %523 = vst.msk [vmem:[%s1124_s4 + $0x74] sm:$0xf] %vm507_vm2, %v490_v18 }
 0x10c   : > { %920 = vst.msk [vmem:[%s1124_s4 + $0x7c] sm:$0xf] %vm507_vm2, %v653_v19  ;;  %v472_v22 = vpop.f32.mrf.mxu2 }
 0x10d   : > { %v473_v23 = vadd.f32 %v1112_v20, %v472_v22  ;;  %v635_v24 = vpop.f32.mrf.mxu3 }
 0x10e   : > { %v636_v25 = vadd.f32 %v1117_v21, %v635_v24 }
 0x10f   : > { %v506_v26 = vpack.c.bf16 %v473_v23, %v473_v23 }
 0x110   : > { %v669_v27 = vpack.c.bf16 %v636_v25, %v636_v25 }
 0x111   : > { %539 = vst.msk [vmem:[%s1124_s4 + $0xf4] sm:$0xf] %vm507_vm2, %v506_v26 }
 0x112   : > { %936 = vst.msk [vmem:[%s1124_s4 + $0xfc] sm:$0xf] %vm507_vm2, %v669_v27 }
 0x113 PF: > { %s13_s14 = sadd.s32 1, %s1007_s14   ;;  %s1330_s12 = smov %s1003_s13 }
 0x114   : > { %p10_p5 = scmp.ge.s32.totalorder %s13_s14, 4   ;;  %s1331_s13 = smov %s1333_s15 }
 0x116   :  { %12 = sbr.rel (!%p10_p5) target bundleno = 2 (0x2), region = 64 }

// kernel: up_block_forward.4
= control target key start
LH: loop header
LB: loop body
LE: loop exit
PB: predicated region body
PF: predicated region fallthrough
CT: control target
= control target key end

     0   :  { %s2165_s15 = smov 0   ;;  %s2167_s16 = smov 0   ;;  %s3235_s0 = inlined_call_operand.vmem [shape: bf16[2048,72], index: 0, kind: input, shape index: {}]   ;;  %s3236_s1 = inlined_call_operand.vmem [shape: bf16[72,4], index: 1, kind: input, shape index: {}]   ;;  %s3237_s2 = inlined_call_operand.vmem [shape: f32[1,4], index: 2, kind: input, shape index: {}]   ;;  %s3238_s3 = inlined_call_operand.vmem [shape: bf16[2048,4], index: 3, kind: output, shape index: {0}]   ;;  %s3239_s4 = inlined_call_operand.vmem [shape: f32[4,2,4], index: 4, kind: output, shape index: {1}]  }
   0x1   :  { %s2169_s17 = smov 0  }
   0x2 LB: > { %s34_s18 = sadd.s32 1, %s2133_s16  ;;  %p1853_p0 = scmp.ge.s32.totalorder %s2137_s17, 1  ;;  %s2137_s17 = sphi %s2169_s17, %s15_s17   ;;  %s2133_s16 = sphi %s2167_s16, %s3241_s16   ;;  %s2129_s15 = sphi %s2165_s15, %s3240_s15  }
   0x3   : > { %p36_p1 = scmp.ge.s32.totalorder %s34_s18, 4  ;;  %p218_p2 = scmp.lt.s32.totalorder %s2137_s17, 5 }
   0x5   : > { %s3243_s18 = smov (%p36_p1, %s34_s18), 0  ;;  %p219_p3 = pnand %p1853_p0, %p218_p2 }
   0x6   : > { %s1854_s21 = sshll.u32 (!%p219_p3), %s2129_s15, 6  ;;  %p298_p5 = scmp.lt.s32.totalorder (!%p219_p3), %s2129_s15, 3 }
   0x7   : > { %222 = sbr.rel (%p219_p3) target bundleno = 409 (0x199), region = 32  ;;  %p269_p4 = scmp.lt.s32.totalorder (!%p219_p3), %s1854_s21, 255 }
   0xc   : > { %v511_v0 = vld [vmem:[%s3236_s1 + $0x20] sm:$0xf]  ;;  %vm796_vm0 = vcmask 1043456   ;;  %v2072_v4 = vld [vmem:[%s3236_s1 + $0x18] sm:$0xff]  ;;  %v2071_v5 = vld [vmem:[%s3236_s1 + $0x10] sm:$0xff]  ;;  %s3245_s21 = smov (!%p269_p4, %s1854_s21), 255 }
   0xd   : > { %v689_v1 = vunpack.c.l.b16 %v511_v0  ;;  %v2070_v6 = vld [vmem:[%s3236_s1 + $0x8] sm:$0xff]  ;;  %s1855_s28 = sshll.u32 %s3245_s21, 2  ;;  %v2069_v7 = vld [vmem:[%s3236_s1] sm:$0xff]  ;;  %vm699_vm1 = vcmask 588800   ;;  %vm310_vm2 = vcmask 31744   ;;  %v2139_v28 = vmov 0.0  }
   0xe   : > { %s2209_s7 = scalar_lea.vmem %s3235_s0, %s1855_s28  ;;  %311 = vst.msk [vmem:[#allocation2] sm:$0xff] %vm310_vm2, %v2139_v28  ;;  %v2371_v41 = vld [vmem:[%s3237_s2] ss:$0 sm:$0xff]  ;;  %s2389_s12 = scalar_lea.vmem %s3238_s3, %s1855_s28  ;;  %vm1297_vm3 = vcmask 27648   ;;  %vm1495_vm4 = vcmask 24576  }
   0xf   : > { %v694_v2 = vpack.c.b16 %v689_v1, %v689_v1  ;;  %v2037_v8 = vld [vmem:[%s2209_s7] sm:$0xff]  ;;  %v2038_v10 = vld [vmem:[%s2209_s7 + $0x8] sm:$0xff]  ;;  %v2039_v13 = vld [vmem:[%s2209_s7 + $0x10] sm:$0xff]  ;;  %312 = vst.msk [vmem:[#allocation2 + $0x8] sm:$0xff] %vm310_vm2, %v2139_v28  ;;  %s3247_s15 = smov (!%p298_p5, %s2129_s15), 3 }
  0x10   : > { %v2045_v9 = vld [vmem:[%s2209_s7 + $0x40] sm:$0xff]  ;;  %v2046_v11 = vld [vmem:[%s2209_s7 + $0x48] sm:$0xff]  ;;  %v2047_v14 = vld [vmem:[%s2209_s7 + $0x50] sm:$0xff]  ;;  %313 = vst.msk [vmem:[#allocation2 + $0x10] sm:$0xff] %vm310_vm2, %v2139_v28  ;;  %s1858_s19 = sshll.u32 %s3247_s15, 1 }
  0x11   : > { %v798_v3 = vsel %vm796_vm0, %v694_v2, 0  ;;  %v2053_v12 = vld [vmem:[%s2209_s7 + $0x80] sm:$0xff]  ;;  %v2054_v15 = vld [vmem:[%s2209_s7 + $0x88] sm:$0xff]  ;;  %v2040_v16 = vld [vmem:[%s2209_s7 + $0x18] sm:$0xff]  ;;  %314 = vst.msk [vmem:[#allocation2 + $0x18] sm:$0xff] %vm310_vm2, %v2139_v28  ;;  %s304_s22 = scalar_lea.vmem %s3239_s4, %s1858_s19 }
  0x12   : > { %803 = vmatpush.bf16.msra.mxu0 %v798_v3  ;;  %2073 = vmatpush.bf16.msra.mxu1 %v798_v3  ;;  %v2048_v17 = vld [vmem:[%s2209_s7 + $0x58] sm:$0xff]  ;;  %v2055_v18 = vld [vmem:[%s2209_s7 + $0x90] sm:$0xff]  ;;  %v2061_v19 = vld [vmem:[%s2209_s7 + $0xc0] sm:$0xff]  ;;  %315 = vst.msk [vmem:[#allocation2 + $0x20] sm:$0xff] %vm310_vm2, %v2139_v28 }
  0x13   : > { %2074 = vmatpush.bf16.msra.mxu2 %v798_v3  ;;  %2075 = vmatpush.bf16.msra.mxu3 %v798_v3  ;;  %v2041_v20 = vld [vmem:[%s2209_s7 + $0x20] sm:$0xff]  ;;  %v2056_v22 = vld [vmem:[%s2209_s7 + $0x98] sm:$0xff]  ;;  %v2062_v23 = vld [vmem:[%s2209_s7 + $0xc8] sm:$0xff]  ;;  %316 = vst.msk [vmem:[#allocation2 + $0x28] sm:$0xff] %vm310_vm2, %v2139_v28 }
  0x14   : > { %v2049_v21 = vld [vmem:[%s2209_s7 + $0x60] sm:$0xff]  ;;  %v2042_v24 = vld [vmem:[%s2209_s7 + $0x28] sm:$0xff]  ;;  %v2063_v27 = vld [vmem:[%s2209_s7 + $0xd0] sm:$0xff]  ;;  %317 = vst.msk [vmem:[#allocation2 + $0x30] sm:$0xff] %vm310_vm2, %v2139_v28 }
  0x15   : > { %v2050_v25 = vld [vmem:[%s2209_s7 + $0x68] sm:$0xff]  ;;  %v2057_v26 = vld [vmem:[%s2209_s7 + $0xa0] sm:$0xff]  ;;  %318 = vst.msk [vmem:[#allocation2 + $0x38] sm:$0xff] %vm310_vm2, %v2139_v28  ;;  %v2043_v29 = vld [vmem:[%s2209_s7 + $0x30] sm:$0xff] }
  0x16   : > { %804 = vmatpush.bf16.msra.mxu0 %v2072_v4  ;;  %2076 = vmatpush.bf16.msra.mxu1 %v2072_v4  ;;  %319 = vst.msk [vmem:[#allocation2 + $0x40] sm:$0xff] %vm310_vm2, %v2139_v28  ;;  %v2051_v30 = vld [vmem:[%s2209_s7 + $0x70] sm:$0xff]  ;;  %v2058_v31 = vld [vmem:[%s2209_s7 + $0xa8] sm:$0xff]  ;;  %v2064_v32 = vld [vmem:[%s2209_s7 + $0xd8] sm:$0xff] }
  0x17   : > { %2077 = vmatpush.bf16.msra.mxu2 %v2072_v4  ;;  %2078 = vmatpush.bf16.msra.mxu3 %v2072_v4  ;;  %320 = vst.msk [vmem:[#allocation2 + $0x48] sm:$0xff] %vm310_vm2, %v2139_v28  ;;  %v2044_v33 = vld [vmem:[%s2209_s7 + $0x38] sm:$0xff]  ;;  %v375_v35 = vld [vmem:[#allocation2] sm:$0xff]  ;;  %v2059_v36 = vld [vmem:[%s2209_s7 + $0xb0] sm:$0xff] }
  0x18   : > { %321 = vst.msk [vmem:[#allocation2 + $0x50] sm:$0xff] %vm310_vm2, %v2139_v28  ;;  %v2052_v34 = vld [vmem:[%s2209_s7 + $0x78] sm:$0xff]  ;;  %v2065_v37 = vld [vmem:[%s2209_s7 + $0xe0] sm:$0xff]  ;;  %v2066_v48 = vld [vmem:[%s2209_s7 + $0xe8] sm:$0xff] }
  0x19   : > { %322 = vst.msk [vmem:[#allocation2 + $0x58] sm:$0xff] %vm310_vm2, %v2139_v28  ;;  %v2060_v47 = vld [vmem:[%s2209_s7 + $0xb8] sm:$0xff]  ;;  %v376_v49 = vld [vmem:[#allocation2 + $0x8] sm:$0xff]  ;;  %v377_v50 = vld [vmem:[#allocation2 + $0x10] sm:$0xff] }
  0x1a   : > { %805 = vmatpush.bf16.msra.mxu0 %v2071_v5  ;;  %2079 = vmatpush.bf16.msra.mxu1 %v2071_v5  ;;  %323 = vst.msk [vmem:[#allocation2 + $0x60] sm:$0xff] %vm310_vm2, %v2139_v28  ;;  %v378_v59 = vld [vmem:[#allocation2 + $0x18] sm:$0xff] }
  0x1b   : > { %2080 = vmatpush.bf16.msra.mxu2 %v2071_v5  ;;  %2081 = vmatpush.bf16.msra.mxu3 %v2071_v5  ;;  %324 = vst.msk [vmem:[#allocation2 + $0x68] sm:$0xff] %vm310_vm2, %v2139_v28 }
  0x1c   : > { %325 = vst.msk [vmem:[#allocation2 + $0x70] sm:$0xff] %vm310_vm2, %v2139_v28 }
  0x1d   : > { %326 = vst.msk [vmem:[#allocation2 + $0x78] sm:$0xff] %vm310_vm2, %v2139_v28 }
  0x1e   : > { %806 = vmatpush.bf16.msra.mxu0 %v2070_v6  ;;  %2082 = vmatpush.bf16.msra.mxu1 %v2070_v6  ;;  %327 = vst.msk [vmem:[#allocation2 + $0x80] sm:$0xff] %vm310_vm2, %v2139_v28 }
  0x1f   : > { %2083 = vmatpush.bf16.msra.mxu2 %v2070_v6  ;;  %2084 = vmatpush.bf16.msra.mxu3 %v2070_v6  ;;  %328 = vst.msk [vmem:[#allocation2 + $0x88] sm:$0xff] %vm310_vm2, %v2139_v28 }
  0x20   : > { %329 = vst.msk [vmem:[#allocation2 + $0x90] sm:$0xff] %vm310_vm2, %v2139_v28 }
  0x21   : > { %330 = vst.msk [vmem:[#allocation2 + $0x98] sm:$0xff] %vm310_vm2, %v2139_v28 }
  0x22   : > { %807 = vmatpush.bf16.msra.mxu0 %v2069_v7  ;;  %2085 = vmatpush.bf16.msra.mxu1 %v2069_v7  ;;  %331 = vst.msk [vmem:[#allocation2 + $0xa0] sm:$0xff] %vm310_vm2, %v2139_v28 }
  0x23   : > { %2086 = vmatpush.bf16.msra.mxu2 %v2069_v7  ;;  %2087 = vmatpush.bf16.msra.mxu3 %v2069_v7  ;;  %332 = vst.msk [vmem:[#allocation2 + $0xa8] sm:$0xff] %vm310_vm2, %v2139_v28  ;;  %v2067_v7 = vld [vmem:[%s2209_s7 + $0xf0] sm:$0xff] }
  0x24   : > { %333 = vst.msk [vmem:[#allocation2 + $0xb0] sm:$0xff] %vm310_vm2, %v2139_v28 }
  0x25   : > { %2003 = vmatmul.msk.bf16.vlgmr.msra.gmra.mxu0 %vm699_vm1, %v2037_v8  ;;  %2011 = vmatmul.msk.bf16.vlgmr.msra.gmra.mxu1 %vm699_vm1, %v2045_v9  ;;  %334 = vst.msk [vmem:[#allocation2 + $0xb8] sm:$0xff] %vm310_vm2, %v2139_v28  ;;  %v391_v52 = vld [vmem:[#allocation2 + $0x80] sm:$0xff] }
  0x26   : > { %2019 = vmatmul.msk.bf16.vlgmr.msra.gmra.mxu2 %vm699_vm1, %v2053_v12  ;;  %2027 = vmatmul.msk.bf16.vlgmr.msra.gmra.mxu3 %vm699_vm1, %v2061_v19  ;;  %335 = vst.msk [vmem:[#allocation2 + $0xc0] sm:$0xff] %vm310_vm2, %v2139_v28  ;;  %v392_v54 = vld [vmem:[#allocation2 + $0x88] sm:$0xff] }
  0x27   : > { %336 = vst.msk [vmem:[#allocation2 + $0xc8] sm:$0xff] %vm310_vm2, %v2139_v28  ;;  %v393_v61 = vld [vmem:[#allocation2 + $0x90] sm:$0xff] }
  0x28   : > { %337 = vst.msk [vmem:[#allocation2 + $0xd0] sm:$0xff] %vm310_vm2, %v2139_v28  ;;  %v394_v0 = vld [vmem:[#allocation2 + $0x98] sm:$0xff] }
  0x29   : > { %338 = vst.msk [vmem:[#allocation2 + $0xd8] sm:$0xff] %vm310_vm2, %v2139_v28 }
  0x2a   : > { %339 = vst.msk [vmem:[#allocation2 + $0xe0] sm:$0xff] %vm310_vm2, %v2139_v28 }
  0x2b   : > { %340 = vst.msk [vmem:[#allocation2 + $0xe8] sm:$0xff] %vm310_vm2, %v2139_v28 }
  0x2c   : > { %341 = vst.msk [vmem:[#allocation2 + $0xf0] sm:$0xff] %vm310_vm2, %v2139_v28 }
  0x2d   : > { %342 = vst.msk [vmem:[#allocation2 + $0xf8] sm:$0xff] %vm310_vm2, %v2139_v28 }
  0x2e   : > { %343 = vst.msk [vmem:[#allocation2 + $0x100] sm:$0xff] %vm310_vm2, %v2139_v28 }
  0x2f   : > { %344 = vst.msk [vmem:[#allocation2 + $0x108] sm:$0xff] %vm310_vm2, %v2139_v28 }
  0x30   : > { %345 = vst.msk [vmem:[#allocation2 + $0x110] sm:$0xff] %vm310_vm2, %v2139_v28 }
  0x31   : > { %346 = vst.msk [vmem:[#allocation2 + $0x118] sm:$0xff] %vm310_vm2, %v2139_v28 }
  0x32   : > { %347 = vst.msk [vmem:[#allocation2 + $0x120] sm:$0xff] %vm310_vm2, %v2139_v28 }
  0x33   : > { %348 = vst.msk [vmem:[#allocation2 + $0x128] sm:$0xff] %vm310_vm2, %v2139_v28 }
  0x34   : > { %349 = vst.msk [vmem:[#allocation2 + $0x130] sm:$0xff] %vm310_vm2, %v2139_v28 }
  0x35   : > { %2004 = vmatmul.msk.bf16.gmra.mxu0 %vm699_vm1, %v2038_v10  ;;  %2012 = vmatmul.msk.bf16.gmra.mxu1 %vm699_vm1, %v2046_v11  ;;  %350 = vst.msk [vmem:[#allocation2 + $0x138] sm:$0xff] %vm310_vm2, %v2139_v28 }
  0x36   : > { %2020 = vmatmul.msk.bf16.gmra.mxu2 %vm699_vm1, %v2054_v15  ;;  %2028 = vmatmul.msk.bf16.gmra.mxu3 %vm699_vm1, %v2062_v23  ;;  %351 = vst.msk [vmem:[#allocation2 + $0x140] sm:$0xff] %vm310_vm2, %v2139_v28 }
  0x37   : > { %352 = vst.msk [vmem:[#allocation2 + $0x148] sm:$0xff] %vm310_vm2, %v2139_v28 }
  0x38   : > { %353 = vst.msk [vmem:[#allocation2 + $0x150] sm:$0xff] %vm310_vm2, %v2139_v28 }
  0x39   : > { %354 = vst.msk [vmem:[#allocation2 + $0x158] sm:$0xff] %vm310_vm2, %v2139_v28 }
  0x3a   : > { %355 = vst.msk [vmem:[#allocation2 + $0x160] sm:$0xff] %vm310_vm2, %v2139_v28 }
  0x3b   : > { %356 = vst.msk [vmem:[#allocation2 + $0x168] sm:$0xff] %vm310_vm2, %v2139_v28 }
  0x3c   : > { %357 = vst.msk [vmem:[#allocation2 + $0x170] sm:$0xff] %vm310_vm2, %v2139_v28 }
  0x3d   : > { %358 = vst.msk [vmem:[#allocation2 + $0x178] sm:$0xff] %vm310_vm2, %v2139_v28 }
  0x3e   : > { %359 = vst.msk [vmem:[#allocation2 + $0x180] sm:$0xff] %vm310_vm2, %v2139_v28 }
  0x3f   : > { %360 = vst.msk [vmem:[#allocation2 + $0x188] sm:$0xff] %vm310_vm2, %v2139_v28 }
  0x40   : > { %361 = vst.msk [vmem:[#allocation2 + $0x190] sm:$0xff] %vm310_vm2, %v2139_v28 }
  0x41   : > { %362 = vst.msk [vmem:[#allocation2 + $0x198] sm:$0xff] %vm310_vm2, %v2139_v28 }
  0x42   : > { %363 = vst.msk [vmem:[#allocation2 + $0x1a0] sm:$0xff] %vm310_vm2, %v2139_v28 }
  0x43   : > { %364 = vst.msk [vmem:[#allocation2 + $0x1a8] sm:$0xff] %vm310_vm2, %v2139_v28 }
  0x44   : > { %365 = vst.msk [vmem:[#allocation2 + $0x1b0] sm:$0xff] %vm310_vm2, %v2139_v28 }
  0x45   : > { %2005 = vmatmul.msk.bf16.gmra.mxu0 %vm699_vm1, %v2039_v13  ;;  %2013 = vmatmul.msk.bf16.gmra.mxu1 %vm699_vm1, %v2047_v14  ;;  %366 = vst.msk [vmem:[#allocation2 + $0x1b8] sm:$0xff] %vm310_vm2, %v2139_v28 }
  0x46   : > { %2021 = vmatmul.msk.bf16.gmra.mxu2 %vm699_vm1, %v2055_v18  ;;  %2029 = vmatmul.msk.bf16.gmra.mxu3 %vm699_vm1, %v2063_v27  ;;  %367 = vst.msk [vmem:[#allocation2 + $0x1c0] sm:$0xff] %vm310_vm2, %v2139_v28 }
  0x47   : > { %368 = vst.msk [vmem:[#allocation2 + $0x1c8] sm:$0xff] %vm310_vm2, %v2139_v28 }
  0x48   : > { %369 = vst.msk [vmem:[#allocation2 + $0x1d0] sm:$0xff] %vm310_vm2, %v2139_v28 }
  0x49   : > { %370 = vst.msk [vmem:[#allocation2 + $0x1d8] sm:$0xff] %vm310_vm2, %v2139_v28 }
  0x4a   : > { %371 = vst.msk [vmem:[#allocation2 + $0x1e0] sm:$0xff] %vm310_vm2, %v2139_v28 }
  0x4b   : > { %372 = vst.msk [vmem:[#allocation2 + $0x1e8] sm:$0xff] %vm310_vm2, %v2139_v28 }
  0x4c   : > { %373 = vst.msk [vmem:[#allocation2 + $0x1f0] sm:$0xff] %vm310_vm2, %v2139_v28 }
  0x4d   : > { %374 = vst.msk [vmem:[#allocation2 + $0x1f8] sm:$0xff] %vm310_vm2, %v2139_v28 }
  0x55   : > { %2006 = vmatmul.msk.bf16.gmra.mxu0 %vm699_vm1, %v2040_v16  ;;  %2014 = vmatmul.msk.bf16.gmra.mxu1 %vm699_vm1, %v2048_v17 }
  0x56   : > { %2022 = vmatmul.msk.bf16.gmra.mxu2 %vm699_vm1, %v2056_v22  ;;  %2030 = vmatmul.msk.bf16.gmra.mxu3 %vm699_vm1, %v2064_v32 }
  0x65   : > { %2007 = vmatmul.msk.bf16.gmra.mxu0 %vm699_vm1, %v2041_v20  ;;  %2015 = vmatmul.msk.bf16.gmra.mxu1 %vm699_vm1, %v2049_v21  ;;  %v379_v20 = vld [vmem:[#allocation2 + $0x20] sm:$0xff] }
  0x66   : > { %2023 = vmatmul.msk.bf16.gmra.mxu2 %vm699_vm1, %v2057_v26  ;;  %2031 = vmatmul.msk.bf16.gmra.mxu3 %vm699_vm1, %v2065_v37 }
  0x75   : > { %2008 = vmatmul.msk.bf16.gmra.mxu0 %vm699_vm1, %v2042_v24  ;;  %2016 = vmatmul.msk.bf16.gmra.mxu1 %vm699_vm1, %v2050_v25 }
  0x76   : > { %2024 = vmatmul.msk.bf16.gmra.mxu2 %vm699_vm1, %v2058_v31  ;;  %2032 = vmatmul.msk.bf16.gmra.mxu3 %vm699_vm1, %v2066_v48 }
  0x85   : > { %2009 = vmatmul.msk.bf16.gmra.mxu0 %vm699_vm1, %v2043_v29  ;;  %2017 = vmatmul.msk.bf16.gmra.mxu1 %vm699_vm1, %v2051_v30 }
  0x86   : > { %2025 = vmatmul.msk.bf16.gmra.mxu2 %vm699_vm1, %v2059_v36  ;;  %2033 = vmatmul.msk.bf16.gmra.mxu3 %vm699_vm1, %v2067_v7 }
  0x95   : > { %2010 = vmatmul.msk.bf16.gmra.mxu0 %vm699_vm1, %v2044_v33  ;;  %2018 = vmatmul.msk.bf16.gmra.mxu1 %vm699_vm1, %v2052_v34 }
  0x96   : > { %2026 = vmatmul.msk.bf16.gmra.mxu2 %vm699_vm1, %v2060_v47 }
  0xa2   : > { %v809_v38 = vpop.f32.mrf.mxu0  ;;  %v849_v40 = vpop.f32.mrf.mxu1 }
  0xa3   : > { %v969_v39 = vadd.f32 %v809_v38, %v375_v35  ;;  %v985_v57 = vadd.f32 %v849_v40, %v391_v52 }
  0xa5   : > { %1034 = vst.msk [vmem:[#allocation2] sm:$0xff] %vm310_vm2, %v969_v39 }
  0xa6   : > { %1050 = vst.msk [vmem:[#allocation2 + $0x80] sm:$0xff] %vm310_vm2, %v985_v57 }
  0xa9   : > { %v889_v32 = vpop.f32.mrf.mxu2 }
  0xaa   : > { %v811_v42 = vpop.f32.mrf.mxu0  ;;  %v851_v45 = vpop.f32.mrf.mxu1 }
  0xab   : > { %v970_v53 = vadd.f32 %v811_v42, %v376_v49  ;;  %v986_v58 = vadd.f32 %v851_v45, %v392_v54 }
  0xac   : > { %v1101_v43 = vld [vmem:[#allocation2] sm:$0xff] }
  0xad   : > { %v1169_v44 = vadd.f32 %v2371_v41, %v1101_v43  ;;  %1035 = vst.msk [vmem:[#allocation2 + $0x8] sm:$0xff] %vm310_vm2, %v970_v53  ;;  %v1117_v10 = vld [vmem:[#allocation2 + $0x80] sm:$0xff] }
  0xae   : > { %1051 = vst.msk [vmem:[#allocation2 + $0x88] sm:$0xff] %vm310_vm2, %v986_v58  ;;  %v2428_v14 = vadd.f32 %v2371_v41, %v1117_v10  ;;  %v408_v58 = vld [vmem:[#allocation2 + $0x108] sm:$0xff] }
  0xaf   : > { %v1233_v46 = vpack.c.bf16 %v1169_v44, %v1169_v44  ;;  %v1497_v4 = vmul.f32 %v1169_v44, %v1169_v44  ;;  %v1362_v8 = vsel %vm310_vm2, %v1169_v44, 0.0  ;;  %v380_v44 = vld [vmem:[#allocation2 + $0x28] sm:$0xff] }
  0xb0   : > { %v1249_v25 = vpack.c.bf16 %v2428_v14, %v2428_v14 }
  0xb1   : > { %1298 = vst.msk [vmem:[%s2389_s12] sm:$0xf] %vm1297_vm3, %v1233_v46  ;;  %v1561_v22 = vsel %vm310_vm2, %v1497_v4, 0.0 }
  0xb2   : > { %v814_v51 = vpop.f32.mrf.mxu0  ;;  %v854_v56 = vpop.f32.mrf.mxu1  ;;  %1314 = vst.msk [vmem:[%s2389_s12 + $0x40] sm:$0xf] %vm1297_vm3, %v1249_v25 }
  0xb3   : > { %v971_v55 = vadd.f32 %v814_v51, %v377_v50  ;;  %v987_v63 = vadd.f32 %v854_v56, %v393_v61  ;;  %v395_v50 = vld [vmem:[#allocation2 + $0xa0] sm:$0xff]  ;;  %v396_v56 = vld [vmem:[#allocation2 + $0xa8] sm:$0xff] }
  0xb4   : > { %v1102_v3 = vld [vmem:[#allocation2 + $0x8] sm:$0xff]  ;;  %v407_v51 = vld [vmem:[#allocation2 + $0x100] sm:$0xff] }
  0xb5   : > { %1036 = vst.msk [vmem:[#allocation2 + $0x10] sm:$0xff] %vm310_vm2, %v971_v55  ;;  %v1170_v5 = vadd.f32 %v2371_v41, %v1102_v3  ;;  %v1118_v21 = vld [vmem:[#allocation2 + $0x88] sm:$0xff]  ;;  %v1001_v55 = vadd.f32 %v889_v32, %v407_v51 }
  0xb6   : > { %1052 = vst.msk [vmem:[#allocation2 + $0x90] sm:$0xff] %vm310_vm2, %v987_v63  ;;  %v2445_v34 = vadd.f32 %v2371_v41, %v1118_v21 }
  0xb7   : > { %v1234_v11 = vpack.c.bf16 %v1170_v5, %v1170_v5  ;;  %v1363_v12 = vsel %vm310_vm2, %v1170_v5, 0.0  ;;  %v1498_v13 = vmul.f32 %v1170_v5, %v1170_v5  ;;  %1066 = vst.msk [vmem:[#allocation2 + $0x100] sm:$0xff] %vm310_vm2, %v1001_v55 }
  0xb8   : > { %v1364_v16 = vadd.f32 %v1363_v12, %v1362_v8  ;;  %v1250_v43 = vpack.c.bf16 %v2445_v34, %v2445_v34 }
  0xb9   : > { %1299 = vst.msk [vmem:[%s2389_s12 + $0x4] sm:$0xf] %vm1297_vm3, %v1234_v11  ;;  %v1562_v23 = vsel %vm310_vm2, %v1498_v13, 0.0 }
  0xba   : > { %v816_v60 = vpop.f32.mrf.mxu0  ;;  %v856_v1 = vpop.f32.mrf.mxu1  ;;  %v1563_v26 = vadd.f32 %v1562_v23, %v1561_v22  ;;  %1315 = vst.msk [vmem:[%s2389_s12 + $0x44] sm:$0xf] %vm1297_vm3, %v1250_v43 }
  0xbb   : > { %v972_v62 = vadd.f32 %v816_v60, %v378_v59  ;;  %v988_v2 = vadd.f32 %v856_v1, %v394_v0  ;;  %v891_v59 = vpop.f32.mrf.mxu2  ;;  %v381_v0 = vld [vmem:[#allocation2 + $0x30] sm:$0xff]  ;;  %v2068_v1 = vld [vmem:[%s2209_s7 + $0xf8] sm:$0xff] }
  0xbc   : > { %v1103_v6 = vld [vmem:[#allocation2 + $0x10] sm:$0xff]  ;;  %v1002_v61 = vadd.f32 %v891_v59, %v408_v58  ;;  %2034 = vmatmul.msk.bf16.gmra.mxu3 %vm699_vm1, %v2068_v1  ;;  %v384_v59 = vld [vmem:[#allocation2 + $0x48] sm:$0xff] }
  0xbd   : > { %1037 = vst.msk [vmem:[#allocation2 + $0x18] sm:$0xff] %vm310_vm2, %v972_v62  ;;  %v1171_v9 = vadd.f32 %v2371_v41, %v1103_v6  ;;  %v1119_v30 = vld [vmem:[#allocation2 + $0x90] sm:$0xff] }
  0xbe   : > { %1053 = vst.msk [vmem:[#allocation2 + $0x98] sm:$0xff] %vm310_vm2, %v988_v2  ;;  %v2448_v35 = vadd.f32 %v2371_v41, %v1119_v30  ;;  %v409_v30 = vld [vmem:[#allocation2 + $0x110] sm:$0xff] }
  0xbf   : > { %v1235_v17 = vpack.c.bf16 %v1171_v9, %v1171_v9  ;;  %v1365_v18 = vsel %vm310_vm2, %v1171_v9, 0.0  ;;  %v1499_v19 = vmul.f32 %v1171_v9, %v1171_v9  ;;  %1067 = vst.msk [vmem:[#allocation2 + $0x108] sm:$0xff] %vm310_vm2, %v1002_v61 }
  0xc0   : > { %v1366_v27 = vadd.f32 %v1365_v18, %v1364_v16  ;;  %v1251_v46 = vpack.c.bf16 %v2448_v35, %v2448_v35  ;;  %v1133_v18 = vld [vmem:[#allocation2 + $0x100] sm:$0xff] }
  0xc1   : > { %1300 = vst.msk [vmem:[%s2389_s12 + $0x8] sm:$0xf] %vm1297_vm3, %v1235_v17  ;;  %v1564_v28 = vsel %vm310_vm2, %v1499_v19, 0.0  ;;  %v382_v19 = vld [vmem:[#allocation2 + $0x38] sm:$0xff] }
  0xc2   : > { %v819_v15 = vpop.f32.mrf.mxu0  ;;  %v859_v31 = vpop.f32.mrf.mxu1  ;;  %v1565_v36 = vadd.f32 %v1564_v28, %v1563_v26  ;;  %1316 = vst.msk [vmem:[%s2389_s12 + $0x48] sm:$0xf] %vm1297_vm3, %v1251_v46  ;;  %v397_v26 = vld [vmem:[#allocation2 + $0xb0] sm:$0xff]  ;;  %v383_v46 = vld [vmem:[#allocation2 + $0x40] sm:$0xff] }
  0xc3   : > { %v973_v33 = vadd.f32 %v819_v15, %v379_v20  ;;  %v989_v53 = vadd.f32 %v859_v31, %v395_v50  ;;  %v894_v13 = vpop.f32.mrf.mxu2  ;;  %v2496_v20 = vadd.f32 %v2371_v41, %v1133_v18 }
  0xc4   : > { %v1104_v24 = vld [vmem:[#allocation2 + $0x18] sm:$0xff]  ;;  %v1003_v43 = vadd.f32 %v894_v13, %v409_v30  ;;  %v412_v30 = vld [vmem:[#allocation2 + $0x128] sm:$0xff] }
  0xc5   : > { %v1172_v29 = vadd.f32 %v2371_v41, %v1104_v24  ;;  %v1120_v40 = vld [vmem:[#allocation2 + $0x98] sm:$0xff]  ;;  %1038 = vst.msk [vmem:[#allocation2 + $0x20] sm:$0xff] %vm310_vm2, %v973_v33  ;;  %v1265_v25 = vpack.c.bf16 %v2496_v20, %v2496_v20 }
  0xc6   : > { %v2462_v49 = vadd.f32 %v2371_v41, %v1120_v40  ;;  %1054 = vst.msk [vmem:[#allocation2 + $0xa0] sm:$0xff] %vm310_vm2, %v989_v53  ;;  %v1134_v23 = vld [vmem:[#allocation2 + $0x108] sm:$0xff] }
  0xc7   : > { %v1236_v37 = vpack.c.bf16 %v1172_v29, %v1172_v29  ;;  %v1367_v38 = vsel %vm310_vm2, %v1172_v29, 0.0  ;;  %v1500_v39 = vmul.f32 %v1172_v29, %v1172_v29  ;;  %v2510_v29 = vadd.f32 %v2371_v41, %v1134_v23  ;;  %1330 = vst.msk [vmem:[%s2389_s12 + $0x80] sm:$0xf] %vm1297_vm3, %v1265_v25  ;;  %v400_v25 = vld [vmem:[#allocation2 + $0xc8] sm:$0xff] }
  0xc8   : > { %v1368_v42 = vadd.f32 %v1367_v38, %v1366_v27  ;;  %v1252_v54 = vpack.c.bf16 %v2462_v49, %v2462_v49  ;;  %1068 = vst.msk [vmem:[#allocation2 + $0x110] sm:$0xff] %vm310_vm2, %v1003_v43 }
  0xc9   : > { %1301 = vst.msk [vmem:[%s2389_s12 + $0xc] sm:$0xf] %vm1297_vm3, %v1236_v37  ;;  %v1566_v45 = vsel %vm310_vm2, %v1500_v39, 0.0  ;;  %v398_v37 = vld [vmem:[#allocation2 + $0xb8] sm:$0xff] }
  0xca   : > { %v1567_v47 = vadd.f32 %v1566_v45, %v1565_v36  ;;  %v821_v48 = vpop.f32.mrf.mxu0  ;;  %v861_v57 = vpop.f32.mrf.mxu1  ;;  %1317 = vst.msk [vmem:[%s2389_s12 + $0x4c] sm:$0xf] %vm1297_vm3, %v1252_v54  ;;  %v410_v39 = vld [vmem:[#allocation2 + $0x118] sm:$0xff] }
  0xcb   : > { %v974_v52 = vadd.f32 %v821_v48, %v380_v44  ;;  %v990_v60 = vadd.f32 %v861_v57, %v396_v56  ;;  %v896_v40 = vpop.f32.mrf.mxu2  ;;  %v929_v57 = vpop.f32.mrf.mxu3 }
  0xcc   : > { %v1105_v62 = vld [vmem:[#allocation2 + $0x20] sm:$0xff] }
  0xcd   : > { %1039 = vst.msk [vmem:[#allocation2 + $0x28] sm:$0xff] %vm310_vm2, %v974_v52  ;;  %v1173_v63 = vadd.f32 %v2371_v41, %v1105_v62  ;;  %v1121_v15 = vld [vmem:[#allocation2 + $0xa0] sm:$0xff] }
  0xce   : > { %1055 = vst.msk [vmem:[#allocation2 + $0xa8] sm:$0xff] %vm310_vm2, %v990_v60  ;;  %v2493_v17 = vadd.f32 %v2371_v41, %v1121_v15  ;;  %v423_v15 = vld [vmem:[#allocation2 + $0x180] sm:$0xff] }
  0xcf   : > { %v1237_v2 = vpack.c.bf16 %v1173_v63, %v1173_v63  ;;  %v1369_v3 = vsel %vm310_vm2, %v1173_v63, 0.0  ;;  %v1501_v4 = vmul.f32 %v1173_v63, %v1173_v63  ;;  %v1135_v61 = vld [vmem:[#allocation2 + $0x110] sm:$0xff] }
  0xd0   : > { %v2479_v6 = vadd.f32 %v1369_v3, %v1368_v42  ;;  %v1253_v22 = vpack.c.bf16 %v2493_v17, %v2493_v17  ;;  %v1266_v42 = vpack.c.bf16 %v2510_v29, %v2510_v29  ;;  %v2550_v63 = vadd.f32 %v2371_v41, %v1135_v61 }
  0xd1   : > { %1302 = vst.msk [vmem:[%s2389_s12 + $0x10] sm:$0xf] %vm1297_vm3, %v1237_v2  ;;  %v1568_v8 = vsel %vm310_vm2, %v1501_v4, 0.0  ;;  %v399_v4 = vld [vmem:[#allocation2 + $0xc0] sm:$0xff] }
  0xd2   : > { %v824_v5 = vpop.f32.mrf.mxu0  ;;  %v2484_v10 = vadd.f32 %v1568_v8, %v1567_v47  ;;  %v864_v12 = vpop.f32.mrf.mxu1  ;;  %1318 = vst.msk [vmem:[%s2389_s12 + $0x50] sm:$0xf] %vm1297_vm3, %v1253_v22  ;;  %v1004_v47 = vadd.f32 %v896_v40, %v410_v39 }
  0xd3   : > { %v975_v7 = vadd.f32 %v824_v5, %v381_v0  ;;  %v991_v32 = vadd.f32 %v864_v12, %v397_v26  ;;  %1331 = vst.msk [vmem:[%s2389_s12 + $0x84] sm:$0xf] %vm1297_vm3, %v1266_v42  ;;  %v899_v55 = vpop.f32.mrf.mxu2  ;;  %v931_v22 = vpop.f32.mrf.mxu3  ;;  %v385_v26 = vld [vmem:[#allocation2 + $0x50] sm:$0xff] }
  0xd4   : > { %v1106_v9 = vld [vmem:[#allocation2 + $0x28] sm:$0xff]  ;;  %1069 = vst.msk [vmem:[#allocation2 + $0x118] sm:$0xff] %vm310_vm2, %v1004_v47  ;;  %v386_v47 = vld [vmem:[#allocation2 + $0x58] sm:$0xff] }
  0xd5   : > { %v2487_v11 = vadd.f32 %v2371_v41, %v1106_v9  ;;  %1040 = vst.msk [vmem:[#allocation2 + $0x30] sm:$0xff] %vm310_vm2, %v975_v7  ;;  %v1122_v21 = vld [vmem:[#allocation2 + $0xa8] sm:$0xff]  ;;  %v1267_v7 = vpack.c.bf16 %v2550_v63, %v2550_v63  ;;  %v411_v9 = vld [vmem:[#allocation2 + $0x120] sm:$0xff] }
  0xd6   : > { %v2507_v28 = vadd.f32 %v2371_v41, %v1122_v21  ;;  %1056 = vst.msk [vmem:[#allocation2 + $0xb0] sm:$0xff] %vm310_vm2, %v991_v32 }
  0xd7   : > { %v1238_v16 = vpack.c.bf16 %v2487_v11, %v2487_v11  ;;  %1332 = vst.msk [vmem:[%s2389_s12 + $0x88] sm:$0xf] %vm1297_vm3, %v1267_v7 }
  0xd8   : > { %v1254_v36 = vpack.c.bf16 %v2507_v28, %v2507_v28 }
  0xd9   : > { %1303 = vst.msk [vmem:[%s2389_s12 + $0x14] sm:$0xf] %vm1297_vm3, %v1238_v16 }
  0xda   : > { %v826_v24 = vpop.f32.mrf.mxu0  ;;  %v866_v38 = vpop.f32.mrf.mxu1  ;;  %1319 = vst.msk [vmem:[%s2389_s12 + $0x54] sm:$0xf] %vm1297_vm3, %v1254_v36 }
  0xdb   : > { %v976_v27 = vadd.f32 %v826_v24, %v382_v19  ;;  %v992_v45 = vadd.f32 %v866_v38, %v398_v37  ;;  %v1136_v3 = vld [vmem:[#allocation2 + $0x118] sm:$0xff]  ;;  %v901_v18 = vpop.f32.mrf.mxu2  ;;  %v1005_v24 = vadd.f32 %v899_v55, %v411_v9 }
  0xdc   : > { %v1107_v31 = vld [vmem:[#allocation2 + $0x30] sm:$0xff]  ;;  %v2558_v8 = vadd.f32 %v2371_v41, %v1136_v3  ;;  %v1006_v38 = vadd.f32 %v901_v18, %v412_v30 }
  0xdd   : > { %v2515_v33 = vadd.f32 %v2371_v41, %v1107_v31  ;;  %1041 = vst.msk [vmem:[#allocation2 + $0x38] sm:$0xff] %vm310_vm2, %v976_v27  ;;  %v1123_v53 = vld [vmem:[#allocation2 + $0xb0] sm:$0xff]  ;;  %v1017_v27 = vadd.f32 %v929_v57, %v423_v15  ;;  %v424_v31 = vld [vmem:[#allocation2 + $0x188] sm:$0xff] }
  0xde   : > { %1057 = vst.msk [vmem:[#allocation2 + $0xb8] sm:$0xff] %vm310_vm2, %v992_v45  ;;  %v2539_v56 = vadd.f32 %v2371_v41, %v1123_v53  ;;  %v1268_v19 = vpack.c.bf16 %v2558_v8, %v2558_v8  ;;  %v1018_v40 = vadd.f32 %v931_v22, %v424_v31  ;;  %v934_v45 = vpop.f32.mrf.mxu3 }
  0xdf   : > { %v1239_v44 = vpack.c.bf16 %v2515_v33, %v2515_v33  ;;  %1070 = vst.msk [vmem:[#allocation2 + $0x120] sm:$0xff] %vm310_vm2, %v1005_v24 }
  0xe0   : > { %v1255_v60 = vpack.c.bf16 %v2539_v56, %v2539_v56  ;;  %1333 = vst.msk [vmem:[%s2389_s12 + $0x8c] sm:$0xf] %vm1297_vm3, %v1268_v19 }
  0xe1   : > { %1304 = vst.msk [vmem:[%s2389_s12 + $0x18] sm:$0xf] %vm1297_vm3, %v1239_v44 }
  0xe2   : > { %v829_v48 = vpop.f32.mrf.mxu0  ;;  %v869_v54 = vpop.f32.mrf.mxu1  ;;  %1320 = vst.msk [vmem:[%s2389_s12 + $0x58] sm:$0xf] %vm1297_vm3, %v1255_v60 }
  0xe3   : > { %v977_v50 = vadd.f32 %v829_v48, %v383_v46  ;;  %v993_v21 = vadd.f32 %v869_v54, %v399_v4  ;;  %1082 = vst.msk [vmem:[#allocation2 + $0x180] sm:$0xff] %vm310_vm2, %v1017_v27  ;;  %v904_v44 = vpop.f32.mrf.mxu2 }
  0xe4   : > { %v1108_v51 = vld [vmem:[#allocation2 + $0x38] sm:$0xff]  ;;  %1071 = vst.msk [vmem:[#allocation2 + $0x128] sm:$0xff] %vm310_vm2, %v1006_v38 }
  0xe5   : > { %v2535_v52 = vadd.f32 %v2371_v41, %v1108_v51  ;;  %1042 = vst.msk [vmem:[#allocation2 + $0x40] sm:$0xff] %vm310_vm2, %v977_v50  ;;  %v1124_v0 = vld [vmem:[#allocation2 + $0xb8] sm:$0xff] }
  0xe6   : > { %v2553_v2 = vadd.f32 %v2371_v41, %v1124_v0  ;;  %1058 = vst.msk [vmem:[#allocation2 + $0xc0] sm:$0xff] %vm310_vm2, %v993_v21  ;;  %v1137_v53 = vld [vmem:[#allocation2 + $0x120] sm:$0xff]  ;;  %v936_v15 = vpop.f32.mrf.mxu3 }
  0xe7   : > { %v1240_v58 = vpack.c.bf16 %v2535_v52, %v2535_v52  ;;  %1083 = vst.msk [vmem:[#allocation2 + $0x188] sm:$0xff] %vm310_vm2, %v1018_v40  ;;  %v2596_v55 = vadd.f32 %v2371_v41, %v1137_v53  ;;  %v387_v21 = vld [vmem:[#allocation2 + $0x60] sm:$0xff]  ;;  %v388_v53 = vld [vmem:[#allocation2 + $0x68] sm:$0xff] }
  0xe8   : > { %v1256_v13 = vpack.c.bf16 %v2553_v2, %v2553_v2 }
  0xe9   : > { %1305 = vst.msk [vmem:[%s2389_s12 + $0x1c] sm:$0xf] %vm1297_vm3, %v1240_v58  ;;  %v401_v58 = vld [vmem:[#allocation2 + $0xd0] sm:$0xff] }
  0xea   : > { %v831_v62 = vpop.f32.mrf.mxu0  ;;  %v871_v16 = vpop.f32.mrf.mxu1  ;;  %1321 = vst.msk [vmem:[%s2389_s12 + $0x5c] sm:$0xf] %vm1297_vm3, %v1256_v13  ;;  %v1149_v57 = vld [vmem:[#allocation2 + $0x180] sm:$0xff] }
  0xeb   : > { %v978_v1 = vadd.f32 %v831_v62, %v384_v59  ;;  %v994_v36 = vadd.f32 %v871_v16, %v400_v25  ;;  %v2601_v61 = vadd.f32 %v2371_v41, %v1149_v57  ;;  %v413_v62 = vld [vmem:[#allocation2 + $0x130] sm:$0xff]  ;;  %v1138_v9 = vld [vmem:[#allocation2 + $0x128] sm:$0xff] }
  0xec   : > { %v1109_v5 = vld [vmem:[#allocation2 + $0x40] sm:$0xff]  ;;  %v1007_v19 = vadd.f32 %v904_v44, %v413_v62  ;;  %v425_v25 = vld [vmem:[#allocation2 + $0x190] sm:$0xff] }
  0xed   : > { %v2561_v12 = vadd.f32 %v2371_v41, %v1109_v5  ;;  %1043 = vst.msk [vmem:[#allocation2 + $0x48] sm:$0xff] %vm310_vm2, %v978_v1  ;;  %v1125_v48 = vld [vmem:[#allocation2 + $0xc0] sm:$0xff]  ;;  %v1269_v1 = vpack.c.bf16 %v2596_v55, %v2596_v55  ;;  %v906_v5 = vpop.f32.mrf.mxu2  ;;  %v1281_v7 = vpack.c.bf16 %v2601_v61, %v2601_v61  ;;  %v1019_v38 = vadd.f32 %v934_v45, %v425_v25 }
  0xee   : > { %1059 = vst.msk [vmem:[#allocation2 + $0xc8] sm:$0xff] %vm310_vm2, %v994_v36  ;;  %v2593_v51 = vadd.f32 %v2371_v41, %v1125_v48  ;;  %v1150_v18 = vld [vmem:[#allocation2 + $0x188] sm:$0xff]  ;;  %v939_v48 = vpop.f32.mrf.mxu3 }
  0xef   : > { %v1241_v23 = vpack.c.bf16 %v2561_v12, %v2561_v12  ;;  %1334 = vst.msk [vmem:[%s2389_s12 + $0x90] sm:$0xf] %vm1297_vm3, %v1269_v1  ;;  %v2628_v24 = vadd.f32 %v2371_v41, %v1150_v18 }
  0xf0   : > { %v1257_v60 = vpack.c.bf16 %v2593_v51, %v2593_v51  ;;  %1346 = vst.msk [vmem:[%s2389_s12 + $0xc0] sm:$0xf] %vm1297_vm3, %v1281_v7 }
  0xf1   : > { %1306 = vst.msk [vmem:[%s2389_s12 + $0x20] sm:$0xf] %vm1297_vm3, %v1241_v23  ;;  %v2623_v23 = vadd.f32 %v2371_v41, %v1138_v9 }
  0xf2   : > { %v834_v32 = vpop.f32.mrf.mxu0  ;;  %v874_v43 = vpop.f32.mrf.mxu1  ;;  %1322 = vst.msk [vmem:[%s2389_s12 + $0x60] sm:$0xf] %vm1297_vm3, %v1257_v60 }
  0xf3   : > { %v979_v37 = vadd.f32 %v834_v32, %v385_v26  ;;  %v995_v13 = vadd.f32 %v874_v43, %v401_v58  ;;  %v1270_v31 = vpack.c.bf16 %v2623_v23, %v2623_v23  ;;  %1072 = vst.msk [vmem:[#allocation2 + $0x130] sm:$0xff] %vm310_vm2, %v1007_v19  ;;  %v402_v32 = vld [vmem:[#allocation2 + $0xd8] sm:$0xff] }
  0xf4   : > { %v1110_v39 = vld [vmem:[#allocation2 + $0x48] sm:$0xff]  ;;  %v426_v43 = vld [vmem:[#allocation2 + $0x198] sm:$0xff]  ;;  %1084 = vst.msk [vmem:[#allocation2 + $0x190] sm:$0xff] %vm310_vm2, %v1019_v38  ;;  %v389_v38 = vld [vmem:[#allocation2 + $0x70] sm:$0xff] }
  0xf5   : > { %v2582_v42 = vadd.f32 %v2371_v41, %v1110_v39  ;;  %1044 = vst.msk [vmem:[#allocation2 + $0x50] sm:$0xff] %vm310_vm2, %v979_v37  ;;  %v1126_v3 = vld [vmem:[#allocation2 + $0xc8] sm:$0xff]  ;;  %v1282_v37 = vpack.c.bf16 %v2628_v24, %v2628_v24  ;;  %v414_v39 = vld [vmem:[#allocation2 + $0x138] sm:$0xff] }
  0xf6   : > { %v2620_v22 = vadd.f32 %v2371_v41, %v1126_v3  ;;  %1060 = vst.msk [vmem:[#allocation2 + $0xd0] sm:$0xff] %vm310_vm2, %v995_v13  ;;  %v1008_v45 = vadd.f32 %v906_v5, %v414_v39  ;;  %v1502_v5 = vmul.f32 %v2487_v11, %v2487_v11  ;;  %v403_v13 = vld [vmem:[#allocation2 + $0xe0] sm:$0xff]  ;;  %v1371_v39 = vsel %vm310_vm2, %v2487_v11, 0.0 }
  0xf7   : > { %v1242_v46 = vpack.c.bf16 %v2582_v42, %v2582_v42  ;;  %1335 = vst.msk [vmem:[%s2389_s12 + $0x94] sm:$0xf] %vm1297_vm3, %v1270_v31  ;;  %v1373_v11 = vsel %vm310_vm2, %v2515_v33, 0.0 }
  0xf8   : > { %v1258_v27 = vpack.c.bf16 %v2620_v22, %v2620_v22  ;;  %1347 = vst.msk [vmem:[%s2389_s12 + $0xc4] sm:$0xf] %vm1297_vm3, %v1282_v37 }
  0xf9   : > { %1307 = vst.msk [vmem:[%s2389_s12 + $0x24] sm:$0xf] %vm1297_vm3, %v1242_v46  ;;  %v909_v46 = vpop.f32.mrf.mxu2 }
  0xfa   : > { %v836_v50 = vpop.f32.mrf.mxu0  ;;  %v876_v4 = vpop.f32.mrf.mxu1  ;;  %1323 = vst.msk [vmem:[%s2389_s12 + $0x64] sm:$0xf] %vm1297_vm3, %v1258_v27  ;;  %v1139_v60 = vld [vmem:[#allocation2 + $0x130] sm:$0xff] }
  0xfb   : > { %v980_v54 = vadd.f32 %v836_v50, %v386_v47  ;;  %v996_v47 = vadd.f32 %v876_v4, %v402_v32  ;;  %v2658_v1 = vadd.f32 %v2371_v41, %v1139_v60  ;;  %1073 = vst.msk [vmem:[#allocation2 + $0x138] sm:$0xff] %vm310_vm2, %v1008_v45  ;;  %v404_v32 = vld [vmem:[#allocation2 + $0xe8] sm:$0xff]  ;;  %v1372_v60 = vadd.f32 %v1371_v39, %v2479_v6 }
  0xfc   : > { %v1111_v59 = vld [vmem:[#allocation2 + $0x50] sm:$0xff] }
  0xfd   : > { %v2604_v0 = vadd.f32 %v2371_v41, %v1111_v59  ;;  %1045 = vst.msk [vmem:[#allocation2 + $0x58] sm:$0xff] %vm310_vm2, %v980_v54  ;;  %v1020_v54 = vadd.f32 %v936_v15, %v426_v43  ;;  %v1127_v57 = vld [vmem:[#allocation2 + $0xd0] sm:$0xff]  ;;  %v1271_v9 = vpack.c.bf16 %v2658_v1, %v2658_v1  ;;  %v415_v15 = vld [vmem:[#allocation2 + $0x140] sm:$0xff]  ;;  %v1570_v43 = vsel %vm310_vm2, %v1502_v5, 0.0  ;;  %v416_v5 = vld [vmem:[#allocation2 + $0x148] sm:$0xff] }
  0xfe   : > { %v2654_v59 = vadd.f32 %v2371_v41, %v1127_v57  ;;  %1061 = vst.msk [vmem:[#allocation2 + $0xd8] sm:$0xff] %vm310_vm2, %v996_v47  ;;  %v1009_v25 = vadd.f32 %v909_v46, %v415_v15  ;;  %v1504_v46 = vmul.f32 %v2535_v52, %v2535_v52  ;;  %v428_v15 = vld [vmem:[#allocation2 + $0x1a8] sm:$0xff] }
  0xff   : > { %v1243_v16 = vpack.c.bf16 %v2604_v0, %v2604_v0  ;;  %1085 = vst.msk [vmem:[#allocation2 + $0x198] sm:$0xff] %vm310_vm2, %v1020_v54 }
 0x100   : > { %v1259_v4 = vpack.c.bf16 %v2654_v59, %v2654_v59  ;;  %1336 = vst.msk [vmem:[%s2389_s12 + $0x98] sm:$0xf] %vm1297_vm3, %v1271_v9  ;;  %v1375_v9 = vsel %vm310_vm2, %v2535_v52, 0.0  ;;  %v1574_v52 = vsel %vm310_vm2, %v1504_v46, 0.0  ;;  %v390_v46 = vld [vmem:[#allocation2 + $0x78] sm:$0xff] }
 0x101   : > { %1308 = vst.msk [vmem:[%s2389_s12 + $0x28] sm:$0xf] %vm1297_vm3, %v1243_v16  ;;  %v427_v16 = vld [vmem:[#allocation2 + $0x1a0] sm:$0xff]  ;;  %v911_v19 = vpop.f32.mrf.mxu2 }
 0x102   : > { %v839_v26 = vpop.f32.mrf.mxu0  ;;  %v879_v44 = vpop.f32.mrf.mxu1  ;;  %1324 = vst.msk [vmem:[%s2389_s12 + $0x68] sm:$0xf] %vm1297_vm3, %v1259_v4  ;;  %v1021_v31 = vadd.f32 %v939_v48, %v427_v16  ;;  %v1010_v39 = vadd.f32 %v911_v19, %v416_v5 }
 0x103   : > { %v981_v30 = vadd.f32 %v839_v26, %v387_v21  ;;  %v997_v21 = vadd.f32 %v879_v44, %v403_v13  ;;  %v941_v26 = vpop.f32.mrf.mxu3  ;;  %1074 = vst.msk [vmem:[#allocation2 + $0x140] sm:$0xff] %vm310_vm2, %v1009_v25  ;;  %v1505_v13 = vmul.f32 %v2561_v12, %v2561_v12 }
 0x104   : > { %v1112_v36 = vld [vmem:[#allocation2 + $0x58] sm:$0xff]  ;;  %1086 = vst.msk [vmem:[#allocation2 + $0x1a0] sm:$0xff] %vm310_vm2, %v1021_v31  ;;  %v1377_v31 = vsel %vm310_vm2, %v2561_v12, 0.0  ;;  %v1379_v12 = vsel %vm310_vm2, %v2582_v42, 0.0 }
 0x105   : > { %v2641_v40 = vadd.f32 %v2371_v41, %v1112_v36  ;;  %1046 = vst.msk [vmem:[#allocation2 + $0x60] sm:$0xff] %vm310_vm2, %v981_v30  ;;  %v1151_v30 = vld [vmem:[#allocation2 + $0x190] sm:$0xff]  ;;  %v1503_v36 = vmul.f32 %v2515_v33, %v2515_v33  ;;  %v1128_v44 = vld [vmem:[#allocation2 + $0xd8] sm:$0xff] }
 0x106   : > { %v2681_v37 = vadd.f32 %v2371_v41, %v1151_v30  ;;  %1062 = vst.msk [vmem:[#allocation2 + $0xe0] sm:$0xff] %vm310_vm2, %v997_v21  ;;  %v2697_v54 = vadd.f32 %v2371_v41, %v1128_v44  ;;  %v1374_v21 = vadd.f32 %v1373_v11, %v1372_v60 }
 0x107   : > { %v1244_v50 = vpack.c.bf16 %v2641_v40, %v2641_v40  ;;  %1075 = vst.msk [vmem:[#allocation2 + $0x148] sm:$0xff] %vm310_vm2, %v1010_v39 }
 0x108   : > { %v1283_v47 = vpack.c.bf16 %v2681_v37, %v2681_v37  ;;  %v1376_v44 = vadd.f32 %v1375_v9, %v1374_v21 }
 0x109   : > { %1309 = vst.msk [vmem:[%s2389_s12 + $0x2c] sm:$0xf] %vm1297_vm3, %v1244_v50  ;;  %v1140_v50 = vld [vmem:[#allocation2 + $0x138] sm:$0xff] }
 0x10a   : > { %v841_v58 = vpop.f32.mrf.mxu0  ;;  %v881_v18 = vpop.f32.mrf.mxu1  ;;  %v2700_v57 = vadd.f32 %v2371_v41, %v1140_v50  ;;  %1348 = vst.msk [vmem:[%s2389_s12 + $0xc8] sm:$0xf] %vm1297_vm3, %v1283_v47  ;;  %v1022_v47 = vadd.f32 %v941_v26, %v428_v15  ;;  %v1507_v50 = vmul.f32 %v2604_v0, %v2604_v0  ;;  %v1141_v19 = vld [vmem:[#allocation2 + $0x140] sm:$0xff] }
 0x10b   : > { %v982_v62 = vadd.f32 %v841_v58, %v388_v53  ;;  %v998_v45 = vadd.f32 %v881_v18, %v404_v32  ;;  %v1152_v58 = vld [vmem:[#allocation2 + $0x198] sm:$0xff]  ;;  %v2723_v18 = vpop.f32.mrf.mxu2  ;;  %v2731_v30 = vpop.f32.mrf.mxu3  ;;  %v1506_v32 = vmul.f32 %v2582_v42, %v2582_v42  ;;  %v2758_v60 = vadd.f32 %v2371_v41, %v1141_v19  ;;  %v1153_v42 = vld [vmem:[#allocation2 + $0x1a0] sm:$0xff]  ;;  %v429_v19 = vld [vmem:[#allocation2 + $0x1b0] sm:$0xff] }
 0x10c   : > { %v1113_v3 = vld [vmem:[#allocation2 + $0x60] sm:$0xff]  ;;  %v2709_v33 = vadd.f32 %v2371_v41, %v1152_v58  ;;  %v1272_v25 = vpack.c.bf16 %v2700_v57, %v2700_v57  ;;  %v1508_v58 = vmul.f32 %v2641_v40, %v2641_v40  ;;  %v2769_v21 = vadd.f32 %v2371_v41, %v1153_v42  ;;  %1087 = vst.msk [vmem:[#allocation2 + $0x1a8] sm:$0xff] %vm310_vm2, %v1022_v47 }
 0x10d   : > { %v2667_v7 = vadd.f32 %v2371_v41, %v1113_v3  ;;  %1047 = vst.msk [vmem:[#allocation2 + $0x68] sm:$0xff] %vm310_vm2, %v982_v62  ;;  %v1571_v62 = vadd.f32 %v1570_v43, %v2484_v10  ;;  %v1572_v3 = vsel %vm310_vm2, %v1503_v36, 0.0  ;;  %v1260_v10 = vpack.c.bf16 %v2697_v54, %v2697_v54 }
 0x10e   : > { %1063 = vst.msk [vmem:[#allocation2 + $0xe8] sm:$0xff] %vm310_vm2, %v998_v45  ;;  %v1273_v15 = vpack.c.bf16 %v2758_v60, %v2758_v60 }
 0x10f   : > { %v1245_v27 = vpack.c.bf16 %v2667_v7, %v2667_v7  ;;  %1325 = vst.msk [vmem:[%s2389_s12 + $0x6c] sm:$0xf] %vm1297_vm3, %v1260_v10  ;;  %v1573_v43 = vadd.f32 %v1572_v3, %v1571_v62  ;;  %v1578_v62 = vsel %vm310_vm2, %v1506_v32, 0.0  ;;  %v1381_v3 = vsel %vm310_vm2, %v2604_v0, 0.0  ;;  %v405_v32 = vld [vmem:[#allocation2 + $0xf0] sm:$0xff] }
 0x110   : > { %1337 = vst.msk [vmem:[%s2389_s12 + $0x9c] sm:$0xf] %vm1297_vm3, %v1272_v25  ;;  %v1580_v0 = vsel %vm310_vm2, %v1507_v50, 0.0  ;;  %v1509_v25 = vmul.f32 %v2667_v7, %v2667_v7  ;;  %v1385_v47 = vsel %vm310_vm2, %v2667_v7, 0.0 }
 0x111   : > { %1310 = vst.msk [vmem:[%s2389_s12 + $0x30] sm:$0xf] %vm1297_vm3, %v1245_v27  ;;  %v1284_v27 = vpack.c.bf16 %v2709_v33, %v2709_v33  ;;  %v1575_v11 = vadd.f32 %v1574_v52, %v1573_v43  ;;  %v1383_v52 = vsel %vm310_vm2, %v2641_v40, 0.0  ;;  %v1285_v40 = vpack.c.bf16 %v2769_v21, %v2769_v21 }
 0x112   : > { %v844_v48 = vpop.f32.mrf.mxu0  ;;  %v2721_v16 = vpop.f32.mrf.mxu1  ;;  %1338 = vst.msk [vmem:[%s2389_s12 + $0xa0] sm:$0xf] %vm1297_vm3, %v1273_v15 }
 0x113   : > { %v983_v53 = vadd.f32 %v844_v48, %v389_v38  ;;  %v1129_v38 = vld [vmem:[#allocation2 + $0xe0] sm:$0xff]  ;;  %v1576_v48 = vsel %vm310_vm2, %v1505_v13, 0.0  ;;  %1349 = vst.msk [vmem:[%s2389_s12 + $0xcc] sm:$0xf] %vm1297_vm3, %v1284_v27  ;;  %v999_v42 = vadd.f32 %v2721_v16, %v405_v32  ;;  %v1023_v16 = vadd.f32 %v2731_v30, %v429_v19  ;;  %v430_v30 = vld [vmem:[#allocation2 + $0x1b8] sm:$0xff] }
 0x114   : > { %v1114_v4 = vld [vmem:[#allocation2 + $0x68] sm:$0xff]  ;;  %v2751_v45 = vadd.f32 %v2371_v41, %v1129_v38  ;;  %v1577_v9 = vadd.f32 %v1576_v48, %v1575_v11  ;;  %v916_v38 = vpop.f32.mrf.mxu2  ;;  %v406_v11 = vld [vmem:[#allocation2 + $0xf8] sm:$0xff]  ;;  %1350 = vst.msk [vmem:[%s2389_s12 + $0xd0] sm:$0xf] %vm1297_vm3, %v1285_v40 }
 0x115   : > { %v2716_v6 = vadd.f32 %v2371_v41, %v1114_v4  ;;  %1048 = vst.msk [vmem:[#allocation2 + $0x70] sm:$0xff] %vm310_vm2, %v983_v53  ;;  %v1378_v53 = vadd.f32 %v1377_v31, %v1376_v44  ;;  %v1130_v31 = vld [vmem:[#allocation2 + $0xe8] sm:$0xff]  ;;  %v1582_v44 = vsel %vm310_vm2, %v1508_v58, 0.0 }
 0x116   : > { %v1261_v5 = vpack.c.bf16 %v2751_v45, %v2751_v45  ;;  %v1579_v39 = vadd.f32 %v1578_v62, %v1577_v9  ;;  %v2791_v50 = vadd.f32 %v2371_v41, %v1130_v31  ;;  %v1584_v62 = vsel %vm310_vm2, %v1509_v25, 0.0  ;;  %1064 = vst.msk [vmem:[#allocation2 + $0xf0] sm:$0xff] %vm310_vm2, %v999_v42  ;;  %v418_v25 = vld [vmem:[#allocation2 + $0x158] sm:$0xff] }
 0x117   : > { %v1246_v36 = vpack.c.bf16 %v2716_v6, %v2716_v6  ;;  %v1380_v13 = vadd.f32 %v1379_v12, %v1378_v53  ;;  %v1510_v48 = vmul.f32 %v2716_v6, %v2716_v6  ;;  %1088 = vst.msk [vmem:[#allocation2 + $0x1b0] sm:$0xff] %vm310_vm2, %v1023_v16 }
 0x118   : > { %1326 = vst.msk [vmem:[%s2389_s12 + $0x70] sm:$0xf] %vm1297_vm3, %v1261_v5  ;;  %v1581_v58 = vadd.f32 %v1580_v0, %v1579_v39  ;;  %v1262_v5 = vpack.c.bf16 %v2791_v50, %v2791_v50 }
 0x119   : > { %1311 = vst.msk [vmem:[%s2389_s12 + $0x34] sm:$0xf] %vm1297_vm3, %v1246_v36  ;;  %v417_v36 = vld [vmem:[#allocation2 + $0x150] sm:$0xff]  ;;  %v1382_v43 = vadd.f32 %v1381_v3, %v1380_v13  ;;  %v1387_v3 = vsel %vm310_vm2, %v2716_v6, 0.0 }
 0x11a   : > { %v846_v26 = vpop.f32.mrf.mxu0  ;;  %v886_v53 = vpop.f32.mrf.mxu1  ;;  %v1011_v7 = vadd.f32 %v2723_v18, %v417_v36  ;;  %v1583_v9 = vadd.f32 %v1582_v44, %v1581_v58  ;;  %v1586_v18 = vsel %vm310_vm2, %v1510_v48, 0.0  ;;  %1327 = vst.msk [vmem:[%s2389_s12 + $0x74] sm:$0xf] %vm1297_vm3, %v1262_v5  ;;  %v1393_v5 = vsel %vm310_vm2, %v2428_v14, 0.0 }
 0x11b   : > { %v984_v4 = vadd.f32 %v846_v26, %v390_v46  ;;  %v946_v46 = vpop.f32.mrf.mxu3  ;;  %v1384_v26 = vadd.f32 %v1383_v52, %v1382_v43  ;;  %v1000_v15 = vadd.f32 %v886_v53, %v406_v11  ;;  %v1154_v52 = vld [vmem:[#allocation2 + $0x1a8] sm:$0xff]  ;;  %v1012_v11 = vadd.f32 %v916_v38, %v418_v25 }
 0x11c   : > { %v1115_v10 = vld [vmem:[#allocation2 + $0x70] sm:$0xff]  ;;  %v1585_v31 = vadd.f32 %v1584_v62, %v1583_v9  ;;  %v2814_v39 = vadd.f32 %v2371_v41, %v1154_v52  ;;  %1076 = vst.msk [vmem:[#allocation2 + $0x150] sm:$0xff] %vm310_vm2, %v1011_v7  ;;  %v1024_v7 = vadd.f32 %v946_v46, %v430_v30  ;;  %v1514_v62 = vmul.f32 %v2445_v34, %v2445_v34 }
 0x11d   : > { %v1183_v27 = vadd.f32 %v2371_v41, %v1115_v10  ;;  %1049 = vst.msk [vmem:[#allocation2 + $0x78] sm:$0xff] %vm310_vm2, %v984_v4  ;;  %v1386_v13 = vadd.f32 %v1385_v47, %v1384_v26  ;;  %v1142_v10 = vld [vmem:[#allocation2 + $0x148] sm:$0xff]  ;;  %v919_v47 = vpop.f32.mrf.mxu2  ;;  %v1131_v9 = vld [vmem:[#allocation2 + $0xf0] sm:$0xff]  ;;  %v1517_v30 = vmul.f32 %v2493_v17, %v2493_v17 }
 0x11e   : > { %v2811_v6 = vadd.f32 %v2371_v41, %v1142_v10  ;;  %v1587_v48 = vadd.f32 %v1586_v18, %v1585_v31  ;;  %v1286_v19 = vpack.c.bf16 %v2814_v39, %v2814_v39  ;;  %1065 = vst.msk [vmem:[#allocation2 + $0xf8] sm:$0xff] %vm310_vm2, %v1000_v15  ;;  %v2842_v16 = vadd.f32 %v2371_v41, %v1131_v9 }
 0x11f   : > { %v1247_v12 = vpack.c.bf16 %v1183_v27, %v1183_v27  ;;  %v1511_v4 = vmul.f32 %v1183_v27, %v1183_v27  ;;  %v1389_v0 = vsel %vm310_vm2, %v1183_v27, 0.0  ;;  %v1388_v32 = vadd.f32 %v1387_v3, %v1386_v13  ;;  %1077 = vst.msk [vmem:[#allocation2 + $0x158] sm:$0xff] %vm310_vm2, %v1012_v11 }
 0x120   : > { %v1513_v27 = vmul.f32 %v2428_v14, %v2428_v14  ;;  %v1274_v40 = vpack.c.bf16 %v2811_v6, %v2811_v6  ;;  %1351 = vst.msk [vmem:[%s2389_s12 + $0xd4] sm:$0xf] %vm1297_vm3, %v1286_v19  ;;  %v1395_v15 = vsel %vm310_vm2, %v2445_v34, 0.0  ;;  %v1397_v14 = vsel %vm310_vm2, %v2448_v35, 0.0  ;;  %v2871_v19 = vld [vmem:[%s3237_s2] ss:$0 sm:$0xff] }
 0x121   : > { %1312 = vst.msk [vmem:[%s2389_s12 + $0x38] sm:$0xf] %vm1297_vm3, %v1247_v12  ;;  %v1588_v43 = vsel %vm310_vm2, %v1511_v4, 0.0  ;;  %v1390_v12 = vadd.f32 %v1389_v0, %v1388_v32  ;;  %v1515_v18 = vmul.f32 %v2448_v35, %v2448_v35  ;;  %v1594_v52 = vsel %vm310_vm2, %v1514_v62, 0.0 }
 0x122   : > { %1339 = vst.msk [vmem:[%s2389_s12 + $0xa4] sm:$0xf] %vm1297_vm3, %v1274_v40  ;;  %v1589_v3 = vadd.f32 %v1588_v43, %v1587_v48  ;;  %v1592_v46 = vsel %vm310_vm2, %v1513_v27, 0.0  ;;  %v1263_v32 = vpack.c.bf16 %v2842_v16, %v2842_v16  ;;  %v1516_v34 = vmul.f32 %v2462_v49, %v2462_v49 }
 0x123   : > { %v2827_v53 = vpop.f32.mrf.mxu3  ;;  %v1143_v0 = vld [vmem:[#allocation2 + $0x150] sm:$0xff]  ;;  %1089 = vst.msk [vmem:[#allocation2 + $0x1b8] sm:$0xff] %vm310_vm2, %v1024_v7 }
 0x124   : > { %v1116_v36 = vld [vmem:[#allocation2 + $0x78] sm:$0xff]  ;;  %v2861_v35 = vadd.f32 %v2371_v41, %v1143_v0  ;;  %1328 = vst.msk [vmem:[%s2389_s12 + $0x78] sm:$0xf] %vm1297_vm3, %v1263_v32  ;;  %v1403_v0 = vsel %vm310_vm2, %v2507_v28, 0.0  ;;  %v432_v32 = vld [vmem:[#allocation2 + $0x1c8] sm:$0xff] }
 0x125   : > { %v1184_v44 = vadd.f32 %v2371_v41, %v1116_v36  ;;  %v1155_v36 = vld [vmem:[#allocation2 + $0x1b0] sm:$0xff]  ;;  %v1132_v43 = vld [vmem:[#allocation2 + $0xf8] sm:$0xff]  ;;  %v921_v40 = vpop.f32.mrf.mxu2 }
 0x126   : > { %v2864_v27 = vadd.f32 %v2371_v41, %v1155_v36  ;;  %v2874_v11 = vadd.f32 %v2871_v19, %v1132_v43  ;;  %v1596_v41 = vsel %vm310_vm2, %v1515_v18, 0.0  ;;  %v1275_v7 = vpack.c.bf16 %v2861_v35, %v2861_v35 }
 0x127   : > { %v1248_v58 = vpack.c.bf16 %v1184_v44, %v1184_v44  ;;  %v1391_v26 = vsel %vm310_vm2, %v1184_v44, 0.0  ;;  %v1512_v42 = vmul.f32 %v1184_v44, %v1184_v44  ;;  %v419_v44 = vld [vmem:[#allocation2 + $0x160] sm:$0xff] }
 0x128   : > { %v1392_v4 = vadd.f32 %v1391_v26, %v1390_v12  ;;  %1340 = vst.msk [vmem:[%s2389_s12 + $0xa8] sm:$0xf] %vm1297_vm3, %v1275_v7  ;;  %v1264_v9 = vpack.c.bf16 %v2874_v11, %v2874_v11 }
 0x129   : > { %1313 = vst.msk [vmem:[%s2389_s12 + $0x3c] sm:$0xf] %vm1297_vm3, %v1248_v58  ;;  %v1590_v38 = vsel %vm310_vm2, %v1512_v42, 0.0  ;;  %v1013_v58 = vadd.f32 %v919_v47, %v419_v44  ;;  %v1399_v42 = vsel %vm310_vm2, %v2462_v49, 0.0  ;;  %v1598_v47 = vsel %vm310_vm2, %v1516_v34, 0.0 }
 0x12a   : > { %v1394_v13 = vadd.f32 %v1393_v5, %v1392_v4  ;;  %v1591_v10 = vadd.f32 %v1590_v38, %v1589_v3  ;;  %v1287_v4 = vpack.c.bf16 %v2864_v27, %v2864_v27  ;;  %v431_v5 = vld [vmem:[#allocation2 + $0x1c0] sm:$0xff]  ;;  %v1401_v38 = vsel %vm310_vm2, %v2493_v17, 0.0  ;;  %v1156_v17 = vld [vmem:[#allocation2 + $0x1b8] sm:$0xff]  ;;  %1329 = vst.msk [vmem:[%s2389_s12 + $0x7c] sm:$0xf] %vm1297_vm3, %v1264_v9 }
 0x12b   : > { %v951_v26 = vpop.f32.mrf.mxu3  ;;  %1078 = vst.msk [vmem:[#allocation2 + $0x160] sm:$0xff] %vm310_vm2, %v1013_v58  ;;  %v1518_v49 = vmul.f32 %v2507_v28, %v2507_v28  ;;  %v1405_v44 = vsel %vm310_vm2, %v2539_v56, 0.0 }
 0x12c   : > { %v1396_v25 = vadd.f32 %v1395_v15, %v1394_v13  ;;  %v1593_v31 = vadd.f32 %v1592_v46, %v1591_v10  ;;  %v1144_v13 = vld [vmem:[#allocation2 + $0x158] sm:$0xff]  ;;  %v420_v10 = vld [vmem:[#allocation2 + $0x168] sm:$0xff]  ;;  %v1600_v46 = vsel %vm310_vm2, %v1517_v30, 0.0  ;;  %1352 = vst.msk [vmem:[%s2389_s12 + $0xd8] sm:$0xf] %vm1297_vm3, %v1287_v4  ;;  %v1522_v4 = vmul.f32 %v2620_v22, %v2620_v22 }
 0x12d   : > { %v2897_v18 = vadd.f32 %v2871_v19, %v1144_v13  ;;  %v1014_v43 = vadd.f32 %v921_v40, %v420_v10  ;;  %v1602_v28 = vsel %vm310_vm2, %v1518_v49, 0.0  ;;  %v1523_v49 = vmul.f32 %v2654_v59, %v2654_v59 }
 0x12e   : > { %v1398_v48 = vadd.f32 %v1397_v14, %v1396_v25  ;;  %v1595_v12 = vadd.f32 %v1594_v52, %v1593_v31  ;;  %v1519_v52 = vmul.f32 %v2539_v56, %v2539_v56  ;;  %v2906_v25 = vadd.f32 %v2871_v19, %v1156_v17 }
 0x12f   : > { %v1025_v31 = vadd.f32 %v2827_v53, %v431_v5  ;;  %v1276_v30 = vpack.c.bf16 %v2897_v18, %v2897_v18  ;;  %v924_v53 = vpop.f32.mrf.mxu2  ;;  %v1407_v56 = vsel %vm310_vm2, %v2553_v2, 0.0  ;;  %1079 = vst.msk [vmem:[#allocation2 + $0x168] sm:$0xff] %vm310_vm2, %v1014_v43 }
 0x130   : > { %v1400_v62 = vadd.f32 %v1399_v42, %v1398_v48  ;;  %v1597_v3 = vadd.f32 %v1596_v41, %v1595_v12  ;;  %v1520_v48 = vmul.f32 %v2553_v2, %v2553_v2  ;;  %v1288_v12 = vpack.c.bf16 %v2906_v25, %v2906_v25 }
 0x131   : > { %1090 = vst.msk [vmem:[#allocation2 + $0x1c0] sm:$0xff] %vm310_vm2, %v1025_v31  ;;  %v1026_v42 = vadd.f32 %v951_v26, %v432_v32  ;;  %v1604_v7 = vsel %vm310_vm2, %v1519_v52, 0.0  ;;  %v1409_v2 = vsel %vm310_vm2, %v2593_v51, 0.0  ;;  %v1413_v52 = vsel %vm310_vm2, %v2654_v59, 0.0 }
 0x132   : > { %v1402_v15 = vadd.f32 %v1401_v38, %v1400_v62  ;;  %v1599_v14 = vadd.f32 %v1598_v47, %v1597_v3  ;;  %1341 = vst.msk [vmem:[%s2389_s12 + $0xac] sm:$0xf] %vm1297_vm3, %v1276_v30  ;;  %v1521_v62 = vmul.f32 %v2593_v51, %v2593_v51  ;;  %v1145_v3 = vld [vmem:[#allocation2 + $0x160] sm:$0xff]  ;;  %v1606_v38 = vsel %vm310_vm2, %v1520_v48, 0.0  ;;  %v422_v30 = vld [vmem:[#allocation2 + $0x178] sm:$0xff] }
 0x133   : > { %v954_v40 = vpop.f32.mrf.mxu3  ;;  %1353 = vst.msk [vmem:[%s2389_s12 + $0xdc] sm:$0xf] %vm1297_vm3, %v1288_v12  ;;  %v2931_v26 = vadd.f32 %v2871_v19, %v1145_v3  ;;  %v1612_v31 = vsel %vm310_vm2, %v1523_v49, 0.0  ;;  %v1524_v32 = vmul.f32 %v2697_v54, %v2697_v54  ;;  %v1415_v59 = vsel %vm310_vm2, %v2697_v54, 0.0 }
 0x134   : > { %v1404_v36 = vadd.f32 %v1403_v0, %v1402_v15  ;;  %v1601_v34 = vadd.f32 %v1600_v46, %v1599_v14  ;;  %1091 = vst.msk [vmem:[#allocation2 + $0x1c8] sm:$0xff] %vm310_vm2, %v1026_v42  ;;  %v1608_v46 = vsel %vm310_vm2, %v1521_v62, 0.0  ;;  %v1411_v15 = vsel %vm310_vm2, %v2620_v22, 0.0  ;;  %v433_v22 = vld [vmem:[#allocation2 + $0x1d0] sm:$0xff]  ;;  %v434_v62 = vld [vmem:[#allocation2 + $0x1d8] sm:$0xff] }
 0x135   : > { %v1277_v10 = vpack.c.bf16 %v2931_v26, %v2931_v26  ;;  %v1610_v14 = vsel %vm310_vm2, %v1522_v4, 0.0  ;;  %v1027_v12 = vadd.f32 %v954_v40, %v433_v22  ;;  %v1614_v40 = vsel %vm310_vm2, %v1524_v32, 0.0 }
 0x136   : > { %v1603_v58 = vadd.f32 %v1602_v28, %v1601_v34  ;;  %v1406_v41 = vadd.f32 %v1405_v44, %v1404_v36  ;;  %v421_v34 = vld [vmem:[#allocation2 + $0x170] sm:$0xff]  ;;  %v1417_v54 = vsel %vm310_vm2, %v2751_v45, 0.0 }
 0x137   : > { %1342 = vst.msk [vmem:[%s2389_s12 + $0xb0] sm:$0xf] %vm1297_vm3, %v1277_v10  ;;  %v926_v43 = vpop.f32.mrf.mxu2  ;;  %v1015_v48 = vadd.f32 %v924_v53, %v421_v34  ;;  %v1419_v10 = vsel %vm310_vm2, %v2791_v50, 0.0  ;;  %v1529_v34 = vmul.f32 %v2496_v20, %v2496_v20 }
 0x138   : > { %v1408_v5 = vadd.f32 %v1407_v56, %v1406_v41  ;;  %v1605_v47 = vadd.f32 %v1604_v7, %v1603_v58  ;;  %v1157_v51 = vld [vmem:[#allocation2 + $0x1c0] sm:$0xff]  ;;  %v1525_v41 = vmul.f32 %v2751_v45, %v2751_v45  ;;  %v1146_v7 = vld [vmem:[#allocation2 + $0x168] sm:$0xff]  ;;  %v1016_v56 = vadd.f32 %v926_v43, %v422_v30  ;;  %1092 = vst.msk [vmem:[#allocation2 + $0x1d0] sm:$0xff] %vm310_vm2, %v1027_v12 }
 0x139   : > { %v2954_v36 = vadd.f32 %v2871_v19, %v1157_v51  ;;  %1080 = vst.msk [vmem:[#allocation2 + $0x170] sm:$0xff] %vm310_vm2, %v1015_v48  ;;  %v1421_v51 = vsel %vm310_vm2, %v2842_v16, 0.0  ;;  %v1423_v30 = vsel %vm310_vm2, %v2874_v11, 0.0  ;;  %v1425_v48 = vsel %vm310_vm2, %v2496_v20, 0.0 }
 0x13a   : > { %v1410_v9 = vadd.f32 %v1409_v2, %v1408_v5  ;;  %v1607_v13 = vadd.f32 %v1606_v38, %v1605_v47  ;;  %v2963_v5 = vadd.f32 %v2871_v19, %v1146_v7  ;;  %v1526_v47 = vmul.f32 %v2791_v50, %v2791_v50  ;;  %1081 = vst.msk [vmem:[#allocation2 + $0x178] sm:$0xff] %vm310_vm2, %v1016_v56 }
 0x13b   : > { %v956_v58 = vpop.f32.mrf.mxu3  ;;  %v1289_v42 = vpack.c.bf16 %v2954_v36, %v2954_v36  ;;  %v1158_v53 = vld [vmem:[#allocation2 + $0x1c8] sm:$0xff]  ;;  %v1616_v45 = vsel %vm310_vm2, %v1525_v41, 0.0  ;;  %v1528_v50 = vmul.f32 %v2874_v11, %v2874_v11  ;;  %v1530_v12 = vmul.f32 %v2510_v29, %v2510_v29 }
 0x13c   : > { %v1412_v17 = vadd.f32 %v1411_v15, %v1410_v9  ;;  %v1609_v0 = vadd.f32 %v1608_v46, %v1607_v13  ;;  %v2974_v38 = vadd.f32 %v2871_v19, %v1158_v53  ;;  %v1278_v9 = vpack.c.bf16 %v2963_v5, %v2963_v5 }
 0x13d   : > { %1354 = vst.msk [vmem:[%s2389_s12 + $0xe0] sm:$0xf] %vm1297_vm3, %v1289_v42  ;;  %v1028_v13 = vadd.f32 %v956_v58, %v434_v62  ;;  %v1527_v46 = vmul.f32 %v2842_v16, %v2842_v16  ;;  %v1622_v58 = vsel %vm310_vm2, %v1528_v50, 0.0  ;;  %v1531_v41 = vmul.f32 %v2550_v63, %v2550_v63 }
 0x13e   : > { %v1414_v28 = vadd.f32 %v1413_v52, %v1412_v17  ;;  %v1611_v44 = vadd.f32 %v1610_v14, %v1609_v0  ;;  %v1290_v15 = vpack.c.bf16 %v2974_v38, %v2974_v38  ;;  %1343 = vst.msk [vmem:[%s2389_s12 + $0xb4] sm:$0xf] %vm1297_vm3, %v1278_v9  ;;  %v1618_v0 = vsel %vm310_vm2, %v1526_v47, 0.0  ;;  %v435_v9 = vld [vmem:[#allocation2 + $0x1e0] sm:$0xff] }
 0x13f   : > { %1093 = vst.msk [vmem:[#allocation2 + $0x1d8] sm:$0xff] %vm310_vm2, %v1028_v13  ;;  %v1620_v22 = vsel %vm310_vm2, %v1527_v46, 0.0  ;;  %v1624_v62 = vsel %vm310_vm2, %v1529_v34, 0.0  ;;  %v1427_v20 = vsel %vm310_vm2, %v2510_v29, 0.0  ;;  %v1429_v47 = vsel %vm310_vm2, %v2550_v63, 0.0  ;;  %v436_v13 = vld [vmem:[#allocation2 + $0x1e8] sm:$0xff] }
 0x140   : > { %v1416_v3 = vadd.f32 %v1415_v59, %v1414_v28  ;;  %v1613_v4 = vadd.f32 %v1612_v31, %v1611_v44  ;;  %1355 = vst.msk [vmem:[%s2389_s12 + $0xe4] sm:$0xf] %vm1297_vm3, %v1290_v15  ;;  %v1147_v43 = vld [vmem:[#allocation2 + $0x170] sm:$0xff]  ;;  %v1431_v63 = vsel %vm310_vm2, %v2558_v8, 0.0 }
 0x141   : > { %v3003_v44 = vadd.f32 %v2871_v19, %v1147_v43  ;;  %v1159_v59 = vld [vmem:[#allocation2 + $0x1d0] sm:$0xff]  ;;  %v1148_v56 = vld [vmem:[#allocation2 + $0x178] sm:$0xff] }
 0x142   : > { %v1418_v2 = vadd.f32 %v1417_v54, %v1416_v3  ;;  %v1615_v49 = vadd.f32 %v1614_v40, %v1613_v4  ;;  %v3018_v3 = vadd.f32 %v2871_v19, %v1159_v59  ;;  %v3021_v4 = vadd.f32 %v2871_v19, %v1148_v56 }
 0x143   : > { %v959_v32 = vpop.f32.mrf.mxu3  ;;  %v1279_v7 = vpack.c.bf16 %v3003_v44, %v3003_v44  ;;  %v1626_v54 = vsel %vm310_vm2, %v1530_v12, 0.0  ;;  %v1437_v59 = vsel %vm310_vm2, %v2658_v1, 0.0  ;;  %v1439_v56 = vsel %vm310_vm2, %v2700_v57, 0.0 }
 0x144   : > { %v1617_v14 = vadd.f32 %v1616_v45, %v1615_v49  ;;  %v1420_v17 = vadd.f32 %v1419_v10, %v1418_v2  ;;  %v1532_v2 = vmul.f32 %v2558_v8, %v2558_v8  ;;  %v1291_v29 = vpack.c.bf16 %v3018_v3, %v3018_v3 }
 0x145   : > { %1344 = vst.msk [vmem:[%s2389_s12 + $0xb8] sm:$0xf] %vm1297_vm3, %v1279_v7  ;;  %v1628_v45 = vsel %vm310_vm2, %v1531_v41, 0.0  ;;  %v1280_v15 = vpack.c.bf16 %v3021_v4, %v3021_v4  ;;  %v1433_v8 = vsel %vm310_vm2, %v2596_v55, 0.0  ;;  %v1536_v41 = vmul.f32 %v2700_v57, %v2700_v57 }
 0x146   : > { %v1619_v52 = vadd.f32 %v1618_v0, %v1617_v14  ;;  %v1422_v31 = vadd.f32 %v1421_v51, %v1420_v17  ;;  %v1160_v49 = vld [vmem:[#allocation2 + $0x1d8] sm:$0xff]  ;;  %v1533_v17 = vmul.f32 %v2596_v55, %v2596_v55  ;;  %1356 = vst.msk [vmem:[%s2389_s12 + $0xe8] sm:$0xf] %vm1297_vm3, %v1291_v29  ;;  %v1029_v51 = vadd.f32 %v959_v32, %v435_v9 }
 0x147   : > { %v3042_v0 = vadd.f32 %v2871_v19, %v1160_v49  ;;  %1345 = vst.msk [vmem:[%s2389_s12 + $0xbc] sm:$0xf] %vm1297_vm3, %v1280_v15  ;;  %v1630_v34 = vsel %vm310_vm2, %v1532_v2, 0.0  ;;  %v1535_v55 = vmul.f32 %v2658_v1, %v2658_v1  ;;  %v1441_v1 = vsel %vm310_vm2, %v2758_v60, 0.0 }
 0x148   : > { %v1621_v16 = vadd.f32 %v1620_v22, %v1619_v52  ;;  %v1424_v28 = vadd.f32 %v1423_v30, %v1422_v31  ;;  %v1534_v22 = vmul.f32 %v2623_v23, %v2623_v23  ;;  %1094 = vst.msk [vmem:[#allocation2 + $0x1e0] sm:$0xff] %vm310_vm2, %v1029_v51  ;;  %v1540_v51 = vmul.f32 %v2897_v18, %v2897_v18 }
 0x149   : > { %v1292_v30 = vpack.c.bf16 %v3042_v0, %v3042_v0 }
 0x14a   : > { %v1426_v11 = vadd.f32 %v1425_v48, %v1424_v28  ;;  %v1623_v42 = vadd.f32 %v1622_v58, %v1621_v16  ;;  %v1632_v16 = vsel %vm310_vm2, %v1533_v17, 0.0  ;;  %v1435_v28 = vsel %vm310_vm2, %v2623_v23, 0.0 }
 0x14b   : > { %v961_v14 = vpop.f32.mrf.mxu3  ;;  %1357 = vst.msk [vmem:[%s2389_s12 + $0xec] sm:$0xf] %vm1297_vm3, %v1292_v30  ;;  %v1634_v58 = vsel %vm310_vm2, %v1534_v22, 0.0  ;;  %v1636_v23 = vsel %vm310_vm2, %v1535_v55, 0.0  ;;  %v1445_v17 = vsel %vm310_vm2, %v2861_v35, 0.0  ;;  %v1447_v30 = vsel %vm310_vm2, %v2897_v18, 0.0 }
 0x14c   : > { %v1428_v53 = vadd.f32 %v1427_v20, %v1426_v11  ;;  %v1625_v40 = vadd.f32 %v1624_v62, %v1623_v42  ;;  %v1030_v31 = vadd.f32 %v961_v14, %v436_v13  ;;  %v1537_v62 = vmul.f32 %v2758_v60, %v2758_v60 }
 0x14d   : > { %v1539_v60 = vmul.f32 %v2861_v35, %v2861_v35  ;;  %v1541_v35 = vmul.f32 %v2931_v26, %v2931_v26  ;;  %v1449_v55 = vsel %vm310_vm2, %v2931_v26, 0.0  ;;  %v1453_v26 = vsel %vm310_vm2, %v3003_v44, 0.0 }
 0x14e   : > { %v1430_v10 = vadd.f32 %v1429_v47, %v1428_v53  ;;  %v1627_v46 = vadd.f32 %v1626_v54, %v1625_v40  ;;  %1095 = vst.msk [vmem:[#allocation2 + $0x1e8] sm:$0xff] %vm310_vm2, %v1030_v31  ;;  %v1638_v54 = vsel %vm310_vm2, %v1536_v41, 0.0  ;;  %v1538_v47 = vmul.f32 %v2811_v6, %v2811_v6 }
 0x14f   : > { %v1161_v40 = vld [vmem:[#allocation2 + $0x1e0] sm:$0xff]  ;;  %v1640_v13 = vsel %vm310_vm2, %v1537_v62, 0.0  ;;  %v1644_v22 = vsel %vm310_vm2, %v1539_v60, 0.0  ;;  %v1543_v41 = vmul.f32 %v3003_v44, %v3003_v44 }
 0x150   : > { %v1432_v50 = vadd.f32 %v1431_v63, %v1430_v10  ;;  %v1629_v52 = vadd.f32 %v1628_v45, %v1627_v46  ;;  %v3078_v2 = vadd.f32 %v2871_v19, %v1161_v40  ;;  %v1443_v45 = vsel %vm310_vm2, %v2811_v6, 0.0  ;;  %v437_v6 = vld [vmem:[#allocation2 + $0x1f0] sm:$0xff] }
 0x151   : > { %v1642_v63 = vsel %vm310_vm2, %v1538_v47, 0.0 }
 0x152   : > { %v1434_v32 = vadd.f32 %v1433_v8, %v1432_v50  ;;  %v1631_v43 = vadd.f32 %v1630_v34, %v1629_v52  ;;  %v1293_v10 = vpack.c.bf16 %v3078_v2, %v3078_v2  ;;  %v438_v50 = vld [vmem:[#allocation2 + $0x1f8] sm:$0xff] }
 0x153   : > { %v964_v7 = vpop.f32.mrf.mxu3 }
 0x154   : > { %v1633_v48 = vadd.f32 %v1632_v16, %v1631_v43  ;;  %v1436_v12 = vadd.f32 %v1435_v28, %v1434_v32  ;;  %1358 = vst.msk [vmem:[%s2389_s12 + $0xf0] sm:$0xf] %vm1297_vm3, %v1293_v10  ;;  %v1031_v34 = vadd.f32 %v964_v7, %v437_v6  ;;  %v1646_v28 = vsel %vm310_vm2, %v1540_v51, 0.0 }
 0x155   : > { %v1162_v29 = vld [vmem:[#allocation2 + $0x1e8] sm:$0xff]  ;;  %v1548_v51 = vmul.f32 %v2709_v33, %v2709_v33 }
 0x156   : > { %v1438_v11 = vadd.f32 %v1437_v59, %v1436_v12  ;;  %v1635_v42 = vadd.f32 %v1634_v58, %v1633_v48  ;;  %v3081_v9 = vadd.f32 %v2871_v19, %v1162_v29  ;;  %1096 = vst.msk [vmem:[#allocation2 + $0x1f0] sm:$0xff] %vm310_vm2, %v1031_v34  ;;  %v1542_v48 = vmul.f32 %v2963_v5, %v2963_v5 }
 0x157   : > { %v1648_v58 = vsel %vm310_vm2, %v1541_v35, 0.0  ;;  %v1451_v59 = vsel %vm310_vm2, %v2963_v5, 0.0  ;;  %v1652_v5 = vsel %vm310_vm2, %v1543_v41, 0.0  ;;  %v1457_v29 = vsel %vm310_vm2, %v2601_v61, 0.0 }
 0x158   : > { %v1440_v20 = vadd.f32 %v1439_v56, %v1438_v11  ;;  %v1637_v53 = vadd.f32 %v1636_v23, %v1635_v42  ;;  %v1294_v14 = vpack.c.bf16 %v3081_v9, %v3081_v9  ;;  %v1650_v7 = vsel %vm310_vm2, %v1542_v48, 0.0 }
 0x159   : > { %v1544_v23 = vmul.f32 %v3021_v4, %v3021_v4  ;;  %v1553_v41 = vmul.f32 %v2954_v36, %v2954_v36 }
 0x15a   : > { %v1442_v57 = vadd.f32 %v1441_v1, %v1440_v20  ;;  %v1639_v49 = vadd.f32 %v1638_v54, %v1637_v53  ;;  %1359 = vst.msk [vmem:[%s2389_s12 + $0xf4] sm:$0xf] %vm1297_vm3, %v1294_v14  ;;  %v1545_v20 = vmul.f32 %v2601_v61, %v2601_v61  ;;  %v1455_v53 = vsel %vm310_vm2, %v3021_v4, 0.0 }
 0x15b   : > { %v966_v8 = vpop.f32.mrf.mxu3  ;;  %v1547_v61 = vmul.f32 %v2681_v37, %v2681_v37 }
 0x15c   : > { %v1444_v46 = vadd.f32 %v1443_v45, %v1442_v57  ;;  %v1641_v15 = vadd.f32 %v1640_v13, %v1639_v49  ;;  %v1032_v32 = vadd.f32 %v966_v8, %v438_v50  ;;  %v1546_v57 = vmul.f32 %v2628_v24, %v2628_v24 }
 0x15d   : > { %v1163_v40 = vld [vmem:[#allocation2 + $0x1f0] sm:$0xff]  ;;  %v1654_v49 = vsel %vm310_vm2, %v1544_v23, 0.0  ;;  %v1656_v10 = vsel %vm310_vm2, %v1545_v20, 0.0  ;;  %v1660_v50 = vsel %vm310_vm2, %v1547_v61, 0.0  ;;  %v1555_v20 = vmul.f32 %v3018_v3, %v3018_v3 }
 0x15e   : > { %v1446_v52 = vadd.f32 %v1445_v17, %v1444_v46  ;;  %v1643_v31 = vadd.f32 %v1642_v63, %v1641_v15  ;;  %1097 = vst.msk [vmem:[#allocation2 + $0x1f8] sm:$0xff] %vm310_vm2, %v1032_v32  ;;  %v3129_v47 = vadd.f32 %v2871_v19, %v1163_v40  ;;  %v1459_v46 = vsel %vm310_vm2, %v2628_v24, 0.0 }
 0x15f   : > { %v1461_v17 = vsel %vm310_vm2, %v2681_v37, 0.0  ;;  %v1465_v37 = vsel %vm310_vm2, %v2769_v21, 0.0 }
 0x160   : > { %v1448_v43 = vadd.f32 %v1447_v30, %v1446_v52  ;;  %v1645_v16 = vadd.f32 %v1644_v22, %v1643_v31  ;;  %v1295_v60 = vpack.c.bf16 %v3129_v47, %v3129_v47  ;;  %v1463_v52 = vsel %vm310_vm2, %v2709_v33, 0.0 }
 0x161   : > { %v1549_v31 = vmul.f32 %v2769_v21, %v2769_v21  ;;  %v1662_v22 = vsel %vm310_vm2, %v1548_v51, 0.0  ;;  %v1550_v30 = vmul.f32 %v2814_v39, %v2814_v39  ;;  %v1467_v33 = vsel %vm310_vm2, %v2814_v39, 0.0 }
 0x162   : > { %v1647_v12 = vadd.f32 %v1646_v28, %v1645_v16  ;;  %v1450_v18 = vadd.f32 %v1449_v55, %v1448_v43  ;;  %1360 = vst.msk [vmem:[%s2389_s12 + $0xf8] sm:$0xf] %vm1297_vm3, %v1295_v60  ;;  %v1551_v16 = vmul.f32 %v2864_v27, %v2864_v27  ;;  %v1469_v21 = vsel %vm310_vm2, %v2864_v27, 0.0 }
 0x163   : > { %v1664_v43 = vsel %vm310_vm2, %v1549_v31, 0.0  ;;  %v1666_v48 = vsel %vm310_vm2, %v1550_v30, 0.0  ;;  %v1471_v39 = vsel %vm310_vm2, %v2906_v25, 0.0  ;;  %v1473_v27 = vsel %vm310_vm2, %v2954_v36, 0.0 }
 0x164   : > { %v1649_v11 = vadd.f32 %v1648_v58, %v1647_v12  ;;  %v1452_v42 = vadd.f32 %v1451_v59, %v1450_v18  ;;  %v1552_v12 = vmul.f32 %v2906_v25, %v2906_v25  ;;  %v1668_v59 = vsel %vm310_vm2, %v1551_v16, 0.0 }
 0x165   : > { %v1164_v44 = vld [vmem:[#allocation2 + $0x1f8] sm:$0xff]  ;;  %v1475_v25 = vsel %vm310_vm2, %v2974_v38, 0.0  ;;  %v1477_v36 = vsel %vm310_vm2, %v3018_v3, 0.0  ;;  %v1481_v3 = vsel %vm310_vm2, %v3078_v2, 0.0  ;;  %v1558_v60 = vmul.f32 %v3081_v9, %v3081_v9 }
 0x166   : > { %v1651_v56 = vadd.f32 %v1650_v7, %v1649_v11  ;;  %v1454_v62 = vadd.f32 %v1453_v26, %v1452_v42  ;;  %v3137_v13 = vadd.f32 %v2871_v19, %v1164_v44  ;;  %v1658_v19 = vsel %vm310_vm2, %v1546_v57, 0.0 }
 0x167   : > { %v1670_v7 = vsel %vm310_vm2, %v1552_v12, 0.0  ;;  %v1554_v26 = vmul.f32 %v2974_v38, %v2974_v38  ;;  %v1479_v38 = vsel %vm310_vm2, %v3042_v0, 0.0  ;;  %v1557_v57 = vmul.f32 %v3078_v2, %v3078_v2 }
 0x168   : > { %v1653_v54 = vadd.f32 %v1652_v5, %v1651_v56  ;;  %v1456_v1 = vadd.f32 %v1455_v53, %v1454_v62  ;;  %v1296_v15 = vpack.c.bf16 %v3137_v13, %v3137_v13  ;;  %v1672_v62 = vsel %vm310_vm2, %v1553_v41, 0.0 }
 0x169   : > { %v1674_v40 = vsel %vm310_vm2, %v1554_v26, 0.0  ;;  %v1680_v61 = vsel %vm310_vm2, %v1557_v57, 0.0  ;;  %v1485_v2 = vsel %vm310_vm2, %v3129_v47, 0.0 }
 0x16a   : > { %v1458_v4 = vadd.f32 %v1457_v29, %v1456_v1  ;;  %v1655_v45 = vadd.f32 %v1654_v49, %v1653_v54  ;;  %1361 = vst.msk [vmem:[%s2389_s12 + $0xfc] sm:$0xf] %vm1297_vm3, %v1296_v15  ;;  %v1556_v54 = vmul.f32 %v3042_v0, %v3042_v0  ;;  %v1676_v29 = vsel %vm310_vm2, %v1555_v20, 0.0 }
 0x16b   : > { %v1483_v0 = vsel %vm310_vm2, %v3081_v9, 0.0  ;;  %v1559_v15 = vmul.f32 %v3129_v47, %v3129_v47  ;;  %v1487_v9 = vsel %vm310_vm2, %v3137_v13, 0.0 }
 0x16c   : > { %v1460_v14 = vadd.f32 %v1459_v46, %v1458_v4  ;;  %v1657_v63 = vadd.f32 %v1656_v10, %v1655_v45  ;;  %v1678_v45 = vsel %vm310_vm2, %v1556_v54, 0.0 }
 0x16e   : > { %v1462_v24 = vadd.f32 %v1461_v17, %v1460_v14  ;;  %v1659_v6 = vadd.f32 %v1658_v19, %v1657_v63  ;;  %v1682_v19 = vsel %vm310_vm2, %v1558_v60, 0.0  ;;  %v1560_v17 = vmul.f32 %v3137_v13, %v3137_v13 }
 0x170   : > { %v1464_v34 = vadd.f32 %v1463_v52, %v1462_v24  ;;  %v1661_v8 = vadd.f32 %v1660_v50, %v1659_v6  ;;  %v1684_v6 = vsel %vm310_vm2, %v1559_v15, 0.0  ;;  %v1686_v31 = vsel %vm310_vm2, %v1560_v17, 0.0 }
 0x172   : > { %v1466_v35 = vadd.f32 %v1465_v37, %v1464_v34  ;;  %v1663_v32 = vadd.f32 %v1662_v22, %v1661_v8 }
 0x174   : > { %v1665_v28 = vadd.f32 %v1664_v43, %v1663_v32  ;;  %v1468_v55 = vadd.f32 %v1467_v33, %v1466_v35 }
 0x176   : > { %v1470_v18 = vadd.f32 %v1469_v21, %v1468_v55  ;;  %v1667_v58 = vadd.f32 %v1666_v48, %v1665_v28 }
 0x178   : > { %v1472_v11 = vadd.f32 %v1471_v39, %v1470_v18  ;;  %v1669_v42 = vadd.f32 %v1668_v59, %v1667_v58 }
 0x17a   : > { %v1474_v23 = vadd.f32 %v1473_v27, %v1472_v11  ;;  %v1671_v56 = vadd.f32 %v1670_v7, %v1669_v42 }
 0x17c   : > { %v1476_v5 = vadd.f32 %v1475_v25, %v1474_v23  ;;  %v1673_v53 = vadd.f32 %v1672_v62, %v1671_v56 }
 0x17e   : > { %v1478_v1 = vadd.f32 %v1477_v36, %v1476_v5  ;;  %v1675_v44 = vadd.f32 %v1674_v40, %v1673_v53 }
 0x180   : > { %v1480_v49 = vadd.f32 %v1479_v38, %v1478_v1  ;;  %v1677_v4 = vadd.f32 %v1676_v29, %v1675_v44 }
 0x182   : > { %v1679_v10 = vadd.f32 %v1678_v45, %v1677_v4  ;;  %v1482_v46 = vadd.f32 %v1481_v3, %v1480_v49 }
 0x184   : > { %v1681_v14 = vadd.f32 %v1680_v61, %v1679_v10  ;;  %v1484_v63 = vadd.f32 %v1483_v0, %v1482_v46 }
 0x186   : > { %v1683_v51 = vadd.f32 %v1682_v19, %v1681_v14  ;;  %v1486_v24 = vadd.f32 %v1485_v2, %v1484_v63 }
 0x188   : > { %v1685_v50 = vadd.f32 %v1684_v6, %v1683_v51  ;;  %v1488_v52 = vadd.f32 %v1487_v9, %v1486_v24 }
 0x18a   : > { %v1489_v34 = vrot.slane %v1488_v52, 4  ;;  %v1687_v8 = vadd.f32 %v1686_v31, %v1685_v50 }
 0x18c   : > { %v1490_v22 = vadd.f32 %v1489_v34, %v1488_v52  ;;  %v1688_v47 = vrot.slane %v1687_v8, 4 }
 0x18e   : > { %v1491_v37 = vrot.slane %v1490_v22, 2  ;;  %v1689_v30 = vadd.f32 %v1688_v47, %v1687_v8 }
 0x190   : > { %v1492_v35 = vadd.f32 %v1491_v37, %v1490_v22  ;;  %v1690_v32 = vrot.slane %v1689_v30, 2 }
 0x192   : > { %v1493_v43 = vrot.slane %v1492_v35, 1  ;;  %v1691_v33 = vadd.f32 %v1690_v32, %v1689_v30 }
 0x194   : > { %v1494_v13 = vadd.f32 %v1493_v43, %v1492_v35  ;;  %v1692_v16 = vrot.slane %v1691_v33, 1 }
 0x196   : > { %1496 = vst.msk [vmem:[%s304_s22] sm:$0x1] %vm1495_vm4, %v1494_v13  ;;  %v1693_v28 = vadd.f32 %v1692_v16, %v1691_v33 }
 0x198   : > { %1694 = vst.msk [vmem:[%s304_s22 + $0x1] sm:$0x1] %vm1495_vm4, %v1693_v28 }
 0x199 PF: > { %s15_s17 = sadd.s32 1, %s2137_s17   ;;  %s3240_s15 = smov %s2133_s16 }
 0x19a   : > { %p12_p6 = scmp.ge.s32.totalorder %s15_s17, 6   ;;  %s3241_s16 = smov %s3243_s18 }
 0x19c   :  { %14 = sbr.rel (!%p12_p6) target bundleno = 2 (0x2), region = 88 }

// kernel: up_block_forward.5
= control target key start
LH: loop header
LB: loop body
LE: loop exit
PB: predicated region body
PF: predicated region fallthrough
CT: control target
= control target key end

     0   :  { %s2133_s15 = smov 0   ;;  %s2135_s16 = smov 0   ;;  %s3197_s0 = inlined_call_operand.vmem [shape: bf16[2048,36], index: 0, kind: input, shape index: {}]   ;;  %s3198_s1 = inlined_call_operand.vmem [shape: bf16[36,4], index: 1, kind: input, shape index: {}]   ;;  %s3199_s2 = inlined_call_operand.vmem [shape: f32[1,4], index: 2, kind: input, shape index: {}]   ;;  %s3200_s3 = inlined_call_operand.vmem [shape: bf16[2048,4], index: 3, kind: output, shape index: {0}]   ;;  %s3201_s4 = inlined_call_operand.vmem [shape: f32[4,2,4], index: 4, kind: output, shape index: {1}]  }
   0x1   :  { %s2137_s17 = smov 0  }
   0x2 LB: > { %s34_s18 = sadd.s32 1, %s2101_s16  ;;  %p1837_p0 = scmp.ge.s32.totalorder %s2105_s17, 1  ;;  %s2105_s17 = sphi %s2137_s17, %s15_s17   ;;  %s2101_s16 = sphi %s2135_s16, %s3203_s16   ;;  %s2097_s15 = sphi %s2133_s15, %s3202_s15  }
   0x3   : > { %p36_p1 = scmp.ge.s32.totalorder %s34_s18, 4  ;;  %p218_p2 = scmp.lt.s32.totalorder %s2105_s17, 5 }
   0x5   : > { %s3205_s18 = smov (%p36_p1, %s34_s18), 0  ;;  %p219_p3 = pnand %p1837_p0, %p218_p2 }
   0x6   : > { %s1838_s21 = sshll.u32 (!%p219_p3), %s2097_s15, 6  ;;  %p298_p5 = scmp.lt.s32.totalorder (!%p219_p3), %s2097_s15, 3 }
   0x7   : > { %222 = sbr.rel (%p219_p3) target bundleno = 401 (0x191), region = 32  ;;  %p269_p4 = scmp.lt.s32.totalorder (!%p219_p3), %s1838_s21, 255 }
   0xc   : > { %v507_v0 = vld [vmem:[%s3198_s1 + $0x10] sm:$0x3]  ;;  %vm780_vm0 = vcmask 1041408   ;;  %s3207_s21 = smov (!%p269_p4, %s1838_s21), 255  ;;  %v2046_v4 = vld [vmem:[%s3198_s1 + $0x8] sm:$0xff]  ;;  %v2045_v5 = vld [vmem:[%s3198_s1] sm:$0xff] }
   0xd   : > { %v677_v1 = vunpack.c.l.b16 %v507_v0  ;;  %s1839_s24 = sshll.u32 %s3207_s21, 2  ;;  %vm683_vm1 = vcmask 293888   ;;  %vm310_vm2 = vcmask 31744   ;;  %v2107_v26 = vmov 0.0   ;;  %v2333_v39 = vld [vmem:[%s3199_s2] ss:$0 sm:$0xff] }
   0xe   : > { %s2171_s29 = scalar_lea.vmem %s3197_s0, %s1839_s24  ;;  %311 = vst.msk [vmem:[#allocation2] sm:$0xff] %vm310_vm2, %v2107_v26  ;;  %s2351_s8 = scalar_lea.vmem %s3200_s3, %s1839_s24  ;;  %vm1281_vm3 = vcmask 27648   ;;  %vm1479_vm4 = vcmask 24576  }
   0xf   : > { %v680_v2 = vpack.c.b16 %v677_v1, %v677_v1  ;;  %v2013_v6 = vld [vmem:[%s2171_s29] sm:$0xff]  ;;  %v2014_v8 = vld [vmem:[%s2171_s29 + $0x8] sm:$0xff]  ;;  %v2015_v11 = vld [vmem:[%s2171_s29 + $0x10] sm:$0xff]  ;;  %312 = vst.msk [vmem:[#allocation2 + $0x8] sm:$0xff] %vm310_vm2, %v2107_v26  ;;  %s3209_s15 = smov (!%p298_p5, %s2097_s15), 3 }
  0x10   : > { %v2021_v7 = vld [vmem:[%s2171_s29 + $0x40] sm:$0xff]  ;;  %v2022_v9 = vld [vmem:[%s2171_s29 + $0x48] sm:$0xff]  ;;  %v2023_v12 = vld [vmem:[%s2171_s29 + $0x50] sm:$0xff]  ;;  %313 = vst.msk [vmem:[#allocation2 + $0x10] sm:$0xff] %vm310_vm2, %v2107_v26  ;;  %s1842_s11 = sshll.u32 %s3209_s15, 1 }
  0x11   : > { %v782_v3 = vsel %vm780_vm0, %v680_v2, 0  ;;  %v2029_v10 = vld [vmem:[%s2171_s29 + $0x80] sm:$0xff]  ;;  %v2030_v13 = vld [vmem:[%s2171_s29 + $0x88] sm:$0xff]  ;;  %v2016_v14 = vld [vmem:[%s2171_s29 + $0x18] sm:$0xff]  ;;  %314 = vst.msk [vmem:[#allocation2 + $0x18] sm:$0xff] %vm310_vm2, %v2107_v26  ;;  %s304_s14 = scalar_lea.vmem %s3201_s4, %s1842_s11 }
  0x12   : > { %789 = vmatpush.bf16.msra.mxu0 %v782_v3  ;;  %2047 = vmatpush.bf16.msra.mxu1 %v782_v3  ;;  %v2024_v15 = vld [vmem:[%s2171_s29 + $0x58] sm:$0xff]  ;;  %v2031_v16 = vld [vmem:[%s2171_s29 + $0x90] sm:$0xff]  ;;  %v2037_v17 = vld [vmem:[%s2171_s29 + $0xc0] sm:$0xff]  ;;  %315 = vst.msk [vmem:[#allocation2 + $0x20] sm:$0xff] %vm310_vm2, %v2107_v26 }
  0x13   : > { %2048 = vmatpush.bf16.msra.mxu2 %v782_v3  ;;  %2049 = vmatpush.bf16.msra.mxu3 %v782_v3  ;;  %v2017_v18 = vld [vmem:[%s2171_s29 + $0x20] sm:$0xff]  ;;  %v2032_v20 = vld [vmem:[%s2171_s29 + $0x98] sm:$0xff]  ;;  %v2038_v21 = vld [vmem:[%s2171_s29 + $0xc8] sm:$0xff]  ;;  %316 = vst.msk [vmem:[#allocation2 + $0x28] sm:$0xff] %vm310_vm2, %v2107_v26 }
  0x14   : > { %v2025_v19 = vld [vmem:[%s2171_s29 + $0x60] sm:$0xff]  ;;  %v2018_v22 = vld [vmem:[%s2171_s29 + $0x28] sm:$0xff]  ;;  %v2039_v25 = vld [vmem:[%s2171_s29 + $0xd0] sm:$0xff]  ;;  %317 = vst.msk [vmem:[#allocation2 + $0x30] sm:$0xff] %vm310_vm2, %v2107_v26 }
  0x15   : > { %v2026_v23 = vld [vmem:[%s2171_s29 + $0x68] sm:$0xff]  ;;  %v2033_v24 = vld [vmem:[%s2171_s29 + $0xa0] sm:$0xff]  ;;  %318 = vst.msk [vmem:[#allocation2 + $0x38] sm:$0xff] %vm310_vm2, %v2107_v26  ;;  %v2019_v27 = vld [vmem:[%s2171_s29 + $0x30] sm:$0xff] }
  0x16   : > { %790 = vmatpush.bf16.msra.mxu0 %v2046_v4  ;;  %2050 = vmatpush.bf16.msra.mxu1 %v2046_v4  ;;  %319 = vst.msk [vmem:[#allocation2 + $0x40] sm:$0xff] %vm310_vm2, %v2107_v26  ;;  %v2027_v28 = vld [vmem:[%s2171_s29 + $0x70] sm:$0xff]  ;;  %v2034_v29 = vld [vmem:[%s2171_s29 + $0xa8] sm:$0xff]  ;;  %v2040_v30 = vld [vmem:[%s2171_s29 + $0xd8] sm:$0xff] }
  0x17   : > { %2051 = vmatpush.bf16.msra.mxu2 %v2046_v4  ;;  %2052 = vmatpush.bf16.msra.mxu3 %v2046_v4  ;;  %320 = vst.msk [vmem:[#allocation2 + $0x48] sm:$0xff] %vm310_vm2, %v2107_v26  ;;  %v2020_v31 = vld [vmem:[%s2171_s29 + $0x38] sm:$0xff]  ;;  %v375_v33 = vld [vmem:[#allocation2] sm:$0xff]  ;;  %v2035_v34 = vld [vmem:[%s2171_s29 + $0xb0] sm:$0xff] }
  0x18   : > { %321 = vst.msk [vmem:[#allocation2 + $0x50] sm:$0xff] %vm310_vm2, %v2107_v26  ;;  %v2028_v32 = vld [vmem:[%s2171_s29 + $0x78] sm:$0xff]  ;;  %v2041_v35 = vld [vmem:[%s2171_s29 + $0xe0] sm:$0xff]  ;;  %v2042_v46 = vld [vmem:[%s2171_s29 + $0xe8] sm:$0xff] }
  0x19   : > { %322 = vst.msk [vmem:[#allocation2 + $0x58] sm:$0xff] %vm310_vm2, %v2107_v26  ;;  %v2036_v45 = vld [vmem:[%s2171_s29 + $0xb8] sm:$0xff]  ;;  %v376_v47 = vld [vmem:[#allocation2 + $0x8] sm:$0xff]  ;;  %v377_v48 = vld [vmem:[#allocation2 + $0x10] sm:$0xff] }
  0x1a   : > { %791 = vmatpush.bf16.msra.mxu0 %v2045_v5  ;;  %2053 = vmatpush.bf16.msra.mxu1 %v2045_v5  ;;  %323 = vst.msk [vmem:[#allocation2 + $0x60] sm:$0xff] %vm310_vm2, %v2107_v26  ;;  %v378_v57 = vld [vmem:[#allocation2 + $0x18] sm:$0xff] }
  0x1b   : > { %2054 = vmatpush.bf16.msra.mxu2 %v2045_v5  ;;  %2055 = vmatpush.bf16.msra.mxu3 %v2045_v5  ;;  %324 = vst.msk [vmem:[#allocation2 + $0x68] sm:$0xff] %vm310_vm2, %v2107_v26  ;;  %v2043_v5 = vld [vmem:[%s2171_s29 + $0xf0] sm:$0xff] }
  0x1c   : > { %325 = vst.msk [vmem:[#allocation2 + $0x70] sm:$0xff] %vm310_vm2, %v2107_v26 }
  0x1d   : > { %1979 = vmatmul.msk.bf16.vlgmr.msra.gmra.mxu0 %vm683_vm1, %v2013_v6  ;;  %1987 = vmatmul.msk.bf16.vlgmr.msra.gmra.mxu1 %vm683_vm1, %v2021_v7  ;;  %326 = vst.msk [vmem:[#allocation2 + $0x78] sm:$0xff] %vm310_vm2, %v2107_v26 }
  0x1e   : > { %1995 = vmatmul.msk.bf16.vlgmr.msra.gmra.mxu2 %vm683_vm1, %v2029_v10  ;;  %2003 = vmatmul.msk.bf16.vlgmr.msra.gmra.mxu3 %vm683_vm1, %v2037_v17  ;;  %327 = vst.msk [vmem:[#allocation2 + $0x80] sm:$0xff] %vm310_vm2, %v2107_v26 }
  0x1f   : > { %328 = vst.msk [vmem:[#allocation2 + $0x88] sm:$0xff] %vm310_vm2, %v2107_v26 }
  0x20   : > { %329 = vst.msk [vmem:[#allocation2 + $0x90] sm:$0xff] %vm310_vm2, %v2107_v26 }
  0x21   : > { %330 = vst.msk [vmem:[#allocation2 + $0x98] sm:$0xff] %vm310_vm2, %v2107_v26 }
  0x22   : > { %331 = vst.msk [vmem:[#allocation2 + $0xa0] sm:$0xff] %vm310_vm2, %v2107_v26 }
  0x23   : > { %332 = vst.msk [vmem:[#allocation2 + $0xa8] sm:$0xff] %vm310_vm2, %v2107_v26 }
  0x24   : > { %333 = vst.msk [vmem:[#allocation2 + $0xb0] sm:$0xff] %vm310_vm2, %v2107_v26 }
  0x25   : > { %334 = vst.msk [vmem:[#allocation2 + $0xb8] sm:$0xff] %vm310_vm2, %v2107_v26  ;;  %v391_v50 = vld [vmem:[#allocation2 + $0x80] sm:$0xff] }
  0x26   : > { %335 = vst.msk [vmem:[#allocation2 + $0xc0] sm:$0xff] %vm310_vm2, %v2107_v26  ;;  %v392_v52 = vld [vmem:[#allocation2 + $0x88] sm:$0xff] }
  0x27   : > { %336 = vst.msk [vmem:[#allocation2 + $0xc8] sm:$0xff] %vm310_vm2, %v2107_v26  ;;  %v393_v59 = vld [vmem:[#allocation2 + $0x90] sm:$0xff] }
  0x28   : > { %337 = vst.msk [vmem:[#allocation2 + $0xd0] sm:$0xff] %vm310_vm2, %v2107_v26  ;;  %v394_v62 = vld [vmem:[#allocation2 + $0x98] sm:$0xff] }
  0x29   : > { %338 = vst.msk [vmem:[#allocation2 + $0xd8] sm:$0xff] %vm310_vm2, %v2107_v26 }
  0x2a   : > { %339 = vst.msk [vmem:[#allocation2 + $0xe0] sm:$0xff] %vm310_vm2, %v2107_v26 }
  0x2b   : > { %340 = vst.msk [vmem:[#allocation2 + $0xe8] sm:$0xff] %vm310_vm2, %v2107_v26 }
  0x2c   : > { %341 = vst.msk [vmem:[#allocation2 + $0xf0] sm:$0xff] %vm310_vm2, %v2107_v26 }
  0x2d   : > { %1980 = vmatmul.msk.bf16.gmra.mxu0 %vm683_vm1, %v2014_v8  ;;  %1988 = vmatmul.msk.bf16.gmra.mxu1 %vm683_vm1, %v2022_v9  ;;  %342 = vst.msk [vmem:[#allocation2 + $0xf8] sm:$0xff] %vm310_vm2, %v2107_v26 }
  0x2e   : > { %1996 = vmatmul.msk.bf16.gmra.mxu2 %vm683_vm1, %v2030_v13  ;;  %2004 = vmatmul.msk.bf16.gmra.mxu3 %vm683_vm1, %v2038_v21  ;;  %343 = vst.msk [vmem:[#allocation2 + $0x100] sm:$0xff] %vm310_vm2, %v2107_v26 }
  0x2f   : > { %344 = vst.msk [vmem:[#allocation2 + $0x108] sm:$0xff] %vm310_vm2, %v2107_v26 }
  0x30   : > { %345 = vst.msk [vmem:[#allocation2 + $0x110] sm:$0xff] %vm310_vm2, %v2107_v26 }
  0x31   : > { %346 = vst.msk [vmem:[#allocation2 + $0x118] sm:$0xff] %vm310_vm2, %v2107_v26 }
  0x32   : > { %347 = vst.msk [vmem:[#allocation2 + $0x120] sm:$0xff] %vm310_vm2, %v2107_v26 }
  0x33   : > { %348 = vst.msk [vmem:[#allocation2 + $0x128] sm:$0xff] %vm310_vm2, %v2107_v26 }
  0x34   : > { %349 = vst.msk [vmem:[#allocation2 + $0x130] sm:$0xff] %vm310_vm2, %v2107_v26 }
  0x35   : > { %350 = vst.msk [vmem:[#allocation2 + $0x138] sm:$0xff] %vm310_vm2, %v2107_v26 }
  0x36   : > { %351 = vst.msk [vmem:[#allocation2 + $0x140] sm:$0xff] %vm310_vm2, %v2107_v26 }
  0x37   : > { %352 = vst.msk [vmem:[#allocation2 + $0x148] sm:$0xff] %vm310_vm2, %v2107_v26 }
  0x38   : > { %353 = vst.msk [vmem:[#allocation2 + $0x150] sm:$0xff] %vm310_vm2, %v2107_v26 }
  0x39   : > { %354 = vst.msk [vmem:[#allocation2 + $0x158] sm:$0xff] %vm310_vm2, %v2107_v26 }
  0x3a   : > { %355 = vst.msk [vmem:[#allocation2 + $0x160] sm:$0xff] %vm310_vm2, %v2107_v26 }
  0x3b   : > { %356 = vst.msk [vmem:[#allocation2 + $0x168] sm:$0xff] %vm310_vm2, %v2107_v26 }
  0x3c   : > { %357 = vst.msk [vmem:[#allocation2 + $0x170] sm:$0xff] %vm310_vm2, %v2107_v26 }
  0x3d   : > { %1981 = vmatmul.msk.bf16.gmra.mxu0 %vm683_vm1, %v2015_v11  ;;  %1989 = vmatmul.msk.bf16.gmra.mxu1 %vm683_vm1, %v2023_v12  ;;  %358 = vst.msk [vmem:[#allocation2 + $0x178] sm:$0xff] %vm310_vm2, %v2107_v26 }
  0x3e   : > { %1997 = vmatmul.msk.bf16.gmra.mxu2 %vm683_vm1, %v2031_v16  ;;  %2005 = vmatmul.msk.bf16.gmra.mxu3 %vm683_vm1, %v2039_v25  ;;  %359 = vst.msk [vmem:[#allocation2 + $0x180] sm:$0xff] %vm310_vm2, %v2107_v26 }
  0x3f   : > { %360 = vst.msk [vmem:[#allocation2 + $0x188] sm:$0xff] %vm310_vm2, %v2107_v26 }
  0x40   : > { %361 = vst.msk [vmem:[#allocation2 + $0x190] sm:$0xff] %vm310_vm2, %v2107_v26 }
  0x41   : > { %362 = vst.msk [vmem:[#allocation2 + $0x198] sm:$0xff] %vm310_vm2, %v2107_v26 }
  0x42   : > { %363 = vst.msk [vmem:[#allocation2 + $0x1a0] sm:$0xff] %vm310_vm2, %v2107_v26 }
  0x43   : > { %364 = vst.msk [vmem:[#allocation2 + $0x1a8] sm:$0xff] %vm310_vm2, %v2107_v26 }
  0x44   : > { %365 = vst.msk [vmem:[#allocation2 + $0x1b0] sm:$0xff] %vm310_vm2, %v2107_v26 }
  0x45   : > { %366 = vst.msk [vmem:[#allocation2 + $0x1b8] sm:$0xff] %vm310_vm2, %v2107_v26 }
  0x46   : > { %367 = vst.msk [vmem:[#allocation2 + $0x1c0] sm:$0xff] %vm310_vm2, %v2107_v26 }
  0x47   : > { %368 = vst.msk [vmem:[#allocation2 + $0x1c8] sm:$0xff] %vm310_vm2, %v2107_v26 }
  0x48   : > { %369 = vst.msk [vmem:[#allocation2 + $0x1d0] sm:$0xff] %vm310_vm2, %v2107_v26 }
  0x49   : > { %370 = vst.msk [vmem:[#allocation2 + $0x1d8] sm:$0xff] %vm310_vm2, %v2107_v26 }
  0x4a   : > { %371 = vst.msk [vmem:[#allocation2 + $0x1e0] sm:$0xff] %vm310_vm2, %v2107_v26 }
  0x4b   : > { %372 = vst.msk [vmem:[#allocation2 + $0x1e8] sm:$0xff] %vm310_vm2, %v2107_v26 }
  0x4c   : > { %373 = vst.msk [vmem:[#allocation2 + $0x1f0] sm:$0xff] %vm310_vm2, %v2107_v26 }
  0x4d   : > { %1982 = vmatmul.msk.bf16.gmra.mxu0 %vm683_vm1, %v2016_v14  ;;  %1990 = vmatmul.msk.bf16.gmra.mxu1 %vm683_vm1, %v2024_v15  ;;  %374 = vst.msk [vmem:[#allocation2 + $0x1f8] sm:$0xff] %vm310_vm2, %v2107_v26 }
  0x4e   : > { %1998 = vmatmul.msk.bf16.gmra.mxu2 %vm683_vm1, %v2032_v20  ;;  %2006 = vmatmul.msk.bf16.gmra.mxu3 %vm683_vm1, %v2040_v30 }
  0x5d   : > { %1983 = vmatmul.msk.bf16.gmra.mxu0 %vm683_vm1, %v2017_v18  ;;  %1991 = vmatmul.msk.bf16.gmra.mxu1 %vm683_vm1, %v2025_v19  ;;  %v379_v18 = vld [vmem:[#allocation2 + $0x20] sm:$0xff] }
  0x5e   : > { %1999 = vmatmul.msk.bf16.gmra.mxu2 %vm683_vm1, %v2033_v24  ;;  %2007 = vmatmul.msk.bf16.gmra.mxu3 %vm683_vm1, %v2041_v35 }
  0x6d   : > { %1984 = vmatmul.msk.bf16.gmra.mxu0 %vm683_vm1, %v2018_v22  ;;  %1992 = vmatmul.msk.bf16.gmra.mxu1 %vm683_vm1, %v2026_v23 }
  0x6e   : > { %2000 = vmatmul.msk.bf16.gmra.mxu2 %vm683_vm1, %v2034_v29  ;;  %2008 = vmatmul.msk.bf16.gmra.mxu3 %vm683_vm1, %v2042_v46 }
  0x7d   : > { %1985 = vmatmul.msk.bf16.gmra.mxu0 %vm683_vm1, %v2019_v27  ;;  %1993 = vmatmul.msk.bf16.gmra.mxu1 %vm683_vm1, %v2027_v28 }
  0x7e   : > { %2001 = vmatmul.msk.bf16.gmra.mxu2 %vm683_vm1, %v2035_v34  ;;  %2009 = vmatmul.msk.bf16.gmra.mxu3 %vm683_vm1, %v2043_v5 }
  0x8d   : > { %1986 = vmatmul.msk.bf16.gmra.mxu0 %vm683_vm1, %v2020_v31  ;;  %1994 = vmatmul.msk.bf16.gmra.mxu1 %vm683_vm1, %v2028_v32 }
  0x8e   : > { %2002 = vmatmul.msk.bf16.gmra.mxu2 %vm683_vm1, %v2036_v45 }
  0x9a   : > { %v793_v36 = vpop.f32.mrf.mxu0  ;;  %v833_v38 = vpop.f32.mrf.mxu1 }
  0x9b   : > { %v953_v37 = vadd.f32 %v793_v36, %v375_v33  ;;  %v969_v55 = vadd.f32 %v833_v38, %v391_v50 }
  0x9d   : > { %1018 = vst.msk [vmem:[#allocation2] sm:$0xff] %vm310_vm2, %v953_v37 }
  0x9e   : > { %1034 = vst.msk [vmem:[#allocation2 + $0x80] sm:$0xff] %vm310_vm2, %v969_v55 }
  0xa1   : > { %v873_v30 = vpop.f32.mrf.mxu2 }
  0xa2   : > { %v795_v40 = vpop.f32.mrf.mxu0  ;;  %v835_v43 = vpop.f32.mrf.mxu1 }
  0xa3   : > { %v954_v51 = vadd.f32 %v795_v40, %v376_v47  ;;  %v970_v56 = vadd.f32 %v835_v43, %v392_v52 }
  0xa4   : > { %v1085_v41 = vld [vmem:[#allocation2] sm:$0xff] }
  0xa5   : > { %v1153_v42 = vadd.f32 %v2333_v39, %v1085_v41  ;;  %1019 = vst.msk [vmem:[#allocation2 + $0x8] sm:$0xff] %vm310_vm2, %v954_v51  ;;  %v1101_v8 = vld [vmem:[#allocation2 + $0x80] sm:$0xff] }
  0xa6   : > { %1035 = vst.msk [vmem:[#allocation2 + $0x88] sm:$0xff] %vm310_vm2, %v970_v56  ;;  %v2390_v12 = vadd.f32 %v2333_v39, %v1101_v8  ;;  %v408_v56 = vld [vmem:[#allocation2 + $0x108] sm:$0xff] }
  0xa7   : > { %v1217_v44 = vpack.c.bf16 %v1153_v42, %v1153_v42  ;;  %v1481_v2 = vmul.f32 %v1153_v42, %v1153_v42  ;;  %v1346_v6 = vsel %vm310_vm2, %v1153_v42, 0.0  ;;  %v380_v42 = vld [vmem:[#allocation2 + $0x28] sm:$0xff] }
  0xa8   : > { %v1233_v23 = vpack.c.bf16 %v2390_v12, %v2390_v12 }
  0xa9   : > { %1282 = vst.msk [vmem:[%s2351_s8] sm:$0xf] %vm1281_vm3, %v1217_v44  ;;  %v1545_v20 = vsel %vm310_vm2, %v1481_v2, 0.0 }
  0xaa   : > { %v798_v49 = vpop.f32.mrf.mxu0  ;;  %v838_v54 = vpop.f32.mrf.mxu1  ;;  %1298 = vst.msk [vmem:[%s2351_s8 + $0x40] sm:$0xf] %vm1281_vm3, %v1233_v23 }
  0xab   : > { %v955_v53 = vadd.f32 %v798_v49, %v377_v48  ;;  %v971_v61 = vadd.f32 %v838_v54, %v393_v59  ;;  %v395_v48 = vld [vmem:[#allocation2 + $0xa0] sm:$0xff]  ;;  %v396_v54 = vld [vmem:[#allocation2 + $0xa8] sm:$0xff] }
  0xac   : > { %v1086_v1 = vld [vmem:[#allocation2 + $0x8] sm:$0xff]  ;;  %v407_v49 = vld [vmem:[#allocation2 + $0x100] sm:$0xff] }
  0xad   : > { %1020 = vst.msk [vmem:[#allocation2 + $0x10] sm:$0xff] %vm310_vm2, %v955_v53  ;;  %v1154_v3 = vadd.f32 %v2333_v39, %v1086_v1  ;;  %v1102_v19 = vld [vmem:[#allocation2 + $0x88] sm:$0xff]  ;;  %v985_v53 = vadd.f32 %v873_v30, %v407_v49 }
  0xae   : > { %1036 = vst.msk [vmem:[#allocation2 + $0x90] sm:$0xff] %vm310_vm2, %v971_v61  ;;  %v2407_v32 = vadd.f32 %v2333_v39, %v1102_v19 }
  0xaf   : > { %v1218_v9 = vpack.c.bf16 %v1154_v3, %v1154_v3  ;;  %v1347_v10 = vsel %vm310_vm2, %v1154_v3, 0.0  ;;  %v1482_v11 = vmul.f32 %v1154_v3, %v1154_v3  ;;  %1050 = vst.msk [vmem:[#allocation2 + $0x100] sm:$0xff] %vm310_vm2, %v985_v53 }
  0xb0   : > { %v1348_v14 = vadd.f32 %v1347_v10, %v1346_v6  ;;  %v1234_v41 = vpack.c.bf16 %v2407_v32, %v2407_v32 }
  0xb1   : > { %1283 = vst.msk [vmem:[%s2351_s8 + $0x4] sm:$0xf] %vm1281_vm3, %v1218_v9  ;;  %v1546_v21 = vsel %vm310_vm2, %v1482_v11, 0.0 }
  0xb2   : > { %v800_v58 = vpop.f32.mrf.mxu0  ;;  %v840_v63 = vpop.f32.mrf.mxu1  ;;  %v1547_v24 = vadd.f32 %v1546_v21, %v1545_v20  ;;  %1299 = vst.msk [vmem:[%s2351_s8 + $0x44] sm:$0xf] %vm1281_vm3, %v1234_v41 }
  0xb3   : > { %v956_v60 = vadd.f32 %v800_v58, %v378_v57  ;;  %v972_v0 = vadd.f32 %v840_v63, %v394_v62  ;;  %v875_v57 = vpop.f32.mrf.mxu2  ;;  %v381_v62 = vld [vmem:[#allocation2 + $0x30] sm:$0xff]  ;;  %v2044_v63 = vld [vmem:[%s2171_s29 + $0xf8] sm:$0xff] }
  0xb4   : > { %v1087_v4 = vld [vmem:[#allocation2 + $0x10] sm:$0xff]  ;;  %v986_v59 = vadd.f32 %v875_v57, %v408_v56  ;;  %2010 = vmatmul.msk.bf16.gmra.mxu3 %vm683_vm1, %v2044_v63  ;;  %v384_v57 = vld [vmem:[#allocation2 + $0x48] sm:$0xff] }
  0xb5   : > { %1021 = vst.msk [vmem:[#allocation2 + $0x18] sm:$0xff] %vm310_vm2, %v956_v60  ;;  %v1155_v7 = vadd.f32 %v2333_v39, %v1087_v4  ;;  %v1103_v28 = vld [vmem:[#allocation2 + $0x90] sm:$0xff] }
  0xb6   : > { %1037 = vst.msk [vmem:[#allocation2 + $0x98] sm:$0xff] %vm310_vm2, %v972_v0  ;;  %v2410_v33 = vadd.f32 %v2333_v39, %v1103_v28  ;;  %v409_v28 = vld [vmem:[#allocation2 + $0x110] sm:$0xff] }
  0xb7   : > { %v1219_v15 = vpack.c.bf16 %v1155_v7, %v1155_v7  ;;  %v1349_v16 = vsel %vm310_vm2, %v1155_v7, 0.0  ;;  %v1483_v17 = vmul.f32 %v1155_v7, %v1155_v7  ;;  %1051 = vst.msk [vmem:[#allocation2 + $0x108] sm:$0xff] %vm310_vm2, %v986_v59 }
  0xb8   : > { %v1350_v25 = vadd.f32 %v1349_v16, %v1348_v14  ;;  %v1235_v44 = vpack.c.bf16 %v2410_v33, %v2410_v33  ;;  %v1117_v16 = vld [vmem:[#allocation2 + $0x100] sm:$0xff] }
  0xb9   : > { %1284 = vst.msk [vmem:[%s2351_s8 + $0x8] sm:$0xf] %vm1281_vm3, %v1219_v15  ;;  %v1548_v26 = vsel %vm310_vm2, %v1483_v17, 0.0  ;;  %v382_v17 = vld [vmem:[#allocation2 + $0x38] sm:$0xff] }
  0xba   : > { %v803_v13 = vpop.f32.mrf.mxu0  ;;  %v843_v29 = vpop.f32.mrf.mxu1  ;;  %v1549_v34 = vadd.f32 %v1548_v26, %v1547_v24  ;;  %1300 = vst.msk [vmem:[%s2351_s8 + $0x48] sm:$0xf] %vm1281_vm3, %v1235_v44  ;;  %v397_v24 = vld [vmem:[#allocation2 + $0xb0] sm:$0xff]  ;;  %v383_v44 = vld [vmem:[#allocation2 + $0x40] sm:$0xff] }
  0xbb   : > { %v957_v31 = vadd.f32 %v803_v13, %v379_v18  ;;  %v973_v51 = vadd.f32 %v843_v29, %v395_v48  ;;  %v878_v11 = vpop.f32.mrf.mxu2  ;;  %v2458_v18 = vadd.f32 %v2333_v39, %v1117_v16 }
  0xbc   : > { %v1088_v22 = vld [vmem:[#allocation2 + $0x18] sm:$0xff]  ;;  %v987_v41 = vadd.f32 %v878_v11, %v409_v28  ;;  %v412_v28 = vld [vmem:[#allocation2 + $0x128] sm:$0xff] }
  0xbd   : > { %v1156_v27 = vadd.f32 %v2333_v39, %v1088_v22  ;;  %v1104_v38 = vld [vmem:[#allocation2 + $0x98] sm:$0xff]  ;;  %1022 = vst.msk [vmem:[#allocation2 + $0x20] sm:$0xff] %vm310_vm2, %v957_v31  ;;  %v1249_v23 = vpack.c.bf16 %v2458_v18, %v2458_v18 }
  0xbe   : > { %v2424_v47 = vadd.f32 %v2333_v39, %v1104_v38  ;;  %1038 = vst.msk [vmem:[#allocation2 + $0xa0] sm:$0xff] %vm310_vm2, %v973_v51  ;;  %v1118_v21 = vld [vmem:[#allocation2 + $0x108] sm:$0xff] }
  0xbf   : > { %v1220_v35 = vpack.c.bf16 %v1156_v27, %v1156_v27  ;;  %v1351_v36 = vsel %vm310_vm2, %v1156_v27, 0.0  ;;  %v1484_v37 = vmul.f32 %v1156_v27, %v1156_v27  ;;  %v2472_v27 = vadd.f32 %v2333_v39, %v1118_v21  ;;  %1314 = vst.msk [vmem:[%s2351_s8 + $0x80] sm:$0xf] %vm1281_vm3, %v1249_v23  ;;  %v400_v23 = vld [vmem:[#allocation2 + $0xc8] sm:$0xff] }
  0xc0   : > { %v1352_v40 = vadd.f32 %v1351_v36, %v1350_v25  ;;  %v1236_v52 = vpack.c.bf16 %v2424_v47, %v2424_v47  ;;  %1052 = vst.msk [vmem:[#allocation2 + $0x110] sm:$0xff] %vm310_vm2, %v987_v41 }
  0xc1   : > { %1285 = vst.msk [vmem:[%s2351_s8 + $0xc] sm:$0xf] %vm1281_vm3, %v1220_v35  ;;  %v1550_v43 = vsel %vm310_vm2, %v1484_v37, 0.0  ;;  %v398_v35 = vld [vmem:[#allocation2 + $0xb8] sm:$0xff] }
  0xc2   : > { %v1551_v45 = vadd.f32 %v1550_v43, %v1549_v34  ;;  %v805_v46 = vpop.f32.mrf.mxu0  ;;  %v845_v55 = vpop.f32.mrf.mxu1  ;;  %1301 = vst.msk [vmem:[%s2351_s8 + $0x4c] sm:$0xf] %vm1281_vm3, %v1236_v52  ;;  %v410_v37 = vld [vmem:[#allocation2 + $0x118] sm:$0xff] }
  0xc3   : > { %v958_v50 = vadd.f32 %v805_v46, %v380_v42  ;;  %v974_v58 = vadd.f32 %v845_v55, %v396_v54  ;;  %v880_v38 = vpop.f32.mrf.mxu2  ;;  %v913_v55 = vpop.f32.mrf.mxu3 }
  0xc4   : > { %v1089_v60 = vld [vmem:[#allocation2 + $0x20] sm:$0xff] }
  0xc5   : > { %1023 = vst.msk [vmem:[#allocation2 + $0x28] sm:$0xff] %vm310_vm2, %v958_v50  ;;  %v1157_v61 = vadd.f32 %v2333_v39, %v1089_v60  ;;  %v1105_v13 = vld [vmem:[#allocation2 + $0xa0] sm:$0xff] }
  0xc6   : > { %1039 = vst.msk [vmem:[#allocation2 + $0xa8] sm:$0xff] %vm310_vm2, %v974_v58  ;;  %v2455_v15 = vadd.f32 %v2333_v39, %v1105_v13  ;;  %v423_v13 = vld [vmem:[#allocation2 + $0x180] sm:$0xff] }
  0xc7   : > { %v1221_v0 = vpack.c.bf16 %v1157_v61, %v1157_v61  ;;  %v1353_v1 = vsel %vm310_vm2, %v1157_v61, 0.0  ;;  %v1485_v2 = vmul.f32 %v1157_v61, %v1157_v61  ;;  %v1119_v59 = vld [vmem:[#allocation2 + $0x110] sm:$0xff] }
  0xc8   : > { %v2441_v4 = vadd.f32 %v1353_v1, %v1352_v40  ;;  %v1237_v20 = vpack.c.bf16 %v2455_v15, %v2455_v15  ;;  %v1250_v40 = vpack.c.bf16 %v2472_v27, %v2472_v27  ;;  %v2512_v61 = vadd.f32 %v2333_v39, %v1119_v59 }
  0xc9   : > { %1286 = vst.msk [vmem:[%s2351_s8 + $0x10] sm:$0xf] %vm1281_vm3, %v1221_v0  ;;  %v1552_v6 = vsel %vm310_vm2, %v1485_v2, 0.0  ;;  %v399_v2 = vld [vmem:[#allocation2 + $0xc0] sm:$0xff] }
  0xca   : > { %v808_v3 = vpop.f32.mrf.mxu0  ;;  %v2446_v8 = vadd.f32 %v1552_v6, %v1551_v45  ;;  %v848_v10 = vpop.f32.mrf.mxu1  ;;  %1302 = vst.msk [vmem:[%s2351_s8 + $0x50] sm:$0xf] %vm1281_vm3, %v1237_v20  ;;  %v988_v45 = vadd.f32 %v880_v38, %v410_v37 }
  0xcb   : > { %v959_v5 = vadd.f32 %v808_v3, %v381_v62  ;;  %v975_v30 = vadd.f32 %v848_v10, %v397_v24  ;;  %1315 = vst.msk [vmem:[%s2351_s8 + $0x84] sm:$0xf] %vm1281_vm3, %v1250_v40  ;;  %v883_v53 = vpop.f32.mrf.mxu2  ;;  %v915_v20 = vpop.f32.mrf.mxu3  ;;  %v385_v24 = vld [vmem:[#allocation2 + $0x50] sm:$0xff] }
  0xcc   : > { %v1090_v7 = vld [vmem:[#allocation2 + $0x28] sm:$0xff]  ;;  %1053 = vst.msk [vmem:[#allocation2 + $0x118] sm:$0xff] %vm310_vm2, %v988_v45  ;;  %v386_v45 = vld [vmem:[#allocation2 + $0x58] sm:$0xff] }
  0xcd   : > { %v2449_v9 = vadd.f32 %v2333_v39, %v1090_v7  ;;  %1024 = vst.msk [vmem:[#allocation2 + $0x30] sm:$0xff] %vm310_vm2, %v959_v5  ;;  %v1106_v19 = vld [vmem:[#allocation2 + $0xa8] sm:$0xff]  ;;  %v1251_v5 = vpack.c.bf16 %v2512_v61, %v2512_v61  ;;  %v411_v7 = vld [vmem:[#allocation2 + $0x120] sm:$0xff] }
  0xce   : > { %v2469_v26 = vadd.f32 %v2333_v39, %v1106_v19  ;;  %1040 = vst.msk [vmem:[#allocation2 + $0xb0] sm:$0xff] %vm310_vm2, %v975_v30 }
  0xcf   : > { %v1222_v14 = vpack.c.bf16 %v2449_v9, %v2449_v9  ;;  %1316 = vst.msk [vmem:[%s2351_s8 + $0x88] sm:$0xf] %vm1281_vm3, %v1251_v5 }
  0xd0   : > { %v1238_v34 = vpack.c.bf16 %v2469_v26, %v2469_v26 }
  0xd1   : > { %1287 = vst.msk [vmem:[%s2351_s8 + $0x14] sm:$0xf] %vm1281_vm3, %v1222_v14 }
  0xd2   : > { %v810_v22 = vpop.f32.mrf.mxu0  ;;  %v850_v36 = vpop.f32.mrf.mxu1  ;;  %1303 = vst.msk [vmem:[%s2351_s8 + $0x54] sm:$0xf] %vm1281_vm3, %v1238_v34 }
  0xd3   : > { %v960_v25 = vadd.f32 %v810_v22, %v382_v17  ;;  %v976_v43 = vadd.f32 %v850_v36, %v398_v35  ;;  %v1120_v1 = vld [vmem:[#allocation2 + $0x118] sm:$0xff]  ;;  %v885_v16 = vpop.f32.mrf.mxu2  ;;  %v989_v22 = vadd.f32 %v883_v53, %v411_v7 }
  0xd4   : > { %v1091_v29 = vld [vmem:[#allocation2 + $0x30] sm:$0xff]  ;;  %v2520_v6 = vadd.f32 %v2333_v39, %v1120_v1  ;;  %v990_v36 = vadd.f32 %v885_v16, %v412_v28 }
  0xd5   : > { %v2477_v31 = vadd.f32 %v2333_v39, %v1091_v29  ;;  %1025 = vst.msk [vmem:[#allocation2 + $0x38] sm:$0xff] %vm310_vm2, %v960_v25  ;;  %v1107_v51 = vld [vmem:[#allocation2 + $0xb0] sm:$0xff]  ;;  %v1001_v25 = vadd.f32 %v913_v55, %v423_v13  ;;  %v424_v29 = vld [vmem:[#allocation2 + $0x188] sm:$0xff] }
  0xd6   : > { %1041 = vst.msk [vmem:[#allocation2 + $0xb8] sm:$0xff] %vm310_vm2, %v976_v43  ;;  %v2501_v54 = vadd.f32 %v2333_v39, %v1107_v51  ;;  %v1252_v17 = vpack.c.bf16 %v2520_v6, %v2520_v6  ;;  %v1002_v38 = vadd.f32 %v915_v20, %v424_v29  ;;  %v918_v43 = vpop.f32.mrf.mxu3 }
  0xd7   : > { %v1223_v42 = vpack.c.bf16 %v2477_v31, %v2477_v31  ;;  %1054 = vst.msk [vmem:[#allocation2 + $0x120] sm:$0xff] %vm310_vm2, %v989_v22 }
  0xd8   : > { %v1239_v58 = vpack.c.bf16 %v2501_v54, %v2501_v54  ;;  %1317 = vst.msk [vmem:[%s2351_s8 + $0x8c] sm:$0xf] %vm1281_vm3, %v1252_v17 }
  0xd9   : > { %1288 = vst.msk [vmem:[%s2351_s8 + $0x18] sm:$0xf] %vm1281_vm3, %v1223_v42 }
  0xda   : > { %v813_v46 = vpop.f32.mrf.mxu0  ;;  %v853_v52 = vpop.f32.mrf.mxu1  ;;  %1304 = vst.msk [vmem:[%s2351_s8 + $0x58] sm:$0xf] %vm1281_vm3, %v1239_v58 }
  0xdb   : > { %v961_v48 = vadd.f32 %v813_v46, %v383_v44  ;;  %v977_v19 = vadd.f32 %v853_v52, %v399_v2  ;;  %1066 = vst.msk [vmem:[#allocation2 + $0x180] sm:$0xff] %vm310_vm2, %v1001_v25  ;;  %v888_v42 = vpop.f32.mrf.mxu2 }
  0xdc   : > { %v1092_v49 = vld [vmem:[#allocation2 + $0x38] sm:$0xff]  ;;  %1055 = vst.msk [vmem:[#allocation2 + $0x128] sm:$0xff] %vm310_vm2, %v990_v36 }
  0xdd   : > { %v2497_v50 = vadd.f32 %v2333_v39, %v1092_v49  ;;  %1026 = vst.msk [vmem:[#allocation2 + $0x40] sm:$0xff] %vm310_vm2, %v961_v48  ;;  %v1108_v62 = vld [vmem:[#allocation2 + $0xb8] sm:$0xff] }
  0xde   : > { %v2515_v0 = vadd.f32 %v2333_v39, %v1108_v62  ;;  %1042 = vst.msk [vmem:[#allocation2 + $0xc0] sm:$0xff] %vm310_vm2, %v977_v19  ;;  %v1121_v51 = vld [vmem:[#allocation2 + $0x120] sm:$0xff]  ;;  %v920_v13 = vpop.f32.mrf.mxu3 }
  0xdf   : > { %v1224_v56 = vpack.c.bf16 %v2497_v50, %v2497_v50  ;;  %1067 = vst.msk [vmem:[#allocation2 + $0x188] sm:$0xff] %vm310_vm2, %v1002_v38  ;;  %v2558_v53 = vadd.f32 %v2333_v39, %v1121_v51  ;;  %v387_v19 = vld [vmem:[#allocation2 + $0x60] sm:$0xff]  ;;  %v388_v51 = vld [vmem:[#allocation2 + $0x68] sm:$0xff] }
  0xe0   : > { %v1240_v11 = vpack.c.bf16 %v2515_v0, %v2515_v0 }
  0xe1   : > { %1289 = vst.msk [vmem:[%s2351_s8 + $0x1c] sm:$0xf] %vm1281_vm3, %v1224_v56  ;;  %v401_v56 = vld [vmem:[#allocation2 + $0xd0] sm:$0xff] }
  0xe2   : > { %v815_v60 = vpop.f32.mrf.mxu0  ;;  %v855_v14 = vpop.f32.mrf.mxu1  ;;  %1305 = vst.msk [vmem:[%s2351_s8 + $0x5c] sm:$0xf] %vm1281_vm3, %v1240_v11  ;;  %v1133_v55 = vld [vmem:[#allocation2 + $0x180] sm:$0xff] }
  0xe3   : > { %v962_v63 = vadd.f32 %v815_v60, %v384_v57  ;;  %v978_v34 = vadd.f32 %v855_v14, %v400_v23  ;;  %v2563_v59 = vadd.f32 %v2333_v39, %v1133_v55  ;;  %v413_v60 = vld [vmem:[#allocation2 + $0x130] sm:$0xff]  ;;  %v1122_v7 = vld [vmem:[#allocation2 + $0x128] sm:$0xff] }
  0xe4   : > { %v1093_v3 = vld [vmem:[#allocation2 + $0x40] sm:$0xff]  ;;  %v991_v17 = vadd.f32 %v888_v42, %v413_v60  ;;  %v425_v23 = vld [vmem:[#allocation2 + $0x190] sm:$0xff] }
  0xe5   : > { %v2523_v10 = vadd.f32 %v2333_v39, %v1093_v3  ;;  %1027 = vst.msk [vmem:[#allocation2 + $0x48] sm:$0xff] %vm310_vm2, %v962_v63  ;;  %v1109_v46 = vld [vmem:[#allocation2 + $0xc0] sm:$0xff]  ;;  %v1253_v63 = vpack.c.bf16 %v2558_v53, %v2558_v53  ;;  %v890_v3 = vpop.f32.mrf.mxu2  ;;  %v1265_v5 = vpack.c.bf16 %v2563_v59, %v2563_v59  ;;  %v1003_v36 = vadd.f32 %v918_v43, %v425_v23 }
  0xe6   : > { %1043 = vst.msk [vmem:[#allocation2 + $0xc8] sm:$0xff] %vm310_vm2, %v978_v34  ;;  %v2555_v49 = vadd.f32 %v2333_v39, %v1109_v46  ;;  %v1134_v16 = vld [vmem:[#allocation2 + $0x188] sm:$0xff]  ;;  %v923_v46 = vpop.f32.mrf.mxu3 }
  0xe7   : > { %v1225_v21 = vpack.c.bf16 %v2523_v10, %v2523_v10  ;;  %1318 = vst.msk [vmem:[%s2351_s8 + $0x90] sm:$0xf] %vm1281_vm3, %v1253_v63  ;;  %v2590_v22 = vadd.f32 %v2333_v39, %v1134_v16 }
  0xe8   : > { %v1241_v58 = vpack.c.bf16 %v2555_v49, %v2555_v49  ;;  %1330 = vst.msk [vmem:[%s2351_s8 + $0xc0] sm:$0xf] %vm1281_vm3, %v1265_v5 }
  0xe9   : > { %1290 = vst.msk [vmem:[%s2351_s8 + $0x20] sm:$0xf] %vm1281_vm3, %v1225_v21  ;;  %v2585_v21 = vadd.f32 %v2333_v39, %v1122_v7 }
  0xea   : > { %v818_v30 = vpop.f32.mrf.mxu0  ;;  %v858_v41 = vpop.f32.mrf.mxu1  ;;  %1306 = vst.msk [vmem:[%s2351_s8 + $0x60] sm:$0xf] %vm1281_vm3, %v1241_v58 }
  0xeb   : > { %v963_v35 = vadd.f32 %v818_v30, %v385_v24  ;;  %v979_v11 = vadd.f32 %v858_v41, %v401_v56  ;;  %v1254_v29 = vpack.c.bf16 %v2585_v21, %v2585_v21  ;;  %1056 = vst.msk [vmem:[#allocation2 + $0x130] sm:$0xff] %vm310_vm2, %v991_v17  ;;  %v402_v30 = vld [vmem:[#allocation2 + $0xd8] sm:$0xff] }
  0xec   : > { %v1094_v37 = vld [vmem:[#allocation2 + $0x48] sm:$0xff]  ;;  %v426_v41 = vld [vmem:[#allocation2 + $0x198] sm:$0xff]  ;;  %1068 = vst.msk [vmem:[#allocation2 + $0x190] sm:$0xff] %vm310_vm2, %v1003_v36  ;;  %v389_v36 = vld [vmem:[#allocation2 + $0x70] sm:$0xff] }
  0xed   : > { %v2544_v40 = vadd.f32 %v2333_v39, %v1094_v37  ;;  %1028 = vst.msk [vmem:[#allocation2 + $0x50] sm:$0xff] %vm310_vm2, %v963_v35  ;;  %v1110_v1 = vld [vmem:[#allocation2 + $0xc8] sm:$0xff]  ;;  %v1266_v35 = vpack.c.bf16 %v2590_v22, %v2590_v22  ;;  %v414_v37 = vld [vmem:[#allocation2 + $0x138] sm:$0xff] }
  0xee   : > { %v2582_v20 = vadd.f32 %v2333_v39, %v1110_v1  ;;  %1044 = vst.msk [vmem:[#allocation2 + $0xd0] sm:$0xff] %vm310_vm2, %v979_v11  ;;  %v992_v43 = vadd.f32 %v890_v3, %v414_v37  ;;  %v1486_v3 = vmul.f32 %v2449_v9, %v2449_v9  ;;  %v403_v11 = vld [vmem:[#allocation2 + $0xe0] sm:$0xff]  ;;  %v1355_v37 = vsel %vm310_vm2, %v2449_v9, 0.0 }
  0xef   : > { %v1226_v44 = vpack.c.bf16 %v2544_v40, %v2544_v40  ;;  %1319 = vst.msk [vmem:[%s2351_s8 + $0x94] sm:$0xf] %vm1281_vm3, %v1254_v29  ;;  %v1357_v9 = vsel %vm310_vm2, %v2477_v31, 0.0 }
  0xf0   : > { %v1242_v25 = vpack.c.bf16 %v2582_v20, %v2582_v20  ;;  %1331 = vst.msk [vmem:[%s2351_s8 + $0xc4] sm:$0xf] %vm1281_vm3, %v1266_v35 }
  0xf1   : > { %1291 = vst.msk [vmem:[%s2351_s8 + $0x24] sm:$0xf] %vm1281_vm3, %v1226_v44  ;;  %v893_v44 = vpop.f32.mrf.mxu2 }
  0xf2   : > { %v820_v48 = vpop.f32.mrf.mxu0  ;;  %v860_v2 = vpop.f32.mrf.mxu1  ;;  %1307 = vst.msk [vmem:[%s2351_s8 + $0x64] sm:$0xf] %vm1281_vm3, %v1242_v25  ;;  %v1123_v58 = vld [vmem:[#allocation2 + $0x130] sm:$0xff] }
  0xf3   : > { %v964_v52 = vadd.f32 %v820_v48, %v386_v45  ;;  %v980_v45 = vadd.f32 %v860_v2, %v402_v30  ;;  %v2620_v63 = vadd.f32 %v2333_v39, %v1123_v58  ;;  %1057 = vst.msk [vmem:[#allocation2 + $0x138] sm:$0xff] %vm310_vm2, %v992_v43  ;;  %v404_v30 = vld [vmem:[#allocation2 + $0xe8] sm:$0xff]  ;;  %v1356_v58 = vadd.f32 %v1355_v37, %v2441_v4 }
  0xf4   : > { %v1095_v57 = vld [vmem:[#allocation2 + $0x50] sm:$0xff] }
  0xf5   : > { %v2566_v62 = vadd.f32 %v2333_v39, %v1095_v57  ;;  %1029 = vst.msk [vmem:[#allocation2 + $0x58] sm:$0xff] %vm310_vm2, %v964_v52  ;;  %v1004_v52 = vadd.f32 %v920_v13, %v426_v41  ;;  %v1111_v55 = vld [vmem:[#allocation2 + $0xd0] sm:$0xff]  ;;  %v1255_v7 = vpack.c.bf16 %v2620_v63, %v2620_v63  ;;  %v415_v13 = vld [vmem:[#allocation2 + $0x140] sm:$0xff]  ;;  %v1554_v41 = vsel %vm310_vm2, %v1486_v3, 0.0  ;;  %v416_v3 = vld [vmem:[#allocation2 + $0x148] sm:$0xff] }
  0xf6   : > { %v2616_v57 = vadd.f32 %v2333_v39, %v1111_v55  ;;  %1045 = vst.msk [vmem:[#allocation2 + $0xd8] sm:$0xff] %vm310_vm2, %v980_v45  ;;  %v993_v23 = vadd.f32 %v893_v44, %v415_v13  ;;  %v1488_v44 = vmul.f32 %v2497_v50, %v2497_v50  ;;  %v428_v13 = vld [vmem:[#allocation2 + $0x1a8] sm:$0xff] }
  0xf7   : > { %v1227_v14 = vpack.c.bf16 %v2566_v62, %v2566_v62  ;;  %1069 = vst.msk [vmem:[#allocation2 + $0x198] sm:$0xff] %vm310_vm2, %v1004_v52 }
  0xf8   : > { %v1243_v2 = vpack.c.bf16 %v2616_v57, %v2616_v57  ;;  %1320 = vst.msk [vmem:[%s2351_s8 + $0x98] sm:$0xf] %vm1281_vm3, %v1255_v7  ;;  %v1359_v7 = vsel %vm310_vm2, %v2497_v50, 0.0  ;;  %v1558_v50 = vsel %vm310_vm2, %v1488_v44, 0.0  ;;  %v390_v44 = vld [vmem:[#allocation2 + $0x78] sm:$0xff] }
  0xf9   : > { %1292 = vst.msk [vmem:[%s2351_s8 + $0x28] sm:$0xf] %vm1281_vm3, %v1227_v14  ;;  %v427_v14 = vld [vmem:[#allocation2 + $0x1a0] sm:$0xff]  ;;  %v895_v17 = vpop.f32.mrf.mxu2 }
  0xfa   : > { %v823_v24 = vpop.f32.mrf.mxu0  ;;  %v863_v42 = vpop.f32.mrf.mxu1  ;;  %1308 = vst.msk [vmem:[%s2351_s8 + $0x68] sm:$0xf] %vm1281_vm3, %v1243_v2  ;;  %v1005_v29 = vadd.f32 %v923_v46, %v427_v14  ;;  %v994_v37 = vadd.f32 %v895_v17, %v416_v3 }
  0xfb   : > { %v965_v28 = vadd.f32 %v823_v24, %v387_v19  ;;  %v981_v19 = vadd.f32 %v863_v42, %v403_v11  ;;  %v925_v24 = vpop.f32.mrf.mxu3  ;;  %1058 = vst.msk [vmem:[#allocation2 + $0x140] sm:$0xff] %vm310_vm2, %v993_v23  ;;  %v1489_v11 = vmul.f32 %v2523_v10, %v2523_v10 }
  0xfc   : > { %v1096_v34 = vld [vmem:[#allocation2 + $0x58] sm:$0xff]  ;;  %1070 = vst.msk [vmem:[#allocation2 + $0x1a0] sm:$0xff] %vm310_vm2, %v1005_v29  ;;  %v1361_v29 = vsel %vm310_vm2, %v2523_v10, 0.0  ;;  %v1363_v10 = vsel %vm310_vm2, %v2544_v40, 0.0 }
  0xfd   : > { %v2603_v38 = vadd.f32 %v2333_v39, %v1096_v34  ;;  %1030 = vst.msk [vmem:[#allocation2 + $0x60] sm:$0xff] %vm310_vm2, %v965_v28  ;;  %v1135_v28 = vld [vmem:[#allocation2 + $0x190] sm:$0xff]  ;;  %v1487_v34 = vmul.f32 %v2477_v31, %v2477_v31  ;;  %v1112_v42 = vld [vmem:[#allocation2 + $0xd8] sm:$0xff] }
  0xfe   : > { %v2643_v35 = vadd.f32 %v2333_v39, %v1135_v28  ;;  %1046 = vst.msk [vmem:[#allocation2 + $0xe0] sm:$0xff] %vm310_vm2, %v981_v19  ;;  %v2659_v52 = vadd.f32 %v2333_v39, %v1112_v42  ;;  %v1358_v19 = vadd.f32 %v1357_v9, %v1356_v58 }
  0xff   : > { %v1228_v48 = vpack.c.bf16 %v2603_v38, %v2603_v38  ;;  %1059 = vst.msk [vmem:[#allocation2 + $0x148] sm:$0xff] %vm310_vm2, %v994_v37 }
 0x100   : > { %v1267_v45 = vpack.c.bf16 %v2643_v35, %v2643_v35  ;;  %v1360_v42 = vadd.f32 %v1359_v7, %v1358_v19 }
 0x101   : > { %1293 = vst.msk [vmem:[%s2351_s8 + $0x2c] sm:$0xf] %vm1281_vm3, %v1228_v48  ;;  %v1124_v48 = vld [vmem:[#allocation2 + $0x138] sm:$0xff] }
 0x102   : > { %v825_v56 = vpop.f32.mrf.mxu0  ;;  %v865_v16 = vpop.f32.mrf.mxu1  ;;  %v2662_v55 = vadd.f32 %v2333_v39, %v1124_v48  ;;  %1332 = vst.msk [vmem:[%s2351_s8 + $0xc8] sm:$0xf] %vm1281_vm3, %v1267_v45  ;;  %v1006_v45 = vadd.f32 %v925_v24, %v428_v13  ;;  %v1491_v48 = vmul.f32 %v2566_v62, %v2566_v62  ;;  %v1125_v17 = vld [vmem:[#allocation2 + $0x140] sm:$0xff] }
 0x103   : > { %v966_v60 = vadd.f32 %v825_v56, %v388_v51  ;;  %v982_v43 = vadd.f32 %v865_v16, %v404_v30  ;;  %v1136_v56 = vld [vmem:[#allocation2 + $0x198] sm:$0xff]  ;;  %v2685_v16 = vpop.f32.mrf.mxu2  ;;  %v2693_v28 = vpop.f32.mrf.mxu3  ;;  %v1490_v30 = vmul.f32 %v2544_v40, %v2544_v40  ;;  %v2720_v58 = vadd.f32 %v2333_v39, %v1125_v17  ;;  %v1137_v40 = vld [vmem:[#allocation2 + $0x1a0] sm:$0xff]  ;;  %v429_v17 = vld [vmem:[#allocation2 + $0x1b0] sm:$0xff] }
 0x104   : > { %v1097_v1 = vld [vmem:[#allocation2 + $0x60] sm:$0xff]  ;;  %v2671_v31 = vadd.f32 %v2333_v39, %v1136_v56  ;;  %v1256_v23 = vpack.c.bf16 %v2662_v55, %v2662_v55  ;;  %v1492_v56 = vmul.f32 %v2603_v38, %v2603_v38  ;;  %v2731_v19 = vadd.f32 %v2333_v39, %v1137_v40  ;;  %1071 = vst.msk [vmem:[#allocation2 + $0x1a8] sm:$0xff] %vm310_vm2, %v1006_v45 }
 0x105   : > { %v2629_v5 = vadd.f32 %v2333_v39, %v1097_v1  ;;  %1031 = vst.msk [vmem:[#allocation2 + $0x68] sm:$0xff] %vm310_vm2, %v966_v60  ;;  %v1555_v60 = vadd.f32 %v1554_v41, %v2446_v8  ;;  %v1556_v1 = vsel %vm310_vm2, %v1487_v34, 0.0  ;;  %v1244_v8 = vpack.c.bf16 %v2659_v52, %v2659_v52 }
 0x106   : > { %1047 = vst.msk [vmem:[#allocation2 + $0xe8] sm:$0xff] %vm310_vm2, %v982_v43  ;;  %v1257_v13 = vpack.c.bf16 %v2720_v58, %v2720_v58 }
 0x107   : > { %v1229_v25 = vpack.c.bf16 %v2629_v5, %v2629_v5  ;;  %1309 = vst.msk [vmem:[%s2351_s8 + $0x6c] sm:$0xf] %vm1281_vm3, %v1244_v8  ;;  %v1557_v41 = vadd.f32 %v1556_v1, %v1555_v60  ;;  %v1562_v60 = vsel %vm310_vm2, %v1490_v30, 0.0  ;;  %v1365_v1 = vsel %vm310_vm2, %v2566_v62, 0.0  ;;  %v405_v30 = vld [vmem:[#allocation2 + $0xf0] sm:$0xff] }
 0x108   : > { %1321 = vst.msk [vmem:[%s2351_s8 + $0x9c] sm:$0xf] %vm1281_vm3, %v1256_v23  ;;  %v1564_v62 = vsel %vm310_vm2, %v1491_v48, 0.0  ;;  %v1493_v23 = vmul.f32 %v2629_v5, %v2629_v5  ;;  %v1369_v45 = vsel %vm310_vm2, %v2629_v5, 0.0 }
 0x109   : > { %1294 = vst.msk [vmem:[%s2351_s8 + $0x30] sm:$0xf] %vm1281_vm3, %v1229_v25  ;;  %v1268_v25 = vpack.c.bf16 %v2671_v31, %v2671_v31  ;;  %v1559_v9 = vadd.f32 %v1558_v50, %v1557_v41  ;;  %v1367_v50 = vsel %vm310_vm2, %v2603_v38, 0.0  ;;  %v1269_v38 = vpack.c.bf16 %v2731_v19, %v2731_v19 }
 0x10a   : > { %v828_v46 = vpop.f32.mrf.mxu0  ;;  %v2683_v14 = vpop.f32.mrf.mxu1  ;;  %1322 = vst.msk [vmem:[%s2351_s8 + $0xa0] sm:$0xf] %vm1281_vm3, %v1257_v13 }
 0x10b   : > { %v967_v51 = vadd.f32 %v828_v46, %v389_v36  ;;  %v1113_v36 = vld [vmem:[#allocation2 + $0xe0] sm:$0xff]  ;;  %v1560_v46 = vsel %vm310_vm2, %v1489_v11, 0.0  ;;  %1333 = vst.msk [vmem:[%s2351_s8 + $0xcc] sm:$0xf] %vm1281_vm3, %v1268_v25  ;;  %v983_v40 = vadd.f32 %v2683_v14, %v405_v30  ;;  %v1007_v14 = vadd.f32 %v2693_v28, %v429_v17  ;;  %v430_v28 = vld [vmem:[#allocation2 + $0x1b8] sm:$0xff] }
 0x10c   : > { %v1098_v2 = vld [vmem:[#allocation2 + $0x68] sm:$0xff]  ;;  %v2713_v43 = vadd.f32 %v2333_v39, %v1113_v36  ;;  %v1561_v7 = vadd.f32 %v1560_v46, %v1559_v9  ;;  %v900_v36 = vpop.f32.mrf.mxu2  ;;  %v406_v9 = vld [vmem:[#allocation2 + $0xf8] sm:$0xff]  ;;  %1334 = vst.msk [vmem:[%s2351_s8 + $0xd0] sm:$0xf] %vm1281_vm3, %v1269_v38 }
 0x10d   : > { %v2678_v4 = vadd.f32 %v2333_v39, %v1098_v2  ;;  %1032 = vst.msk [vmem:[#allocation2 + $0x70] sm:$0xff] %vm310_vm2, %v967_v51  ;;  %v1362_v51 = vadd.f32 %v1361_v29, %v1360_v42  ;;  %v1114_v29 = vld [vmem:[#allocation2 + $0xe8] sm:$0xff]  ;;  %v1566_v42 = vsel %vm310_vm2, %v1492_v56, 0.0 }
 0x10e   : > { %v1245_v3 = vpack.c.bf16 %v2713_v43, %v2713_v43  ;;  %v1563_v37 = vadd.f32 %v1562_v60, %v1561_v7  ;;  %v2753_v48 = vadd.f32 %v2333_v39, %v1114_v29  ;;  %v1568_v60 = vsel %vm310_vm2, %v1493_v23, 0.0  ;;  %1048 = vst.msk [vmem:[#allocation2 + $0xf0] sm:$0xff] %vm310_vm2, %v983_v40  ;;  %v418_v23 = vld [vmem:[#allocation2 + $0x158] sm:$0xff] }
 0x10f   : > { %v1230_v34 = vpack.c.bf16 %v2678_v4, %v2678_v4  ;;  %v1364_v11 = vadd.f32 %v1363_v10, %v1362_v51  ;;  %v1494_v46 = vmul.f32 %v2678_v4, %v2678_v4  ;;  %1072 = vst.msk [vmem:[#allocation2 + $0x1b0] sm:$0xff] %vm310_vm2, %v1007_v14 }
 0x110   : > { %1310 = vst.msk [vmem:[%s2351_s8 + $0x70] sm:$0xf] %vm1281_vm3, %v1245_v3  ;;  %v1565_v56 = vadd.f32 %v1564_v62, %v1563_v37  ;;  %v1246_v3 = vpack.c.bf16 %v2753_v48, %v2753_v48 }
 0x111   : > { %1295 = vst.msk [vmem:[%s2351_s8 + $0x34] sm:$0xf] %vm1281_vm3, %v1230_v34  ;;  %v417_v34 = vld [vmem:[#allocation2 + $0x150] sm:$0xff]  ;;  %v1366_v41 = vadd.f32 %v1365_v1, %v1364_v11  ;;  %v1371_v1 = vsel %vm310_vm2, %v2678_v4, 0.0 }
 0x112   : > { %v830_v24 = vpop.f32.mrf.mxu0  ;;  %v870_v51 = vpop.f32.mrf.mxu1  ;;  %v995_v5 = vadd.f32 %v2685_v16, %v417_v34  ;;  %v1567_v7 = vadd.f32 %v1566_v42, %v1565_v56  ;;  %v1570_v16 = vsel %vm310_vm2, %v1494_v46, 0.0  ;;  %1311 = vst.msk [vmem:[%s2351_s8 + $0x74] sm:$0xf] %vm1281_vm3, %v1246_v3  ;;  %v1377_v3 = vsel %vm310_vm2, %v2390_v12, 0.0 }
 0x113   : > { %v968_v2 = vadd.f32 %v830_v24, %v390_v44  ;;  %v930_v44 = vpop.f32.mrf.mxu3  ;;  %v1368_v24 = vadd.f32 %v1367_v50, %v1366_v41  ;;  %v984_v13 = vadd.f32 %v870_v51, %v406_v9  ;;  %v1138_v50 = vld [vmem:[#allocation2 + $0x1a8] sm:$0xff]  ;;  %v996_v9 = vadd.f32 %v900_v36, %v418_v23 }
 0x114   : > { %v1099_v8 = vld [vmem:[#allocation2 + $0x70] sm:$0xff]  ;;  %v1569_v29 = vadd.f32 %v1568_v60, %v1567_v7  ;;  %v2776_v37 = vadd.f32 %v2333_v39, %v1138_v50  ;;  %1060 = vst.msk [vmem:[#allocation2 + $0x150] sm:$0xff] %vm310_vm2, %v995_v5  ;;  %v1008_v5 = vadd.f32 %v930_v44, %v430_v28  ;;  %v1498_v60 = vmul.f32 %v2407_v32, %v2407_v32 }
 0x115   : > { %v1167_v25 = vadd.f32 %v2333_v39, %v1099_v8  ;;  %1033 = vst.msk [vmem:[#allocation2 + $0x78] sm:$0xff] %vm310_vm2, %v968_v2  ;;  %v1370_v11 = vadd.f32 %v1369_v45, %v1368_v24  ;;  %v1126_v8 = vld [vmem:[#allocation2 + $0x148] sm:$0xff]  ;;  %v903_v45 = vpop.f32.mrf.mxu2  ;;  %v1115_v7 = vld [vmem:[#allocation2 + $0xf0] sm:$0xff]  ;;  %v1501_v28 = vmul.f32 %v2455_v15, %v2455_v15 }
 0x116   : > { %v2773_v4 = vadd.f32 %v2333_v39, %v1126_v8  ;;  %v1571_v46 = vadd.f32 %v1570_v16, %v1569_v29  ;;  %v1270_v17 = vpack.c.bf16 %v2776_v37, %v2776_v37  ;;  %1049 = vst.msk [vmem:[#allocation2 + $0xf8] sm:$0xff] %vm310_vm2, %v984_v13  ;;  %v2804_v14 = vadd.f32 %v2333_v39, %v1115_v7 }
 0x117   : > { %v1231_v10 = vpack.c.bf16 %v1167_v25, %v1167_v25  ;;  %v1495_v2 = vmul.f32 %v1167_v25, %v1167_v25  ;;  %v1373_v62 = vsel %vm310_vm2, %v1167_v25, 0.0  ;;  %v1372_v30 = vadd.f32 %v1371_v1, %v1370_v11  ;;  %1061 = vst.msk [vmem:[#allocation2 + $0x158] sm:$0xff] %vm310_vm2, %v996_v9 }
 0x118   : > { %v1497_v25 = vmul.f32 %v2390_v12, %v2390_v12  ;;  %v1258_v38 = vpack.c.bf16 %v2773_v4, %v2773_v4  ;;  %1335 = vst.msk [vmem:[%s2351_s8 + $0xd4] sm:$0xf] %vm1281_vm3, %v1270_v17  ;;  %v1379_v13 = vsel %vm310_vm2, %v2407_v32, 0.0  ;;  %v1381_v12 = vsel %vm310_vm2, %v2410_v33, 0.0  ;;  %v2833_v17 = vld [vmem:[%s3199_s2] ss:$0 sm:$0xff] }
 0x119   : > { %1296 = vst.msk [vmem:[%s2351_s8 + $0x38] sm:$0xf] %vm1281_vm3, %v1231_v10  ;;  %v1572_v41 = vsel %vm310_vm2, %v1495_v2, 0.0  ;;  %v1374_v10 = vadd.f32 %v1373_v62, %v1372_v30  ;;  %v1499_v16 = vmul.f32 %v2410_v33, %v2410_v33  ;;  %v1578_v50 = vsel %vm310_vm2, %v1498_v60, 0.0 }
 0x11a   : > { %1323 = vst.msk [vmem:[%s2351_s8 + $0xa4] sm:$0xf] %vm1281_vm3, %v1258_v38  ;;  %v1573_v1 = vadd.f32 %v1572_v41, %v1571_v46  ;;  %v1576_v44 = vsel %vm310_vm2, %v1497_v25, 0.0  ;;  %v1247_v30 = vpack.c.bf16 %v2804_v14, %v2804_v14  ;;  %v1500_v32 = vmul.f32 %v2424_v47, %v2424_v47 }
 0x11b   : > { %v2789_v51 = vpop.f32.mrf.mxu3  ;;  %v1127_v62 = vld [vmem:[#allocation2 + $0x150] sm:$0xff]  ;;  %1073 = vst.msk [vmem:[#allocation2 + $0x1b8] sm:$0xff] %vm310_vm2, %v1008_v5 }
 0x11c   : > { %v1100_v34 = vld [vmem:[#allocation2 + $0x78] sm:$0xff]  ;;  %v2823_v33 = vadd.f32 %v2333_v39, %v1127_v62  ;;  %1312 = vst.msk [vmem:[%s2351_s8 + $0x78] sm:$0xf] %vm1281_vm3, %v1247_v30  ;;  %v1387_v62 = vsel %vm310_vm2, %v2469_v26, 0.0  ;;  %v432_v30 = vld [vmem:[#allocation2 + $0x1c8] sm:$0xff] }
 0x11d   : > { %v1168_v42 = vadd.f32 %v2333_v39, %v1100_v34  ;;  %v1139_v34 = vld [vmem:[#allocation2 + $0x1b0] sm:$0xff]  ;;  %v1116_v41 = vld [vmem:[#allocation2 + $0xf8] sm:$0xff]  ;;  %v905_v38 = vpop.f32.mrf.mxu2 }
 0x11e   : > { %v2826_v25 = vadd.f32 %v2333_v39, %v1139_v34  ;;  %v2836_v9 = vadd.f32 %v2833_v17, %v1116_v41  ;;  %v1580_v39 = vsel %vm310_vm2, %v1499_v16, 0.0  ;;  %v1259_v5 = vpack.c.bf16 %v2823_v33, %v2823_v33 }
 0x11f   : > { %v1232_v56 = vpack.c.bf16 %v1168_v42, %v1168_v42  ;;  %v1375_v24 = vsel %vm310_vm2, %v1168_v42, 0.0  ;;  %v1496_v40 = vmul.f32 %v1168_v42, %v1168_v42  ;;  %v419_v42 = vld [vmem:[#allocation2 + $0x160] sm:$0xff] }
 0x120   : > { %v1376_v2 = vadd.f32 %v1375_v24, %v1374_v10  ;;  %1324 = vst.msk [vmem:[%s2351_s8 + $0xa8] sm:$0xf] %vm1281_vm3, %v1259_v5  ;;  %v1248_v7 = vpack.c.bf16 %v2836_v9, %v2836_v9 }
 0x121   : > { %1297 = vst.msk [vmem:[%s2351_s8 + $0x3c] sm:$0xf] %vm1281_vm3, %v1232_v56  ;;  %v1574_v36 = vsel %vm310_vm2, %v1496_v40, 0.0  ;;  %v997_v56 = vadd.f32 %v903_v45, %v419_v42  ;;  %v1383_v40 = vsel %vm310_vm2, %v2424_v47, 0.0  ;;  %v1582_v45 = vsel %vm310_vm2, %v1500_v32, 0.0 }
 0x122   : > { %v1378_v11 = vadd.f32 %v1377_v3, %v1376_v2  ;;  %v1575_v8 = vadd.f32 %v1574_v36, %v1573_v1  ;;  %v1271_v2 = vpack.c.bf16 %v2826_v25, %v2826_v25  ;;  %v431_v3 = vld [vmem:[#allocation2 + $0x1c0] sm:$0xff]  ;;  %v1385_v36 = vsel %vm310_vm2, %v2455_v15, 0.0  ;;  %v1140_v15 = vld [vmem:[#allocation2 + $0x1b8] sm:$0xff]  ;;  %1313 = vst.msk [vmem:[%s2351_s8 + $0x7c] sm:$0xf] %vm1281_vm3, %v1248_v7 }
 0x123   : > { %v935_v24 = vpop.f32.mrf.mxu3  ;;  %1062 = vst.msk [vmem:[#allocation2 + $0x160] sm:$0xff] %vm310_vm2, %v997_v56  ;;  %v1502_v47 = vmul.f32 %v2469_v26, %v2469_v26  ;;  %v1389_v42 = vsel %vm310_vm2, %v2501_v54, 0.0 }
 0x124   : > { %v1380_v23 = vadd.f32 %v1379_v13, %v1378_v11  ;;  %v1577_v29 = vadd.f32 %v1576_v44, %v1575_v8  ;;  %v1128_v11 = vld [vmem:[#allocation2 + $0x158] sm:$0xff]  ;;  %v420_v8 = vld [vmem:[#allocation2 + $0x168] sm:$0xff]  ;;  %v1584_v44 = vsel %vm310_vm2, %v1501_v28, 0.0  ;;  %1336 = vst.msk [vmem:[%s2351_s8 + $0xd8] sm:$0xf] %vm1281_vm3, %v1271_v2  ;;  %v1506_v2 = vmul.f32 %v2582_v20, %v2582_v20 }
 0x125   : > { %v2859_v16 = vadd.f32 %v2833_v17, %v1128_v11  ;;  %v998_v41 = vadd.f32 %v905_v38, %v420_v8  ;;  %v1586_v26 = vsel %vm310_vm2, %v1502_v47, 0.0  ;;  %v1507_v47 = vmul.f32 %v2616_v57, %v2616_v57 }
 0x126   : > { %v1382_v46 = vadd.f32 %v1381_v12, %v1380_v23  ;;  %v1579_v10 = vadd.f32 %v1578_v50, %v1577_v29  ;;  %v1503_v50 = vmul.f32 %v2501_v54, %v2501_v54  ;;  %v2868_v23 = vadd.f32 %v2833_v17, %v1140_v15 }
 0x127   : > { %v1009_v29 = vadd.f32 %v2789_v51, %v431_v3  ;;  %v1260_v28 = vpack.c.bf16 %v2859_v16, %v2859_v16  ;;  %v908_v51 = vpop.f32.mrf.mxu2  ;;  %v1391_v54 = vsel %vm310_vm2, %v2515_v0, 0.0  ;;  %1063 = vst.msk [vmem:[#allocation2 + $0x168] sm:$0xff] %vm310_vm2, %v998_v41 }
 0x128   : > { %v1384_v60 = vadd.f32 %v1383_v40, %v1382_v46  ;;  %v1581_v1 = vadd.f32 %v1580_v39, %v1579_v10  ;;  %v1504_v46 = vmul.f32 %v2515_v0, %v2515_v0  ;;  %v1272_v10 = vpack.c.bf16 %v2868_v23, %v2868_v23 }
 0x129   : > { %1074 = vst.msk [vmem:[#allocation2 + $0x1c0] sm:$0xff] %vm310_vm2, %v1009_v29  ;;  %v1010_v40 = vadd.f32 %v935_v24, %v432_v30  ;;  %v1588_v5 = vsel %vm310_vm2, %v1503_v50, 0.0  ;;  %v1393_v0 = vsel %vm310_vm2, %v2555_v49, 0.0  ;;  %v1397_v50 = vsel %vm310_vm2, %v2616_v57, 0.0 }
 0x12a   : > { %v1386_v13 = vadd.f32 %v1385_v36, %v1384_v60  ;;  %v1583_v12 = vadd.f32 %v1582_v45, %v1581_v1  ;;  %1325 = vst.msk [vmem:[%s2351_s8 + $0xac] sm:$0xf] %vm1281_vm3, %v1260_v28  ;;  %v1505_v60 = vmul.f32 %v2555_v49, %v2555_v49  ;;  %v1129_v1 = vld [vmem:[#allocation2 + $0x160] sm:$0xff]  ;;  %v1590_v36 = vsel %vm310_vm2, %v1504_v46, 0.0  ;;  %v422_v28 = vld [vmem:[#allocation2 + $0x178] sm:$0xff] }
 0x12b   : > { %v938_v38 = vpop.f32.mrf.mxu3  ;;  %1337 = vst.msk [vmem:[%s2351_s8 + $0xdc] sm:$0xf] %vm1281_vm3, %v1272_v10  ;;  %v2893_v24 = vadd.f32 %v2833_v17, %v1129_v1  ;;  %v1596_v29 = vsel %vm310_vm2, %v1507_v47, 0.0  ;;  %v1508_v30 = vmul.f32 %v2659_v52, %v2659_v52  ;;  %v1399_v57 = vsel %vm310_vm2, %v2659_v52, 0.0 }
 0x12c   : > { %v1388_v34 = vadd.f32 %v1387_v62, %v1386_v13  ;;  %v1585_v32 = vadd.f32 %v1584_v44, %v1583_v12  ;;  %1075 = vst.msk [vmem:[#allocation2 + $0x1c8] sm:$0xff] %vm310_vm2, %v1010_v40  ;;  %v1592_v44 = vsel %vm310_vm2, %v1505_v60, 0.0  ;;  %v1395_v13 = vsel %vm310_vm2, %v2582_v20, 0.0  ;;  %v433_v20 = vld [vmem:[#allocation2 + $0x1d0] sm:$0xff]  ;;  %v434_v60 = vld [vmem:[#allocation2 + $0x1d8] sm:$0xff] }
 0x12d   : > { %v1261_v8 = vpack.c.bf16 %v2893_v24, %v2893_v24  ;;  %v1594_v12 = vsel %vm310_vm2, %v1506_v2, 0.0  ;;  %v1011_v10 = vadd.f32 %v938_v38, %v433_v20  ;;  %v1598_v38 = vsel %vm310_vm2, %v1508_v30, 0.0 }
 0x12e   : > { %v1587_v56 = vadd.f32 %v1586_v26, %v1585_v32  ;;  %v1390_v39 = vadd.f32 %v1389_v42, %v1388_v34  ;;  %v421_v32 = vld [vmem:[#allocation2 + $0x170] sm:$0xff]  ;;  %v1401_v52 = vsel %vm310_vm2, %v2713_v43, 0.0 }
 0x12f   : > { %1326 = vst.msk [vmem:[%s2351_s8 + $0xb0] sm:$0xf] %vm1281_vm3, %v1261_v8  ;;  %v910_v41 = vpop.f32.mrf.mxu2  ;;  %v999_v46 = vadd.f32 %v908_v51, %v421_v32  ;;  %v1403_v8 = vsel %vm310_vm2, %v2753_v48, 0.0  ;;  %v1513_v32 = vmul.f32 %v2458_v18, %v2458_v18 }
 0x130   : > { %v1392_v3 = vadd.f32 %v1391_v54, %v1390_v39  ;;  %v1589_v45 = vadd.f32 %v1588_v5, %v1587_v56  ;;  %v1141_v49 = vld [vmem:[#allocation2 + $0x1c0] sm:$0xff]  ;;  %v1509_v39 = vmul.f32 %v2713_v43, %v2713_v43  ;;  %v1130_v5 = vld [vmem:[#allocation2 + $0x168] sm:$0xff]  ;;  %v1000_v54 = vadd.f32 %v910_v41, %v422_v28  ;;  %1076 = vst.msk [vmem:[#allocation2 + $0x1d0] sm:$0xff] %vm310_vm2, %v1011_v10 }
 0x131   : > { %v2916_v34 = vadd.f32 %v2833_v17, %v1141_v49  ;;  %1064 = vst.msk [vmem:[#allocation2 + $0x170] sm:$0xff] %vm310_vm2, %v999_v46  ;;  %v1405_v49 = vsel %vm310_vm2, %v2804_v14, 0.0  ;;  %v1407_v28 = vsel %vm310_vm2, %v2836_v9, 0.0  ;;  %v1409_v46 = vsel %vm310_vm2, %v2458_v18, 0.0 }
 0x132   : > { %v1394_v7 = vadd.f32 %v1393_v0, %v1392_v3  ;;  %v1591_v11 = vadd.f32 %v1590_v36, %v1589_v45  ;;  %v2925_v3 = vadd.f32 %v2833_v17, %v1130_v5  ;;  %v1510_v45 = vmul.f32 %v2753_v48, %v2753_v48  ;;  %1065 = vst.msk [vmem:[#allocation2 + $0x178] sm:$0xff] %vm310_vm2, %v1000_v54 }
 0x133   : > { %v940_v56 = vpop.f32.mrf.mxu3  ;;  %v1273_v40 = vpack.c.bf16 %v2916_v34, %v2916_v34  ;;  %v1142_v51 = vld [vmem:[#allocation2 + $0x1c8] sm:$0xff]  ;;  %v1600_v43 = vsel %vm310_vm2, %v1509_v39, 0.0  ;;  %v1512_v48 = vmul.f32 %v2836_v9, %v2836_v9  ;;  %v1514_v10 = vmul.f32 %v2472_v27, %v2472_v27 }
 0x134   : > { %v1396_v15 = vadd.f32 %v1395_v13, %v1394_v7  ;;  %v1593_v62 = vadd.f32 %v1592_v44, %v1591_v11  ;;  %v2936_v36 = vadd.f32 %v2833_v17, %v1142_v51  ;;  %v1262_v7 = vpack.c.bf16 %v2925_v3, %v2925_v3 }
 0x135   : > { %1338 = vst.msk [vmem:[%s2351_s8 + $0xe0] sm:$0xf] %vm1281_vm3, %v1273_v40  ;;  %v1012_v11 = vadd.f32 %v940_v56, %v434_v60  ;;  %v1511_v44 = vmul.f32 %v2804_v14, %v2804_v14  ;;  %v1606_v56 = vsel %vm310_vm2, %v1512_v48, 0.0  ;;  %v1515_v39 = vmul.f32 %v2512_v61, %v2512_v61 }
 0x136   : > { %v1398_v26 = vadd.f32 %v1397_v50, %v1396_v15  ;;  %v1595_v42 = vadd.f32 %v1594_v12, %v1593_v62  ;;  %v1274_v13 = vpack.c.bf16 %v2936_v36, %v2936_v36  ;;  %1327 = vst.msk [vmem:[%s2351_s8 + $0xb4] sm:$0xf] %vm1281_vm3, %v1262_v7  ;;  %v1602_v62 = vsel %vm310_vm2, %v1510_v45, 0.0  ;;  %v435_v7 = vld [vmem:[#allocation2 + $0x1e0] sm:$0xff] }
 0x137   : > { %1077 = vst.msk [vmem:[#allocation2 + $0x1d8] sm:$0xff] %vm310_vm2, %v1012_v11  ;;  %v1604_v20 = vsel %vm310_vm2, %v1511_v44, 0.0  ;;  %v1608_v60 = vsel %vm310_vm2, %v1513_v32, 0.0  ;;  %v1411_v18 = vsel %vm310_vm2, %v2472_v27, 0.0  ;;  %v1413_v45 = vsel %vm310_vm2, %v2512_v61, 0.0  ;;  %v436_v11 = vld [vmem:[#allocation2 + $0x1e8] sm:$0xff] }
 0x138   : > { %v1400_v1 = vadd.f32 %v1399_v57, %v1398_v26  ;;  %v1597_v2 = vadd.f32 %v1596_v29, %v1595_v42  ;;  %1339 = vst.msk [vmem:[%s2351_s8 + $0xe4] sm:$0xf] %vm1281_vm3, %v1274_v13  ;;  %v1131_v41 = vld [vmem:[#allocation2 + $0x170] sm:$0xff]  ;;  %v1415_v61 = vsel %vm310_vm2, %v2520_v6, 0.0 }
 0x139   : > { %v2965_v42 = vadd.f32 %v2833_v17, %v1131_v41  ;;  %v1143_v57 = vld [vmem:[#allocation2 + $0x1d0] sm:$0xff]  ;;  %v1132_v54 = vld [vmem:[#allocation2 + $0x178] sm:$0xff] }
 0x13a   : > { %v1402_v0 = vadd.f32 %v1401_v52, %v1400_v1  ;;  %v1599_v47 = vadd.f32 %v1598_v38, %v1597_v2  ;;  %v2980_v1 = vadd.f32 %v2833_v17, %v1143_v57  ;;  %v2983_v2 = vadd.f32 %v2833_v17, %v1132_v54 }
 0x13b   : > { %v943_v30 = vpop.f32.mrf.mxu3  ;;  %v1263_v5 = vpack.c.bf16 %v2965_v42, %v2965_v42  ;;  %v1610_v52 = vsel %vm310_vm2, %v1514_v10, 0.0  ;;  %v1421_v57 = vsel %vm310_vm2, %v2620_v63, 0.0  ;;  %v1423_v54 = vsel %vm310_vm2, %v2662_v55, 0.0 }
 0x13c   : > { %v1601_v12 = vadd.f32 %v1600_v43, %v1599_v47  ;;  %v1404_v15 = vadd.f32 %v1403_v8, %v1402_v0  ;;  %v1516_v0 = vmul.f32 %v2520_v6, %v2520_v6  ;;  %v1275_v27 = vpack.c.bf16 %v2980_v1, %v2980_v1 }
 0x13d   : > { %1328 = vst.msk [vmem:[%s2351_s8 + $0xb8] sm:$0xf] %vm1281_vm3, %v1263_v5  ;;  %v1612_v43 = vsel %vm310_vm2, %v1515_v39, 0.0  ;;  %v1264_v13 = vpack.c.bf16 %v2983_v2, %v2983_v2  ;;  %v1417_v6 = vsel %vm310_vm2, %v2558_v53, 0.0  ;;  %v1520_v39 = vmul.f32 %v2662_v55, %v2662_v55 }
 0x13e   : > { %v1603_v50 = vadd.f32 %v1602_v62, %v1601_v12  ;;  %v1406_v29 = vadd.f32 %v1405_v49, %v1404_v15  ;;  %v1144_v47 = vld [vmem:[#allocation2 + $0x1d8] sm:$0xff]  ;;  %v1517_v15 = vmul.f32 %v2558_v53, %v2558_v53  ;;  %1340 = vst.msk [vmem:[%s2351_s8 + $0xe8] sm:$0xf] %vm1281_vm3, %v1275_v27  ;;  %v1013_v49 = vadd.f32 %v943_v30, %v435_v7 }
 0x13f   : > { %v3004_v62 = vadd.f32 %v2833_v17, %v1144_v47  ;;  %1329 = vst.msk [vmem:[%s2351_s8 + $0xbc] sm:$0xf] %vm1281_vm3, %v1264_v13  ;;  %v1614_v32 = vsel %vm310_vm2, %v1516_v0, 0.0  ;;  %v1519_v53 = vmul.f32 %v2620_v63, %v2620_v63  ;;  %v1425_v63 = vsel %vm310_vm2, %v2720_v58, 0.0 }
 0x140   : > { %v1605_v14 = vadd.f32 %v1604_v20, %v1603_v50  ;;  %v1408_v26 = vadd.f32 %v1407_v28, %v1406_v29  ;;  %v1518_v20 = vmul.f32 %v2585_v21, %v2585_v21  ;;  %1078 = vst.msk [vmem:[#allocation2 + $0x1e0] sm:$0xff] %vm310_vm2, %v1013_v49  ;;  %v1524_v49 = vmul.f32 %v2859_v16, %v2859_v16 }
 0x141   : > { %v1276_v28 = vpack.c.bf16 %v3004_v62, %v3004_v62 }
 0x142   : > { %v1410_v9 = vadd.f32 %v1409_v46, %v1408_v26  ;;  %v1607_v40 = vadd.f32 %v1606_v56, %v1605_v14  ;;  %v1616_v14 = vsel %vm310_vm2, %v1517_v15, 0.0  ;;  %v1419_v26 = vsel %vm310_vm2, %v2585_v21, 0.0 }
 0x143   : > { %v945_v12 = vpop.f32.mrf.mxu3  ;;  %1341 = vst.msk [vmem:[%s2351_s8 + $0xec] sm:$0xf] %vm1281_vm3, %v1276_v28  ;;  %v1618_v56 = vsel %vm310_vm2, %v1518_v20, 0.0  ;;  %v1620_v21 = vsel %vm310_vm2, %v1519_v53, 0.0  ;;  %v1429_v15 = vsel %vm310_vm2, %v2823_v33, 0.0  ;;  %v1431_v28 = vsel %vm310_vm2, %v2859_v16, 0.0 }
 0x144   : > { %v1412_v51 = vadd.f32 %v1411_v18, %v1410_v9  ;;  %v1609_v38 = vadd.f32 %v1608_v60, %v1607_v40  ;;  %v1014_v29 = vadd.f32 %v945_v12, %v436_v11  ;;  %v1521_v60 = vmul.f32 %v2720_v58, %v2720_v58 }
 0x145   : > { %v1523_v58 = vmul.f32 %v2823_v33, %v2823_v33  ;;  %v1525_v33 = vmul.f32 %v2893_v24, %v2893_v24  ;;  %v1433_v53 = vsel %vm310_vm2, %v2893_v24, 0.0  ;;  %v1437_v24 = vsel %vm310_vm2, %v2965_v42, 0.0 }
 0x146   : > { %v1414_v8 = vadd.f32 %v1413_v45, %v1412_v51  ;;  %v1611_v44 = vadd.f32 %v1610_v52, %v1609_v38  ;;  %1079 = vst.msk [vmem:[#allocation2 + $0x1e8] sm:$0xff] %vm310_vm2, %v1014_v29  ;;  %v1622_v52 = vsel %vm310_vm2, %v1520_v39, 0.0  ;;  %v1522_v45 = vmul.f32 %v2773_v4, %v2773_v4 }
 0x147   : > { %v1145_v38 = vld [vmem:[#allocation2 + $0x1e0] sm:$0xff]  ;;  %v1624_v11 = vsel %vm310_vm2, %v1521_v60, 0.0  ;;  %v1628_v20 = vsel %vm310_vm2, %v1523_v58, 0.0  ;;  %v1527_v39 = vmul.f32 %v2965_v42, %v2965_v42 }
 0x148   : > { %v1416_v48 = vadd.f32 %v1415_v61, %v1414_v8  ;;  %v1613_v50 = vadd.f32 %v1612_v43, %v1611_v44  ;;  %v3040_v0 = vadd.f32 %v2833_v17, %v1145_v38  ;;  %v1427_v43 = vsel %vm310_vm2, %v2773_v4, 0.0  ;;  %v437_v4 = vld [vmem:[#allocation2 + $0x1f0] sm:$0xff] }
 0x149   : > { %v1626_v61 = vsel %vm310_vm2, %v1522_v45, 0.0 }
 0x14a   : > { %v1418_v30 = vadd.f32 %v1417_v6, %v1416_v48  ;;  %v1615_v41 = vadd.f32 %v1614_v32, %v1613_v50  ;;  %v1277_v8 = vpack.c.bf16 %v3040_v0, %v3040_v0  ;;  %v438_v48 = vld [vmem:[#allocation2 + $0x1f8] sm:$0xff] }
 0x14b   : > { %v948_v5 = vpop.f32.mrf.mxu3 }
 0x14c   : > { %v1617_v46 = vadd.f32 %v1616_v14, %v1615_v41  ;;  %v1420_v10 = vadd.f32 %v1419_v26, %v1418_v30  ;;  %1342 = vst.msk [vmem:[%s2351_s8 + $0xf0] sm:$0xf] %vm1281_vm3, %v1277_v8  ;;  %v1015_v32 = vadd.f32 %v948_v5, %v437_v4  ;;  %v1630_v26 = vsel %vm310_vm2, %v1524_v49, 0.0 }
 0x14d   : > { %v1146_v27 = vld [vmem:[#allocation2 + $0x1e8] sm:$0xff]  ;;  %v1532_v49 = vmul.f32 %v2671_v31, %v2671_v31 }
 0x14e   : > { %v1422_v9 = vadd.f32 %v1421_v57, %v1420_v10  ;;  %v1619_v40 = vadd.f32 %v1618_v56, %v1617_v46  ;;  %v3043_v7 = vadd.f32 %v2833_v17, %v1146_v27  ;;  %1080 = vst.msk [vmem:[#allocation2 + $0x1f0] sm:$0xff] %vm310_vm2, %v1015_v32  ;;  %v1526_v46 = vmul.f32 %v2925_v3, %v2925_v3 }
 0x14f   : > { %v1632_v56 = vsel %vm310_vm2, %v1525_v33, 0.0  ;;  %v1435_v57 = vsel %vm310_vm2, %v2925_v3, 0.0  ;;  %v1636_v3 = vsel %vm310_vm2, %v1527_v39, 0.0  ;;  %v1441_v27 = vsel %vm310_vm2, %v2563_v59, 0.0 }
 0x150   : > { %v1424_v18 = vadd.f32 %v1423_v54, %v1422_v9  ;;  %v1621_v51 = vadd.f32 %v1620_v21, %v1619_v40  ;;  %v1278_v12 = vpack.c.bf16 %v3043_v7, %v3043_v7  ;;  %v1634_v5 = vsel %vm310_vm2, %v1526_v46, 0.0 }
 0x151   : > { %v1528_v21 = vmul.f32 %v2983_v2, %v2983_v2  ;;  %v1537_v39 = vmul.f32 %v2916_v34, %v2916_v34 }
 0x152   : > { %v1426_v55 = vadd.f32 %v1425_v63, %v1424_v18  ;;  %v1623_v47 = vadd.f32 %v1622_v52, %v1621_v51  ;;  %1343 = vst.msk [vmem:[%s2351_s8 + $0xf4] sm:$0xf] %vm1281_vm3, %v1278_v12  ;;  %v1529_v18 = vmul.f32 %v2563_v59, %v2563_v59  ;;  %v1439_v51 = vsel %vm310_vm2, %v2983_v2, 0.0 }
 0x153   : > { %v950_v6 = vpop.f32.mrf.mxu3  ;;  %v1531_v59 = vmul.f32 %v2643_v35, %v2643_v35 }
 0x154   : > { %v1428_v44 = vadd.f32 %v1427_v43, %v1426_v55  ;;  %v1625_v13 = vadd.f32 %v1624_v11, %v1623_v47  ;;  %v1016_v30 = vadd.f32 %v950_v6, %v438_v48  ;;  %v1530_v55 = vmul.f32 %v2590_v22, %v2590_v22 }
 0x155   : > { %v1147_v38 = vld [vmem:[#allocation2 + $0x1f0] sm:$0xff]  ;;  %v1638_v47 = vsel %vm310_vm2, %v1528_v21, 0.0  ;;  %v1640_v8 = vsel %vm310_vm2, %v1529_v18, 0.0  ;;  %v1644_v48 = vsel %vm310_vm2, %v1531_v59, 0.0  ;;  %v1539_v18 = vmul.f32 %v2980_v1, %v2980_v1 }
 0x156   : > { %v1430_v50 = vadd.f32 %v1429_v15, %v1428_v44  ;;  %v1627_v29 = vadd.f32 %v1626_v61, %v1625_v13  ;;  %1081 = vst.msk [vmem:[#allocation2 + $0x1f8] sm:$0xff] %vm310_vm2, %v1016_v30  ;;  %v3091_v45 = vadd.f32 %v2833_v17, %v1147_v38  ;;  %v1443_v44 = vsel %vm310_vm2, %v2590_v22, 0.0 }
 0x157   : > { %v1445_v15 = vsel %vm310_vm2, %v2643_v35, 0.0  ;;  %v1449_v35 = vsel %vm310_vm2, %v2731_v19, 0.0 }
 0x158   : > { %v1432_v41 = vadd.f32 %v1431_v28, %v1430_v50  ;;  %v1629_v14 = vadd.f32 %v1628_v20, %v1627_v29  ;;  %v1279_v58 = vpack.c.bf16 %v3091_v45, %v3091_v45  ;;  %v1447_v50 = vsel %vm310_vm2, %v2671_v31, 0.0 }
 0x159   : > { %v1533_v29 = vmul.f32 %v2731_v19, %v2731_v19  ;;  %v1646_v20 = vsel %vm310_vm2, %v1532_v49, 0.0  ;;  %v1534_v28 = vmul.f32 %v2776_v37, %v2776_v37  ;;  %v1451_v31 = vsel %vm310_vm2, %v2776_v37, 0.0 }
 0x15a   : > { %v1631_v10 = vadd.f32 %v1630_v26, %v1629_v14  ;;  %v1434_v16 = vadd.f32 %v1433_v53, %v1432_v41  ;;  %1344 = vst.msk [vmem:[%s2351_s8 + $0xf8] sm:$0xf] %vm1281_vm3, %v1279_v58  ;;  %v1535_v14 = vmul.f32 %v2826_v25, %v2826_v25  ;;  %v1453_v19 = vsel %vm310_vm2, %v2826_v25, 0.0 }
 0x15b   : > { %v1648_v41 = vsel %vm310_vm2, %v1533_v29, 0.0  ;;  %v1650_v46 = vsel %vm310_vm2, %v1534_v28, 0.0  ;;  %v1455_v37 = vsel %vm310_vm2, %v2868_v23, 0.0  ;;  %v1457_v25 = vsel %vm310_vm2, %v2916_v34, 0.0 }
 0x15c   : > { %v1633_v9 = vadd.f32 %v1632_v56, %v1631_v10  ;;  %v1436_v40 = vadd.f32 %v1435_v57, %v1434_v16  ;;  %v1536_v10 = vmul.f32 %v2868_v23, %v2868_v23  ;;  %v1652_v57 = vsel %vm310_vm2, %v1535_v14, 0.0 }
 0x15d   : > { %v1148_v42 = vld [vmem:[#allocation2 + $0x1f8] sm:$0xff]  ;;  %v1459_v23 = vsel %vm310_vm2, %v2936_v36, 0.0  ;;  %v1461_v34 = vsel %vm310_vm2, %v2980_v1, 0.0  ;;  %v1465_v1 = vsel %vm310_vm2, %v3040_v0, 0.0  ;;  %v1542_v58 = vmul.f32 %v3043_v7, %v3043_v7 }
 0x15e   : > { %v1635_v54 = vadd.f32 %v1634_v5, %v1633_v9  ;;  %v1438_v60 = vadd.f32 %v1437_v24, %v1436_v40  ;;  %v3099_v11 = vadd.f32 %v2833_v17, %v1148_v42  ;;  %v1642_v17 = vsel %vm310_vm2, %v1530_v55, 0.0 }
 0x15f   : > { %v1654_v5 = vsel %vm310_vm2, %v1536_v10, 0.0  ;;  %v1538_v24 = vmul.f32 %v2936_v36, %v2936_v36  ;;  %v1463_v36 = vsel %vm310_vm2, %v3004_v62, 0.0  ;;  %v1541_v55 = vmul.f32 %v3040_v0, %v3040_v0 }
 0x160   : > { %v1637_v52 = vadd.f32 %v1636_v3, %v1635_v54  ;;  %v1440_v63 = vadd.f32 %v1439_v51, %v1438_v60  ;;  %v1280_v13 = vpack.c.bf16 %v3099_v11, %v3099_v11  ;;  %v1656_v60 = vsel %vm310_vm2, %v1537_v39, 0.0 }
 0x161   : > { %v1658_v38 = vsel %vm310_vm2, %v1538_v24, 0.0  ;;  %v1664_v59 = vsel %vm310_vm2, %v1541_v55, 0.0  ;;  %v1469_v0 = vsel %vm310_vm2, %v3091_v45, 0.0 }
 0x162   : > { %v1442_v2 = vadd.f32 %v1441_v27, %v1440_v63  ;;  %v1639_v43 = vadd.f32 %v1638_v47, %v1637_v52  ;;  %1345 = vst.msk [vmem:[%s2351_s8 + $0xfc] sm:$0xf] %vm1281_vm3, %v1280_v13  ;;  %v1540_v52 = vmul.f32 %v3004_v62, %v3004_v62  ;;  %v1660_v27 = vsel %vm310_vm2, %v1539_v18, 0.0 }
 0x163   : > { %v1467_v62 = vsel %vm310_vm2, %v3043_v7, 0.0  ;;  %v1543_v13 = vmul.f32 %v3091_v45, %v3091_v45  ;;  %v1471_v7 = vsel %vm310_vm2, %v3099_v11, 0.0 }
 0x164   : > { %v1444_v12 = vadd.f32 %v1443_v44, %v1442_v2  ;;  %v1641_v61 = vadd.f32 %v1640_v8, %v1639_v43  ;;  %v1662_v43 = vsel %vm310_vm2, %v1540_v52, 0.0 }
 0x166   : > { %v1446_v22 = vadd.f32 %v1445_v15, %v1444_v12  ;;  %v1643_v4 = vadd.f32 %v1642_v17, %v1641_v61  ;;  %v1666_v17 = vsel %vm310_vm2, %v1542_v58, 0.0  ;;  %v1544_v15 = vmul.f32 %v3099_v11, %v3099_v11 }
 0x168   : > { %v1448_v32 = vadd.f32 %v1447_v50, %v1446_v22  ;;  %v1645_v6 = vadd.f32 %v1644_v48, %v1643_v4  ;;  %v1668_v4 = vsel %vm310_vm2, %v1543_v13, 0.0  ;;  %v1670_v29 = vsel %vm310_vm2, %v1544_v15, 0.0 }
 0x16a   : > { %v1450_v33 = vadd.f32 %v1449_v35, %v1448_v32  ;;  %v1647_v30 = vadd.f32 %v1646_v20, %v1645_v6 }
 0x16c   : > { %v1649_v26 = vadd.f32 %v1648_v41, %v1647_v30  ;;  %v1452_v53 = vadd.f32 %v1451_v31, %v1450_v33 }
 0x16e   : > { %v1454_v16 = vadd.f32 %v1453_v19, %v1452_v53  ;;  %v1651_v56 = vadd.f32 %v1650_v46, %v1649_v26 }
 0x170   : > { %v1456_v9 = vadd.f32 %v1455_v37, %v1454_v16  ;;  %v1653_v40 = vadd.f32 %v1652_v57, %v1651_v56 }
 0x172   : > { %v1458_v21 = vadd.f32 %v1457_v25, %v1456_v9  ;;  %v1655_v54 = vadd.f32 %v1654_v5, %v1653_v40 }
 0x174   : > { %v1460_v3 = vadd.f32 %v1459_v23, %v1458_v21  ;;  %v1657_v51 = vadd.f32 %v1656_v60, %v1655_v54 }
 0x176   : > { %v1462_v63 = vadd.f32 %v1461_v34, %v1460_v3  ;;  %v1659_v42 = vadd.f32 %v1658_v38, %v1657_v51 }
 0x178   : > { %v1464_v47 = vadd.f32 %v1463_v36, %v1462_v63  ;;  %v1661_v2 = vadd.f32 %v1660_v27, %v1659_v42 }
 0x17a   : > { %v1663_v8 = vadd.f32 %v1662_v43, %v1661_v2  ;;  %v1466_v44 = vadd.f32 %v1465_v1, %v1464_v47 }
 0x17c   : > { %v1665_v12 = vadd.f32 %v1664_v59, %v1663_v8  ;;  %v1468_v61 = vadd.f32 %v1467_v62, %v1466_v44 }
 0x17e   : > { %v1667_v49 = vadd.f32 %v1666_v17, %v1665_v12  ;;  %v1470_v22 = vadd.f32 %v1469_v0, %v1468_v61 }
 0x180   : > { %v1669_v48 = vadd.f32 %v1668_v4, %v1667_v49  ;;  %v1472_v50 = vadd.f32 %v1471_v7, %v1470_v22 }
 0x182   : > { %v1473_v32 = vrot.slane %v1472_v50, 4  ;;  %v1671_v6 = vadd.f32 %v1670_v29, %v1669_v48 }
 0x184   : > { %v1474_v20 = vadd.f32 %v1473_v32, %v1472_v50  ;;  %v1672_v45 = vrot.slane %v1671_v6, 4 }
 0x186   : > { %v1475_v35 = vrot.slane %v1474_v20, 2  ;;  %v1673_v28 = vadd.f32 %v1672_v45, %v1671_v6 }
 0x188   : > { %v1476_v33 = vadd.f32 %v1475_v35, %v1474_v20  ;;  %v1674_v30 = vrot.slane %v1673_v28, 2 }
 0x18a   : > { %v1477_v41 = vrot.slane %v1476_v33, 1  ;;  %v1675_v31 = vadd.f32 %v1674_v30, %v1673_v28 }
 0x18c   : > { %v1478_v11 = vadd.f32 %v1477_v41, %v1476_v33  ;;  %v1676_v14 = vrot.slane %v1675_v31, 1 }
 0x18e   : > { %1480 = vst.msk [vmem:[%s304_s14] sm:$0x1] %vm1479_vm4, %v1478_v11  ;;  %v1677_v26 = vadd.f32 %v1676_v14, %v1675_v31 }
 0x190   : > { %1678 = vst.msk [vmem:[%s304_s14 + $0x1] sm:$0x1] %vm1479_vm4, %v1677_v26 }
 0x191 PF: > { %s15_s17 = sadd.s32 1, %s2105_s17   ;;  %s3202_s15 = smov %s2101_s16 }
 0x192   : > { %p12_p6 = scmp.ge.s32.totalorder %s15_s17, 6   ;;  %s3203_s16 = smov %s3205_s18 }
 0x194   :  { %14 = sbr.rel (!%p12_p6) target bundleno = 2 (0x2), region = 88 }

</bundles_post_ra>
